<compile_context>
chip_gen: v5e
topology: v5e:2x2
jax: 0.10.0
libtpu: 0.0.40
codegen_flags: <defaults>
</compile_context>

<pallas_src>
import functools
import math

import jax
import jax.numpy as jnp
from jax.experimental import pallas as pl
from jax.experimental.pallas import tpu as pltpu


def _mix32(h):
    """Murmur3-style 32-bit finalizer (uint32 -> uint32, good avalanche)."""
    h = h ^ (h >> 16)
    h = h * jnp.uint32(0x7FEB352D)
    h = h ^ (h >> 15)
    h = h * jnp.uint32(0x846CA68B)
    h = h ^ (h >> 16)
    return h


def _gaussian_dropout_kernel(seed_ref, x_ref, o_ref, *, alpha, block_rows):
    rows, cols = x_ref.shape
    tile = pl.program_id(0)

    # Global (row, col) coordinate of every element in this tile: unique over
    # the whole array -> independent noise per element and per tile.
    row = jax.lax.broadcasted_iota(jnp.int32, (rows, cols), 0) + tile * block_rows
    col = jax.lax.broadcasted_iota(jnp.int32, (rows, cols), 1)
    row = row.astype(jnp.uint32)
    col = col.astype(jnp.uint32)
    seed = seed_ref[0].astype(jnp.uint32)

    def uniform01(salt):
        h = (row * jnp.uint32(0x01000193)) ^ (col * jnp.uint32(0x85EBCA6B))
        h = h + seed * jnp.uint32(0x9E3779B9) + jnp.uint32(salt)
        h = _mix32(h)
        # Top 23 bits -> float strictly inside (0, 1)  (safe for log()).
        top = (h >> 9).astype(jnp.int32).astype(jnp.float32)
        return (top + jnp.float32(0.5)) * jnp.float32(1.0 / (1 << 23))

    u1 = uniform01(0x68BC21EB)
    u2 = uniform01(0x02E5BE93)
    # Box-Muller: exact standard normal. EUP/VPU work hidden under the DMA.
    radius = jnp.sqrt(jnp.float32(-2.0) * jnp.log(u1))
    z = radius * jnp.cos(jnp.float32(2.0 * math.pi) * u2)

    eps = z * jnp.float32(alpha) + jnp.float32(1.0)
    o_ref[...] = (x_ref[...].astype(jnp.float32) * eps).astype(o_ref.dtype)


def gaussian_dropout(x, seed: int, alpha: float = 1.0, training: bool = True):
    """y = x * (N(0,1) * alpha + 1) elementwise; same shape/dtype as x."""
    if not training:
        # NOTE: the original module never actually reaches the eval branch
        # (self.train() is always truthy); kept only as wrapper convenience.
        return x

    orig_shape = x.shape
    orig_dtype = x.dtype

    flat = x.reshape(-1)
    n = flat.shape[0]

    # Pick a lane-dense 2D view (wide last dim, multiple of 128).  Prefer a
    # width that divides n exactly so no pad / slice round trip is needed.
    lane_w = None
    for cand in (2048, 1024, 512, 256, 128):
        if n % cand == 0:
            lane_w = cand
            break
    padded = False
    if lane_w is None:
        lane_w = 1024
        flat = jnp.pad(flat, (0, (-n) % lane_w))
        padded = True
    rows = flat.shape[0] // lane_w
    x2d = flat.reshape(rows, lane_w)

    # ~2 MiB (f32) blocks: with input+output double-buffered this is ~8 MiB of
    # VMEM -> safe under every generation's default scoped-VMEM limit (16 MiB
    # v5e, 32 MiB v6e/v7x) while sitting on the flat part of the HBM roofline.
    max_block_elems = 512 * 1024
    cap_rows = max(8, (max_block_elems // lane_w) // 8 * 8)
    if rows <= cap_rows:
        block_rows = rows                      # single full-extent block
        grid = (1,)
    else:
        block_rows = cap_rows                  # multiple of 8; ragged tail OK
        grid = (pl.cdiv(rows, block_rows),)

    seed_arr = jnp.asarray([seed], dtype=jnp.int32)
    kernel = functools.partial(
        _gaussian_dropout_kernel, alpha=float(alpha), block_rows=block_rows)

    out2d = pl.pallas_call(
        kernel,
        out_shape=jax.ShapeDtypeStruct((rows, lane_w), orig_dtype),
        grid_spec=pltpu.PrefetchScalarGridSpec(
            num_scalar_prefetch=1,
            grid=grid,
            in_specs=[pl.BlockSpec((block_rows, lane_w), lambda i, seed: (i, 0))],
            out_specs=pl.BlockSpec((block_rows, lane_w), lambda i, seed: (i, 0)),
        ),
        compiler_params=pltpu.CompilerParams(
            # Tiles are fully independent (stateless hash PRNG) -> parallel,
            # so v7x's two TensorCores each take half of the grid.
            dimension_semantics=("parallel",),
        ),
    )(seed_arr, x2d)

    out_flat = out2d.reshape(-1)
    if padded:
        out_flat = out_flat[:n]
    return out_flat.reshape(orig_shape)


if __name__ == "__main__":
    alpha = 1.0  # module __init__ default

    key = jax.random.PRNGKey(0)
    x = jax.random.normal(key, (2, 4, 16, 16), dtype=jnp.float32)  # NCHW

    y = gaussian_dropout(x, seed=0, alpha=alpha, training=True)
    y = jax.block_until_ready(y)

    assert y.shape == x.shape and y.dtype == x.dtype
    assert bool(jnp.all(jnp.isfinite(y)))
    print("KERNEL_OK")
</pallas_src>

<mosaic_0001>
module attributes {stable_mosaic.version = 11 : i64} {
  func.func @_gaussian_dropout_kernel(%arg0: i32, %arg1: memref<1xi32, #tpu.memory_space<smem>>, %arg2: memref<1x2048xf32, #tpu.memory_space<vmem>>, %arg3: memref<1x2048xf32, #tpu.memory_space<vmem>>) attributes {dimension_semantics = [#tpu.dimension_semantics<parallel>], iteration_bounds = array<i64: 1>, scalar_prefetch = 1 : i64, scratch_operands = 0 : i64, tpu.core_type = #tpu.core_type<tc>, window_params = [{transform_indices = @transform_0, window_bounds = array<i64: 1, 2048>}, {transform_indices = @transform_1, window_bounds = array<i64: 1, 2048>}]} {
    %0 = tpu.iota {dimensions = array<i32: 0>} : vector<1x2048xi32>
    %c1_i32 = arith.constant 1 : i32
    %1 = arith.muli %arg0, %c1_i32 : i32
    %2 = vector.broadcast %1 : i32 to vector<1x2048xi32>
    %3 = arith.addi %0, %2 : vector<1x2048xi32>
    %4 = tpu.iota {dimensions = array<i32: 1>} : vector<1x2048xi32>
    %c0 = arith.constant 0 : index
    %5 = memref.load %arg1[%c0] : memref<1xi32, #tpu.memory_space<smem>>
    %c16777619_i32 = arith.constant 16777619 : i32
    %6 = vector.broadcast %c16777619_i32 : i32 to vector<1x2048xi32>
    %7 = arith.muli %3, %6 : vector<1x2048xi32>
    %c-2048144789_i32 = arith.constant -2048144789 : i32
    %8 = vector.broadcast %c-2048144789_i32 : i32 to vector<1x2048xi32>
    %9 = arith.muli %4, %8 : vector<1x2048xi32>
    %10 = arith.xori %7, %9 : vector<1x2048xi32>
    %c-1640531527_i32 = arith.constant -1640531527 : i32
    %11 = arith.muli %5, %c-1640531527_i32 : i32
    %12 = vector.broadcast %11 : i32 to vector<1x2048xi32>
    %13 = arith.addi %10, %12 : vector<1x2048xi32>
    %c1757159915_i32 = arith.constant 1757159915 : i32
    %14 = vector.broadcast %c1757159915_i32 : i32 to vector<1x2048xi32>
    %15 = arith.addi %13, %14 : vector<1x2048xi32>
    %c16_i32 = arith.constant 16 : i32
    %16 = vector.broadcast %c16_i32 : i32 to vector<1x2048xi32>
    %17 = arith.shrui %15, %16 : vector<1x2048xi32>
    %18 = arith.xori %15, %17 : vector<1x2048xi32>
    %c2146121005_i32 = arith.constant 2146121005 : i32
    %19 = vector.broadcast %c2146121005_i32 : i32 to vector<1x2048xi32>
    %20 = arith.muli %18, %19 : vector<1x2048xi32>
    %c15_i32 = arith.constant 15 : i32
    %21 = vector.broadcast %c15_i32 : i32 to vector<1x2048xi32>
    %22 = arith.shrui %20, %21 : vector<1x2048xi32>
    %23 = arith.xori %20, %22 : vector<1x2048xi32>
    %c-2073254261_i32 = arith.constant -2073254261 : i32
    %24 = vector.broadcast %c-2073254261_i32 : i32 to vector<1x2048xi32>
    %25 = arith.muli %23, %24 : vector<1x2048xi32>
    %c16_i32_0 = arith.constant 16 : i32
    %26 = vector.broadcast %c16_i32_0 : i32 to vector<1x2048xi32>
    %27 = arith.shrui %25, %26 : vector<1x2048xi32>
    %28 = arith.xori %25, %27 : vector<1x2048xi32>
    %c9_i32 = arith.constant 9 : i32
    %29 = vector.broadcast %c9_i32 : i32 to vector<1x2048xi32>
    %30 = arith.shrui %28, %29 : vector<1x2048xi32>
    %31 = arith.sitofp %30 : vector<1x2048xi32> to vector<1x2048xf32>
    %cst = arith.constant 5.000000e-01 : f32
    %32 = vector.broadcast %cst : f32 to vector<1x2048xf32>
    %33 = arith.addf %31, %32 : vector<1x2048xf32>
    %cst_1 = arith.constant 1.1920929E-7 : f32
    %34 = vector.broadcast %cst_1 : f32 to vector<1x2048xf32>
    %35 = arith.mulf %33, %34 : vector<1x2048xf32>
    %c16777619_i32_2 = arith.constant 16777619 : i32
    %36 = vector.broadcast %c16777619_i32_2 : i32 to vector<1x2048xi32>
    %37 = arith.muli %3, %36 : vector<1x2048xi32>
    %c-2048144789_i32_3 = arith.constant -2048144789 : i32
    %38 = vector.broadcast %c-2048144789_i32_3 : i32 to vector<1x2048xi32>
    %39 = arith.muli %4, %38 : vector<1x2048xi32>
    %40 = arith.xori %37, %39 : vector<1x2048xi32>
    %c-1640531527_i32_4 = arith.constant -1640531527 : i32
    %41 = arith.muli %5, %c-1640531527_i32_4 : i32
    %42 = vector.broadcast %41 : i32 to vector<1x2048xi32>
    %43 = arith.addi %40, %42 : vector<1x2048xi32>
    %c48610963_i32 = arith.constant 48610963 : i32
    %44 = vector.broadcast %c48610963_i32 : i32 to vector<1x2048xi32>
    %45 = arith.addi %43, %44 : vector<1x2048xi32>
    %c16_i32_5 = arith.constant 16 : i32
    %46 = vector.broadcast %c16_i32_5 : i32 to vector<1x2048xi32>
    %47 = arith.shrui %45, %46 : vector<1x2048xi32>
    %48 = arith.xori %45, %47 : vector<1x2048xi32>
    %c2146121005_i32_6 = arith.constant 2146121005 : i32
    %49 = vector.broadcast %c2146121005_i32_6 : i32 to vector<1x2048xi32>
    %50 = arith.muli %48, %49 : vector<1x2048xi32>
    %c15_i32_7 = arith.constant 15 : i32
    %51 = vector.broadcast %c15_i32_7 : i32 to vector<1x2048xi32>
    %52 = arith.shrui %50, %51 : vector<1x2048xi32>
    %53 = arith.xori %50, %52 : vector<1x2048xi32>
    %c-2073254261_i32_8 = arith.constant -2073254261 : i32
    %54 = vector.broadcast %c-2073254261_i32_8 : i32 to vector<1x2048xi32>
    %55 = arith.muli %53, %54 : vector<1x2048xi32>
    %c16_i32_9 = arith.constant 16 : i32
    %56 = vector.broadcast %c16_i32_9 : i32 to vector<1x2048xi32>
    %57 = arith.shrui %55, %56 : vector<1x2048xi32>
    %58 = arith.xori %55, %57 : vector<1x2048xi32>
    %c9_i32_10 = arith.constant 9 : i32
    %59 = vector.broadcast %c9_i32_10 : i32 to vector<1x2048xi32>
    %60 = arith.shrui %58, %59 : vector<1x2048xi32>
    %61 = arith.sitofp %60 : vector<1x2048xi32> to vector<1x2048xf32>
    %cst_11 = arith.constant 5.000000e-01 : f32
    %62 = vector.broadcast %cst_11 : f32 to vector<1x2048xf32>
    %63 = arith.addf %61, %62 : vector<1x2048xf32>
    %cst_12 = arith.constant 1.1920929E-7 : f32
    %64 = vector.broadcast %cst_12 : f32 to vector<1x2048xf32>
    %65 = arith.mulf %63, %64 : vector<1x2048xf32>
    %66 = math.log %35 : vector<1x2048xf32>
    %cst_13 = arith.constant -2.000000e+00 : f32
    %67 = vector.broadcast %cst_13 : f32 to vector<1x2048xf32>
    %68 = arith.mulf %67, %66 : vector<1x2048xf32>
    %69 = math.sqrt %68 : vector<1x2048xf32>
    %cst_14 = arith.constant 6.28318548 : f32
    %70 = vector.broadcast %cst_14 : f32 to vector<1x2048xf32>
    %71 = arith.mulf %70, %65 : vector<1x2048xf32>
    %72 = math.cos %71 : vector<1x2048xf32>
    %73 = arith.mulf %69, %72 : vector<1x2048xf32>
    %cst_15 = arith.constant 1.000000e+00 : f32
    %74 = vector.broadcast %cst_15 : f32 to vector<1x2048xf32>
    %75 = arith.mulf %73, %74 : vector<1x2048xf32>
    %cst_16 = arith.constant 1.000000e+00 : f32
    %76 = vector.broadcast %cst_16 : f32 to vector<1x2048xf32>
    %77 = arith.addf %75, %76 : vector<1x2048xf32>
    %c0_17 = arith.constant 0 : index
    %c0_18 = arith.constant 0 : index
    %78 = vector.load %arg2[%c0_17, %c0_18] : memref<1x2048xf32, #tpu.memory_space<vmem>>, vector<1x2048xf32>
    %79 = arith.mulf %78, %77 : vector<1x2048xf32>
    %c0_19 = arith.constant 0 : index
    %c0_20 = arith.constant 0 : index
    %80 = vector.load %arg3[%c0_19, %c0_20] : memref<1x2048xf32, #tpu.memory_space<vmem>>, vector<1x2048xf32>
    tpu.vector_store %arg3[%c0_19, %c0_20], %79 {strides = array<i32>} : memref<1x2048xf32, #tpu.memory_space<vmem>>, vector<1x2048xf32>,
    return
  }
  func.func @transform_0(%arg0: i32, %arg1: memref<1xi32, #tpu.memory_space<smem>>) -> (i32, i32) {
    %c0_i32 = arith.constant 0 : i32
    %c0_i32_0 = arith.constant 0 : i32
    return %arg0, %c0_i32 : i32, i32
  }
  func.func @transform_1(%arg0: i32, %arg1: memref<1xi32, #tpu.memory_space<smem>>) -> (i32, i32) {
    %c0_i32 = arith.constant 0 : i32
    %c0_i32_0 = arith.constant 0 : i32
    return %arg0, %c0_i32 : i32, i32
  }
}

</mosaic_0001>

<bundles_post_ra>
// kernel: tpu_custom_call.1
= control target key start
LH: loop header
LB: loop body
LE: loop exit
PB: predicated region body
PF: predicated region fallthrough
CT: control target
= control target key end

     0   :  { %8 = vsyncpa [#allocation5], 0  ;;  %s6890_s0 = inlined_call_operand.<no memory space> [shape: s32[1], index: 0, kind: input, shape index: {}]   ;;  %s6891_s1 = inlined_call_operand.hbm [shape: f32[1,2048], index: 1, kind: input, shape index: {}]   ;;  %s6892_s2 = inlined_call_operand.hbm [shape: f32[1,2048], index: 2, kind: output, shape index: {}]  }
   0x1   :  { %9 = vsyncpa [#allocation6], 0  ;;  %s15_s11 = sshll.u32 %s6891_s1, 4  ;;  %s3515_s12 = smov [#allocation4]   ;;  %s16_s11 = int_to_ptr.hbm [resolvable:$true] %s15_s11 }
   0x2   :  { %s17_s13 = sshll.u32 %s3515_s12, 4  ;;  %s18_s13 = int_to_ptr.vmem [resolvable:$true] %s17_s13 }
   0x3   :  { %20 = dma.hbm_to_vmem [thread:$0]  %s16_s11, 256, %s18_s13, [#allocation5]  }
   0x4   :  { %3511 = dma.done.wait [#allocation5], 256  }
   0x5   :  { %3512 = vsyncadd [#allocation5], 4294967040  ;;  %v25_v0 = vlaneseq  ;;  %s80_s15 = smul.u32 2654435769, %s6890_s0  ;;  %s3523_s0 = smov [#allocation7]  }
   0x6   :  { %s3330_s16 = sshll.u32 %s3523_s0, 4  ;;  %s3332_s19 = sshll.u32 %s6892_s2, 4  ;;  %s3331_s16 = int_to_ptr.vmem [resolvable:$true] %s3330_s16  ;;  %s3333_s19 = int_to_ptr.hbm [resolvable:$true] %s3332_s19 }
   0x7   :  { %v30_v1 = vand.u32 127, %v25_v0  ;;  %v26_v2 = vshrl.u32 %v25_v0, 7  ;;  %v81_v34 = vstv %s80_s15 }
   0x9   :  { %v31_v3 = vadd.s32 128, %v30_v1  ;;  %v32_v4 = vadd.s32 256, %v30_v1  ;;  %v33_v5 = vadd.s32 384, %v30_v1  ;;  %v34_v6 = vadd.s32 512, %v30_v1 }
   0xa   :  { %v35_v7 = vadd.s32 640, %v30_v1  ;;  %v36_v8 = vadd.s32 768, %v30_v1  ;;  %v37_v9 = vadd.s32 896, %v30_v1  ;;  %v38_v10 = vadd.s32 1024, %v30_v1 }
   0xb   :  { %v39_v11 = vadd.s32 1152, %v30_v1  ;;  %v40_v12 = vadd.s32 1280, %v30_v1  ;;  %v41_v13 = vadd.s32 1408, %v30_v1  ;;  %v42_v14 = vadd.s32 1536, %v30_v1 }
   0xc   :  { %v43_v15 = vadd.s32 1664, %v30_v1  ;;  %v44_v16 = vadd.s32 1792, %v30_v1  ;;  %v45_v17 = vadd.s32 1920, %v30_v1  ;;  %v47_v18 = vmul.u32 16777619, %v26_v2 }
   0xd   :  { %v48_v19 = vmul.u32 2246822507, %v30_v1  ;;  %v49_v20 = vmul.u32 2246822507, %v31_v3  ;;  %v50_v21 = vmul.u32 2246822507, %v32_v4 }
   0xe   :  { %v51_v22 = vmul.u32 2246822507, %v33_v5  ;;  %v52_v23 = vmul.u32 2246822507, %v34_v6  ;;  %v53_v24 = vmul.u32 2246822507, %v35_v7 }
   0xf   :  { %v54_v25 = vmul.u32 2246822507, %v36_v8  ;;  %v55_v26 = vmul.u32 2246822507, %v37_v9  ;;  %v56_v27 = vmul.u32 2246822507, %v38_v10  ;;  %v64_v36 = vxor.u32 %v48_v19, %v47_v18 }
  0x10   :  { %v57_v28 = vmul.u32 2246822507, %v39_v11  ;;  %v58_v29 = vmul.u32 2246822507, %v40_v12  ;;  %v59_v30 = vmul.u32 2246822507, %v41_v13  ;;  %v65_v37 = vxor.u32 %v49_v20, %v47_v18 }
  0x11   :  { %v60_v31 = vmul.u32 2246822507, %v42_v14  ;;  %v61_v32 = vmul.u32 2246822507, %v43_v15  ;;  %v62_v33 = vmul.u32 2246822507, %v44_v16  ;;  %v66_v38 = vxor.u32 %v50_v21, %v47_v18 }
  0x12   :  { %v63_v35 = vmul.u32 2246822507, %v45_v17  ;;  %v67_v39 = vxor.u32 %v51_v22, %v47_v18  ;;  %v68_v40 = vxor.u32 %v52_v23, %v47_v18  ;;  %v69_v41 = vxor.u32 %v53_v24, %v47_v18 }
  0x13   :  { %v70_v42 = vxor.u32 %v54_v25, %v47_v18  ;;  %v71_v43 = vxor.u32 %v55_v26, %v47_v18  ;;  %v72_v44 = vxor.u32 %v56_v27, %v47_v18  ;;  %v73_v45 = vxor.u32 %v57_v28, %v47_v18 }
  0x14   :  { %v74_v46 = vxor.u32 %v58_v29, %v47_v18  ;;  %v75_v47 = vxor.u32 %v59_v30, %v47_v18  ;;  %v76_v48 = vxor.u32 %v60_v31, %v47_v18  ;;  %v77_v49 = vxor.u32 %v61_v32, %v47_v18 }
  0x15   :  { %v78_v50 = vxor.u32 %v62_v33, %v47_v18  ;;  %v79_v51 = vxor.u32 %v63_v35, %v47_v18  ;;  %v3545_v52 = vadd.s32 %v81_v34, %v64_v36  ;;  %v3547_v53 = vadd.s32 %v81_v34, %v65_v37 }
  0x16   :  { %v3549_v54 = vadd.s32 %v81_v34, %v66_v38  ;;  %v3551_v55 = vadd.s32 %v81_v34, %v67_v39  ;;  %v3553_v56 = vadd.s32 %v81_v34, %v68_v40  ;;  %v3555_v57 = vadd.s32 %v81_v34, %v69_v41 }
  0x17   :  { %v3557_v58 = vadd.s32 %v81_v34, %v70_v42  ;;  %v3559_v59 = vadd.s32 %v81_v34, %v71_v43  ;;  %v3561_v60 = vadd.s32 %v81_v34, %v72_v44  ;;  %v3563_v61 = vadd.s32 %v81_v34, %v73_v45 }
  0x18   :  { %v3565_v62 = vadd.s32 %v81_v34, %v74_v46  ;;  %v3567_v63 = vadd.s32 %v81_v34, %v75_v47  ;;  %v98_v0 = vadd.s32 1757159915, %v3545_v52  ;;  %v99_v1 = vadd.s32 1757159915, %v3547_v53 }
  0x19   :  { %v100_v2 = vadd.s32 1757159915, %v3549_v54  ;;  %v3572_v3 = vadd.s32 %v81_v34, %v76_v48  ;;  %v101_v4 = vadd.s32 1757159915, %v3551_v55  ;;  %v102_v5 = vadd.s32 1757159915, %v3553_v56 }
  0x1a   :  { %v103_v6 = vadd.s32 1757159915, %v3555_v57  ;;  %v3577_v7 = vadd.s32 %v81_v34, %v77_v49  ;;  %v104_v8 = vadd.s32 1757159915, %v3557_v58  ;;  %v105_v9 = vadd.s32 1757159915, %v3559_v59 }
  0x1b   :  { %7003 = vst [vmem:[#allocation10_spill] sm:$0xff] %v3572_v3  ;;  %v106_v10 = vadd.s32 1757159915, %v3561_v60  ;;  %v3582_v11 = vadd.s32 %v81_v34, %v78_v50  ;;  %v107_v12 = vadd.s32 1757159915, %v3563_v61  ;;  %v3587_v15 = vadd.s32 %v81_v34, %v79_v51 }
  0x1c   :  { %7004 = vst [vmem:[#allocation11_spill] sm:$0xff] %v3577_v7  ;;  %v108_v13 = vadd.s32 1757159915, %v3565_v62  ;;  %v109_v14 = vadd.s32 1757159915, %v3567_v63  ;;  %v114_v18 = vshrl.u32 %v98_v0, 16 }
  0x1d   :  { %7005 = vst [vmem:[#allocation12_spill] sm:$0xff] %v3582_v11  ;;  %v110_v16 = vadd.s32 1757159915, %v3572_v3  ;;  %v111_v17 = vadd.s32 1757159915, %v3577_v7  ;;  %v115_v20 = vshrl.u32 %v99_v1, 16 }
  0x1e   :  { %7006 = vst [vmem:[#allocation13_spill] sm:$0xff] %v3587_v15  ;;  %v112_v19 = vadd.s32 1757159915, %v3582_v11  ;;  %v116_v21 = vshrl.u32 %v100_v2, 16  ;;  %v117_v22 = vshrl.u32 %v101_v4, 16  ;;  %v118_v24 = vshrl.u32 %v102_v5, 16 }
  0x1f   :  { %v113_v23 = vadd.s32 1757159915, %v3587_v15  ;;  %v119_v25 = vshrl.u32 %v103_v6, 16  ;;  %v120_v26 = vshrl.u32 %v104_v8, 16  ;;  %v121_v27 = vshrl.u32 %v105_v9, 16 }
  0x20   :  { %v122_v28 = vshrl.u32 %v106_v10, 16  ;;  %v123_v29 = vshrl.u32 %v107_v12, 16  ;;  %v124_v30 = vshrl.u32 %v108_v13, 16  ;;  %v125_v31 = vshrl.u32 %v109_v14, 16 }
  0x21   :  { %v126_v32 = vshrl.u32 %v110_v16, 16  ;;  %v127_v33 = vshrl.u32 %v111_v17, 16  ;;  %v130_v34 = vxor.u32 %v114_v18, %v98_v0  ;;  %v128_v35 = vshrl.u32 %v112_v19, 16 }
  0x22   :  { %v131_v36 = vxor.u32 %v115_v20, %v99_v1  ;;  %v132_v37 = vxor.u32 %v116_v21, %v100_v2  ;;  %v133_v38 = vxor.u32 %v117_v22, %v101_v4  ;;  %v129_v39 = vshrl.u32 %v113_v23, 16 }
  0x23   :  { %v134_v40 = vxor.u32 %v118_v24, %v102_v5  ;;  %v135_v41 = vxor.u32 %v119_v25, %v103_v6  ;;  %v136_v42 = vxor.u32 %v120_v26, %v104_v8  ;;  %v137_v43 = vxor.u32 %v121_v27, %v105_v9 }
  0x24   :  { %v138_v44 = vxor.u32 %v122_v28, %v106_v10  ;;  %v139_v45 = vxor.u32 %v123_v29, %v107_v12  ;;  %v140_v46 = vxor.u32 %v124_v30, %v108_v13  ;;  %v141_v47 = vxor.u32 %v125_v31, %v109_v14 }
  0x25   :  { %v142_v48 = vxor.u32 %v126_v32, %v110_v16  ;;  %v143_v49 = vxor.u32 %v127_v33, %v111_v17  ;;  %v146_v50 = vmul.u32 2146121005, %v130_v34  ;;  %v144_v51 = vxor.u32 %v128_v35, %v112_v19 }
  0x26   :  { %v147_v15 = vmul.u32 2146121005, %v131_v36  ;;  %v148_v11 = vmul.u32 2146121005, %v132_v37  ;;  %v149_v0 = vmul.u32 2146121005, %v133_v38  ;;  %v145_v18 = vxor.u32 %v129_v39, %v113_v23 }
  0x27   :  { %v150_v1 = vmul.u32 2146121005, %v134_v40  ;;  %v151_v2 = vmul.u32 2146121005, %v135_v41  ;;  %v152_v4 = vmul.u32 2146121005, %v136_v42 }
  0x28   :  { %v153_v20 = vmul.u32 2146121005, %v137_v43  ;;  %v154_v5 = vmul.u32 2146121005, %v138_v44  ;;  %v155_v6 = vmul.u32 2146121005, %v139_v45 }
  0x29   :  { %v156_v8 = vmul.u32 2146121005, %v140_v46  ;;  %v157_v9 = vmul.u32 2146121005, %v141_v47  ;;  %v158_v10 = vmul.u32 2146121005, %v142_v48 }
  0x2a   :  { %v159_v12 = vmul.u32 2146121005, %v143_v49  ;;  %v160_v13 = vmul.u32 2146121005, %v144_v51  ;;  %v162_v14 = vshrl.u32 %v146_v50, 15  ;;  %v163_v16 = vshrl.u32 %v147_v15, 15 }
  0x2b   :  { %v161_v17 = vmul.u32 2146121005, %v145_v18  ;;  %v164_v21 = vshrl.u32 %v148_v11, 15  ;;  %v165_v19 = vshrl.u32 %v149_v0, 15  ;;  %v166_v22 = vshrl.u32 %v150_v1, 15 }
  0x2c   :  { %v167_v24 = vshrl.u32 %v151_v2, 15  ;;  %v168_v25 = vshrl.u32 %v152_v4, 15  ;;  %v169_v23 = vshrl.u32 %v153_v20, 15  ;;  %v170_v26 = vshrl.u32 %v154_v5, 15 }
  0x2d   :  { %v171_v27 = vshrl.u32 %v155_v6, 15  ;;  %v172_v28 = vshrl.u32 %v156_v8, 15  ;;  %v173_v29 = vshrl.u32 %v157_v9, 15  ;;  %v174_v30 = vshrl.u32 %v158_v10, 15 }
  0x2e   :  { %v175_v31 = vshrl.u32 %v159_v12, 15  ;;  %v176_v32 = vshrl.u32 %v160_v13, 15  ;;  %v178_v33 = vxor.u32 %v162_v14, %v146_v50  ;;  %v179_v34 = vxor.u32 %v163_v16, %v147_v15 }
  0x2f   :  { %v177_v35 = vshrl.u32 %v161_v17, 15  ;;  %v180_v36 = vxor.u32 %v164_v21, %v148_v11  ;;  %v181_v37 = vxor.u32 %v165_v19, %v149_v0  ;;  %v182_v38 = vxor.u32 %v166_v22, %v150_v1 }
  0x30   :  { %v183_v39 = vxor.u32 %v167_v24, %v151_v2  ;;  %v184_v40 = vxor.u32 %v168_v25, %v152_v4  ;;  %v185_v41 = vxor.u32 %v169_v23, %v153_v20  ;;  %v186_v42 = vxor.u32 %v170_v26, %v154_v5 }
  0x31   :  { %v187_v43 = vxor.u32 %v171_v27, %v155_v6  ;;  %v188_v44 = vxor.u32 %v172_v28, %v156_v8  ;;  %v189_v45 = vxor.u32 %v173_v29, %v157_v9  ;;  %v190_v46 = vxor.u32 %v174_v30, %v158_v10 }
  0x32   :  { %v191_v47 = vxor.u32 %v175_v31, %v159_v12  ;;  %v192_v48 = vxor.u32 %v176_v32, %v160_v13  ;;  %v194_v49 = vmul.u32 2221713035, %v178_v33  ;;  %v195_v51 = vmul.u32 2221713035, %v179_v34 }
  0x33   :  { %v193_v18 = vxor.u32 %v177_v35, %v161_v17  ;;  %v196_v7 = vmul.u32 2221713035, %v180_v36  ;;  %v197_v50 = vmul.u32 2221713035, %v181_v37  ;;  %v198_v15 = vmul.u32 2221713035, %v182_v38 }
  0x34   :  { %v199_v14 = vmul.u32 2221713035, %v183_v39  ;;  %v200_v11 = vmul.u32 2221713035, %v184_v40  ;;  %v201_v0 = vmul.u32 2221713035, %v185_v41 }
  0x35   :  { %v202_v1 = vmul.u32 2221713035, %v186_v42  ;;  %v203_v2 = vmul.u32 2221713035, %v187_v43  ;;  %v204_v4 = vmul.u32 2221713035, %v188_v44 }
  0x36   :  { %v205_v20 = vmul.u32 2221713035, %v189_v45  ;;  %v206_v5 = vmul.u32 2221713035, %v190_v46  ;;  %v207_v6 = vmul.u32 2221713035, %v191_v47 }
  0x37   :  { %v208_v8 = vmul.u32 2221713035, %v192_v48  ;;  %v209_v9 = vmul.u32 2221713035, %v193_v18  ;;  %v210_v10 = vshrl.u32 %v194_v49, 16  ;;  %v211_v12 = vshrl.u32 %v195_v51, 16 }
  0x38   :  { %v212_v13 = vshrl.u32 %v196_v7, 16  ;;  %v213_v16 = vshrl.u32 %v197_v50, 16  ;;  %v214_v21 = vshrl.u32 %v198_v15, 16  ;;  %v215_v17 = vshrl.u32 %v199_v14, 16 }
  0x39   :  { %v216_v19 = vshrl.u32 %v200_v11, 16  ;;  %v217_v22 = vshrl.u32 %v201_v0, 16  ;;  %v218_v24 = vshrl.u32 %v202_v1, 16  ;;  %v219_v25 = vshrl.u32 %v203_v2, 16 }
  0x3a   :  { %v220_v23 = vshrl.u32 %v204_v4, 16  ;;  %v221_v26 = vshrl.u32 %v205_v20, 16  ;;  %v222_v27 = vshrl.u32 %v206_v5, 16  ;;  %v223_v28 = vshrl.u32 %v207_v6, 16 }
  0x3b   :  { %v224_v29 = vshrl.u32 %v208_v8, 16  ;;  %v225_v30 = vshrl.u32 %v209_v9, 16  ;;  %v226_v31 = vxor.u32 %v210_v10, %v194_v49  ;;  %v227_v32 = vxor.u32 %v211_v12, %v195_v51 }
  0x3c   :  { %v228_v33 = vxor.u32 %v212_v13, %v196_v7  ;;  %v229_v34 = vxor.u32 %v213_v16, %v197_v50  ;;  %v230_v35 = vxor.u32 %v214_v21, %v198_v15  ;;  %v231_v36 = vxor.u32 %v215_v17, %v199_v14 }
  0x3d   :  { %v232_v37 = vxor.u32 %v216_v19, %v200_v11  ;;  %v233_v38 = vxor.u32 %v217_v22, %v201_v0  ;;  %v234_v39 = vxor.u32 %v218_v24, %v202_v1  ;;  %v235_v40 = vxor.u32 %v219_v25, %v203_v2 }
  0x3e   :  { %v236_v41 = vxor.u32 %v220_v23, %v204_v4  ;;  %v237_v42 = vxor.u32 %v221_v26, %v205_v20  ;;  %v238_v43 = vxor.u32 %v222_v27, %v206_v5  ;;  %v239_v44 = vxor.u32 %v223_v28, %v207_v6 }
  0x3f   :  { %v240_v45 = vxor.u32 %v224_v29, %v208_v8  ;;  %v241_v46 = vxor.u32 %v225_v30, %v209_v9  ;;  %v242_v47 = vshrl.u32 %v226_v31, 9  ;;  %v243_v48 = vshrl.u32 %v227_v32, 9 }
  0x40   :  { %v244_v18 = vshrl.u32 %v228_v33, 9  ;;  %v245_v3 = vshrl.u32 %v229_v34, 9  ;;  %v246_v49 = vshrl.u32 %v230_v35, 9  ;;  %v247_v51 = vshrl.u32 %v231_v36, 9 }
  0x41   :  { %v248_v7 = vshrl.u32 %v232_v37, 9  ;;  %v249_v50 = vshrl.u32 %v233_v38, 9  ;;  %v250_v15 = vshrl.u32 %v234_v39, 9  ;;  %v251_v14 = vshrl.u32 %v235_v40, 9 }
  0x42   :  { %v252_v11 = vshrl.u32 %v236_v41, 9  ;;  %v253_v0 = vshrl.u32 %v237_v42, 9  ;;  %v254_v1 = vshrl.u32 %v238_v43, 9  ;;  %v255_v2 = vshrl.u32 %v239_v44, 9 }
  0x43   :  { %v256_v4 = vshrl.u32 %v240_v45, 9  ;;  %v257_v20 = vshrl.u32 %v241_v46, 9  ;;  %v258_v5 = vcvt.s32.f32 %v242_v47  ;;  %v259_v6 = vcvt.s32.f32 %v243_v48 }
  0x44   :  { %v260_v8 = vcvt.s32.f32 %v244_v18  ;;  %v261_v9 = vcvt.s32.f32 %v245_v3  ;;  %v262_v10 = vcvt.s32.f32 %v246_v49  ;;  %v263_v12 = vcvt.s32.f32 %v247_v51 }
  0x45   :  { %v264_v13 = vcvt.s32.f32 %v248_v7  ;;  %v265_v16 = vcvt.s32.f32 %v249_v50  ;;  %v266_v21 = vcvt.s32.f32 %v250_v15  ;;  %v267_v17 = vcvt.s32.f32 %v251_v14 }
  0x46   :  { %v268_v19 = vcvt.s32.f32 %v252_v11  ;;  %v269_v22 = vcvt.s32.f32 %v253_v0  ;;  %v270_v24 = vcvt.s32.f32 %v254_v1  ;;  %v271_v25 = vcvt.s32.f32 %v255_v2 }
  0x47   :  { %v272_v23 = vcvt.s32.f32 %v256_v4  ;;  %v273_v26 = vcvt.s32.f32 %v257_v20  ;;  %v274_v27 = vadd.f32 0.5, %v258_v5  ;;  %v275_v28 = vadd.f32 0.5, %v259_v6 }
  0x48   :  { %v276_v29 = vadd.f32 0.5, %v260_v8  ;;  %v277_v30 = vadd.f32 0.5, %v261_v9  ;;  %v278_v31 = vadd.f32 0.5, %v262_v10  ;;  %v279_v32 = vadd.f32 0.5, %v263_v12 }
  0x49   :  { %v280_v33 = vadd.f32 0.5, %v264_v13  ;;  %v281_v3 = vadd.f32 0.5, %v265_v16  ;;  %v282_v34 = vadd.f32 0.5, %v266_v21  ;;  %v283_v35 = vadd.f32 0.5, %v267_v17  ;;  %v7011_v13 = vld [vmem:[#allocation10_spill] sm:$0xff]  ;;  %v7012_v16 = vld [vmem:[#allocation11_spill] sm:$0xff] }
  0x4a   :  { %v284_v36 = vadd.f32 0.5, %v268_v19  ;;  %v285_v37 = vadd.f32 0.5, %v269_v22  ;;  %v286_v38 = vadd.f32 0.5, %v270_v24  ;;  %v287_v39 = vadd.f32 0.5, %v271_v25  ;;  %v7013_v21 = vld [vmem:[#allocation12_spill] sm:$0xff]  ;;  %v7014_v19 = vld [vmem:[#allocation13_spill] sm:$0xff] }
  0x4b   :  { %v288_v40 = vadd.f32 0.5, %v272_v23  ;;  %v289_v41 = vadd.f32 0.5, %v273_v26  ;;  %v3593_v42 = vmul.f32 1.1920929e-07, %v274_v27  ;;  %v3595_v43 = vmul.f32 1.1920929e-07, %v275_v28 }
  0x4c   :  { %v3597_v44 = vmul.f32 1.1920929e-07, %v276_v29  ;;  %v3599_v45 = vmul.f32 1.1920929e-07, %v277_v30  ;;  %v3601_v46 = vmul.f32 1.1920929e-07, %v278_v31  ;;  %v3603_v47 = vmul.f32 1.1920929e-07, %v279_v32 }
  0x4d   :  { %v3605_v48 = vmul.f32 1.1920929e-07, %v280_v33  ;;  %v3607_v18 = vmul.f32 1.1920929e-07, %v281_v3  ;;  %v3609_v49 = vmul.f32 1.1920929e-07, %v282_v34  ;;  %v3611_v51 = vmul.f32 1.1920929e-07, %v283_v35 }
  0x4e   :  { %v3613_v7 = vmul.f32 1.1920929e-07, %v284_v36  ;;  %v3615_v50 = vmul.f32 1.1920929e-07, %v285_v37  ;;  %v3617_v15 = vmul.f32 1.1920929e-07, %v286_v38  ;;  %v3619_v14 = vmul.f32 1.1920929e-07, %v287_v39 }
  0x4f   :  { %v3621_v11 = vmul.f32 1.1920929e-07, %v288_v40  ;;  %v3623_v0 = vmul.f32 1.1920929e-07, %v289_v41  ;;  %v306_v1 = vadd.s32 48610963, %v3545_v52  ;;  %v307_v2 = vadd.s32 48610963, %v3547_v53 }
  0x50   :  { %7007 = vst [vmem:[#allocation14_spill] sm:$0xff] %v3617_v15  ;;  %v308_v4 = vadd.s32 48610963, %v3549_v54  ;;  %v309_v20 = vadd.s32 48610963, %v3551_v55  ;;  %3399 = vlog2.f32 %v3593_v42 }
  0x51   :  { %7008 = vst [vmem:[#allocation15_spill] sm:$0xff] %v3619_v14  ;;  %v310_v5 = vadd.s32 48610963, %v3553_v56  ;;  %v311_v6 = vadd.s32 48610963, %v3555_v57  ;;  %v322_v17 = vshrl.u32 %v306_v1, 16  ;;  %3401 = vlog2.f32 %v3595_v43 }
  0x52   :  { %7009 = vst [vmem:[#allocation16_spill] sm:$0xff] %v3621_v11  ;;  %v312_v8 = vadd.s32 48610963, %v3557_v58  ;;  %v313_v9 = vadd.s32 48610963, %v3559_v59  ;;  %v323_v57 = vshrl.u32 %v307_v2, 16  ;;  %3403 = vlog2.f32 %v3597_v44 }
  0x53   :  { %7010 = vst [vmem:[#allocation17_spill] sm:$0xff] %v3623_v0  ;;  %v314_v10 = vadd.s32 48610963, %v3561_v60  ;;  %v315_v12 = vadd.s32 48610963, %v3563_v61  ;;  %v324_v22 = vshrl.u32 %v308_v4, 16  ;;  %v338_v30 = vxor.u32 %v322_v17, %v306_v1 }
  0x54   :  { %v316_v52 = vadd.s32 48610963, %v3565_v62  ;;  %v317_v53 = vadd.s32 48610963, %v3567_v63  ;;  %v318_v54 = vadd.s32 48610963, %v7011_v13  ;;  %v339_v31 = vxor.u32 %v323_v57, %v307_v2 }
  0x55   :  { %v319_v55 = vadd.s32 48610963, %v7012_v16  ;;  %v320_v56 = vadd.s32 48610963, %v7013_v21  ;;  %v321_v58 = vadd.s32 48610963, %v7014_v19  ;;  %v340_v33 = vxor.u32 %v324_v22, %v308_v4 }
  0x56   :  { %v325_v59 = vshrl.u32 %v309_v20, 16  ;;  %v326_v24 = vshrl.u32 %v310_v5, 16  ;;  %v327_v60 = vshrl.u32 %v311_v6, 16  ;;  %v328_v25 = vshrl.u32 %v312_v8, 16 }
  0x57   :  { %v329_v61 = vshrl.u32 %v313_v9, 16  ;;  %v330_v23 = vshrl.u32 %v314_v10, 16  ;;  %v331_v62 = vshrl.u32 %v315_v12, 16  ;;  %v332_v26 = vshrl.u32 %v316_v52, 16 }
  0x58   :  { %v333_v63 = vshrl.u32 %v317_v53, 16  ;;  %v334_v27 = vshrl.u32 %v318_v54, 16  ;;  %v335_v28 = vshrl.u32 %v319_v55, 16  ;;  %v336_v29 = vshrl.u32 %v320_v56, 16 }
  0x59   :  { %v337_v32 = vshrl.u32 %v321_v58, 16  ;;  %v341_v3 = vxor.u32 %v325_v59, %v309_v20  ;;  %v342_v34 = vxor.u32 %v326_v24, %v310_v5  ;;  %v343_v35 = vxor.u32 %v327_v60, %v311_v6 }
  0x5a   :  { %v344_v36 = vxor.u32 %v328_v25, %v312_v8  ;;  %v345_v37 = vxor.u32 %v329_v61, %v313_v9  ;;  %v346_v38 = vxor.u32 %v330_v23, %v314_v10  ;;  %v347_v39 = vxor.u32 %v331_v62, %v315_v12 }
  0x5b   :  { %v348_v40 = vxor.u32 %v332_v26, %v316_v52  ;;  %v349_v41 = vxor.u32 %v333_v63, %v317_v53  ;;  %v350_v13 = vxor.u32 %v334_v27, %v318_v54  ;;  %v351_v16 = vxor.u32 %v335_v28, %v319_v55 }
  0x5c   :  { %v352_v21 = vxor.u32 %v336_v29, %v320_v56  ;;  %v354_v19 = vmul.u32 2146121005, %v338_v30  ;;  %v355_v0 = vmul.u32 2146121005, %v339_v31  ;;  %v353_v11 = vxor.u32 %v337_v32, %v321_v58 }
  0x5d   :  { %v356_v14 = vmul.u32 2146121005, %v340_v33  ;;  %v357_v1 = vmul.u32 2146121005, %v341_v3  ;;  %v358_v2 = vmul.u32 2146121005, %v342_v34  ;;  %3405 = vlog2.f32 %v3599_v45 }
  0x5e   :  { %v359_v17 = vmul.u32 2146121005, %v343_v35  ;;  %v360_v4 = vmul.u32 2146121005, %v344_v36  ;;  %v361_v20 = vmul.u32 2146121005, %v345_v37  ;;  %3407 = vlog2.f32 %v3601_v46 }
  0x5f   :  { %v362_v5 = vmul.u32 2146121005, %v346_v38  ;;  %v363_v6 = vmul.u32 2146121005, %v347_v39  ;;  %v364_v8 = vmul.u32 2146121005, %v348_v40  ;;  %3409 = vlog2.f32 %v3603_v47 }
  0x60   :  { %v365_v9 = vmul.u32 2146121005, %v349_v41  ;;  %v366_v10 = vmul.u32 2146121005, %v350_v13  ;;  %v367_v12 = vmul.u32 2146121005, %v351_v16  ;;  %3411 = vlog2.f32 %v3605_v48 }
  0x61   :  { %v368_v52 = vmul.u32 2146121005, %v352_v21  ;;  %v369_v53 = vmul.u32 2146121005, %v353_v11  ;;  %v370_v54 = vshrl.u32 %v354_v19, 15  ;;  %v371_v55 = vshrl.u32 %v355_v0, 15 }
  0x62   :  { %v372_v56 = vshrl.u32 %v356_v14, 15  ;;  %v373_v57 = vshrl.u32 %v357_v1, 15  ;;  %v374_v22 = vshrl.u32 %v358_v2, 15  ;;  %v375_v58 = vshrl.u32 %v359_v17, 15 }
  0x63   :  { %v376_v59 = vshrl.u32 %v360_v4, 15  ;;  %v377_v24 = vshrl.u32 %v361_v20, 15  ;;  %v378_v60 = vshrl.u32 %v362_v5, 15  ;;  %v379_v25 = vshrl.u32 %v363_v6, 15 }
  0x64   :  { %v380_v61 = vshrl.u32 %v364_v8, 15  ;;  %v381_v23 = vshrl.u32 %v365_v9, 15  ;;  %v382_v62 = vshrl.u32 %v366_v10, 15  ;;  %v383_v26 = vshrl.u32 %v367_v12, 15 }
  0x65   :  { %v384_v63 = vshrl.u32 %v368_v52, 15  ;;  %v385_v27 = vshrl.u32 %v369_v53, 15  ;;  %v386_v28 = vxor.u32 %v370_v54, %v354_v19  ;;  %v387_v29 = vxor.u32 %v371_v55, %v355_v0  ;;  %v3645_v55 = vpop.eup %3399 }
  0x66   :  { %v388_v30 = vxor.u32 %v372_v56, %v356_v14  ;;  %v389_v11 = vxor.u32 %v373_v57, %v357_v1  ;;  %v390_v31 = vxor.u32 %v374_v22, %v358_v2  ;;  %v391_v32 = vxor.u32 %v375_v58, %v359_v17  ;;  %v3647_v44 = vpop.eup %3401 }
  0x67   :  { %v392_v33 = vxor.u32 %v376_v59, %v360_v4  ;;  %v393_v3 = vxor.u32 %v377_v24, %v361_v20  ;;  %v394_v34 = vxor.u32 %v378_v60, %v362_v5  ;;  %v395_v35 = vxor.u32 %v379_v25, %v363_v6  ;;  %v3649_v60 = vpop.eup %3403 }
  0x68   :  { %v396_v36 = vxor.u32 %v380_v61, %v364_v8  ;;  %v397_v37 = vxor.u32 %v381_v23, %v365_v9  ;;  %v398_v38 = vxor.u32 %v382_v62, %v366_v10  ;;  %v399_v39 = vxor.u32 %v383_v26, %v367_v12  ;;  %v3651_v26 = vpop.eup %3405 }
  0x69   :  { %v400_v40 = vxor.u32 %v384_v63, %v368_v52  ;;  %v401_v41 = vxor.u32 %v385_v27, %v369_v53  ;;  %v402_v13 = vmul.u32 2221713035, %v386_v28  ;;  %v403_v16 = vmul.u32 2221713035, %v387_v29 }
  0x6a   :  { %v404_v21 = vmul.u32 2221713035, %v388_v30  ;;  %v405_v15 = vmul.u32 2221713035, %v389_v11  ;;  %v406_v19 = vmul.u32 2221713035, %v390_v31  ;;  %3413 = vlog2.f32 %v3607_v18 }
  0x6b   :  { %v407_v14 = vmul.u32 2221713035, %v391_v32  ;;  %v408_v0 = vmul.u32 2221713035, %v392_v33  ;;  %v409_v1 = vmul.u32 2221713035, %v393_v3  ;;  %3415 = vlog2.f32 %v3609_v49 }
  0x6c   :  { %v410_v2 = vmul.u32 2221713035, %v394_v34  ;;  %v411_v17 = vmul.u32 2221713035, %v395_v35  ;;  %v412_v4 = vmul.u32 2221713035, %v396_v36  ;;  %3417 = vlog2.f32 %v3611_v51 }
  0x6d   :  { %v413_v20 = vmul.u32 2221713035, %v397_v37  ;;  %v414_v5 = vmul.u32 2221713035, %v398_v38  ;;  %v415_v6 = vmul.u32 2221713035, %v399_v39  ;;  %3419 = vlog2.f32 %v3613_v7 }
  0x6e   :  { %v416_v8 = vmul.u32 2221713035, %v400_v40  ;;  %v417_v9 = vmul.u32 2221713035, %v401_v41  ;;  %v418_v10 = vshrl.u32 %v402_v13, 16  ;;  %v419_v12 = vshrl.u32 %v403_v16, 16 }
  0x6f   :  { %v420_v42 = vshrl.u32 %v404_v21, 16  ;;  %v421_v52 = vshrl.u32 %v405_v15, 16  ;;  %v422_v53 = vshrl.u32 %v406_v19, 16  ;;  %v423_v54 = vshrl.u32 %v407_v14, 16  ;;  %v7023_v7 = vld [vmem:[#allocation15_spill] sm:$0xff] }
  0x70   :  { %v424_v43 = vshrl.u32 %v408_v0, 16  ;;  %v425_v56 = vshrl.u32 %v409_v1, 16  ;;  %v426_v57 = vshrl.u32 %v410_v2, 16  ;;  %v427_v22 = vshrl.u32 %v411_v17, 16 }
  0x71   :  { %v428_v58 = vshrl.u32 %v412_v4, 16  ;;  %v429_v59 = vshrl.u32 %v413_v20, 16  ;;  %v430_v24 = vshrl.u32 %v414_v5, 16  ;;  %v431_v45 = vshrl.u32 %v415_v6, 16 }
  0x72   :  { %v432_v25 = vshrl.u32 %v416_v8, 16  ;;  %v433_v61 = vshrl.u32 %v417_v9, 16  ;;  %v434_v23 = vxor.u32 %v418_v10, %v402_v13  ;;  %v435_v62 = vxor.u32 %v419_v12, %v403_v16 }
  0x73   :  { %v436_v63 = vxor.u32 %v420_v42, %v404_v21  ;;  %v437_v27 = vxor.u32 %v421_v52, %v405_v15  ;;  %v438_v28 = vxor.u32 %v422_v53, %v406_v19  ;;  %v439_v29 = vxor.u32 %v423_v54, %v407_v14 }
  0x74   :  { %v440_v30 = vxor.u32 %v424_v43, %v408_v0  ;;  %v441_v11 = vxor.u32 %v425_v56, %v409_v1  ;;  %v442_v31 = vxor.u32 %v426_v57, %v410_v2  ;;  %v443_v32 = vxor.u32 %v427_v22, %v411_v17 }
  0x75   :  { %v444_v33 = vxor.u32 %v428_v58, %v412_v4  ;;  %v445_v3 = vxor.u32 %v429_v59, %v413_v20  ;;  %v446_v34 = vxor.u32 %v430_v24, %v414_v5  ;;  %v447_v35 = vxor.u32 %v431_v45, %v415_v6 }
  0x76   :  { %v448_v36 = vxor.u32 %v432_v25, %v416_v8  ;;  %v449_v37 = vxor.u32 %v433_v61, %v417_v9  ;;  %v450_v38 = vshrl.u32 %v434_v23, 9  ;;  %v451_v39 = vshrl.u32 %v435_v62, 9 }
  0x77   :  { %v452_v40 = vshrl.u32 %v436_v63, 9  ;;  %v453_v41 = vshrl.u32 %v437_v27, 9  ;;  %v454_v13 = vshrl.u32 %v438_v28, 9  ;;  %v455_v16 = vshrl.u32 %v439_v29, 9 }
  0x78   :  { %v456_v21 = vshrl.u32 %v440_v30, 9  ;;  %v457_v15 = vshrl.u32 %v441_v11, 9  ;;  %v458_v19 = vshrl.u32 %v442_v31, 9  ;;  %v459_v14 = vshrl.u32 %v443_v32, 9 }
  0x79   :  { %v460_v0 = vshrl.u32 %v444_v33, 9  ;;  %v461_v1 = vshrl.u32 %v445_v3, 9  ;;  %v462_v2 = vshrl.u32 %v446_v34, 9  ;;  %v463_v17 = vshrl.u32 %v447_v35, 9 }
  0x7a   :  { %v464_v4 = vshrl.u32 %v448_v36, 9  ;;  %v465_v20 = vshrl.u32 %v449_v37, 9  ;;  %v466_v5 = vcvt.s32.f32 %v450_v38  ;;  %v467_v6 = vcvt.s32.f32 %v451_v39 }
  0x7b   :  { %v468_v8 = vcvt.s32.f32 %v452_v40  ;;  %v469_v9 = vcvt.s32.f32 %v453_v41  ;;  %v470_v10 = vcvt.s32.f32 %v454_v13  ;;  %v471_v12 = vcvt.s32.f32 %v455_v16 }
  0x7c   :  { %v472_v42 = vcvt.s32.f32 %v456_v21  ;;  %v473_v52 = vcvt.s32.f32 %v457_v15  ;;  %v474_v53 = vcvt.s32.f32 %v458_v19  ;;  %v475_v54 = vcvt.s32.f32 %v459_v14  ;;  %v3408_v21 = vpop.eup %3407 }
  0x7d   :  { %v476_v43 = vcvt.s32.f32 %v460_v0  ;;  %v477_v56 = vcvt.s32.f32 %v461_v1  ;;  %v478_v57 = vcvt.s32.f32 %v462_v2  ;;  %v479_v22 = vcvt.s32.f32 %v463_v17  ;;  %v3410_v19 = vpop.eup %3409  ;;  %v7022_v1 = vld [vmem:[#allocation14_spill] sm:$0xff] }
  0x7e   :  { %v480_v58 = vcvt.s32.f32 %v464_v4  ;;  %v481_v59 = vcvt.s32.f32 %v465_v20  ;;  %v482_v24 = vadd.f32 0.5, %v466_v5  ;;  %v483_v45 = vadd.f32 0.5, %v467_v6 }
  0x7f   :  { %v484_v25 = vadd.f32 0.5, %v468_v8  ;;  %v485_v61 = vadd.f32 0.5, %v469_v9  ;;  %v486_v23 = vadd.f32 0.5, %v470_v10  ;;  %v487_v62 = vadd.f32 0.5, %v471_v12 }
  0x80   :  { %v488_v63 = vadd.f32 0.5, %v472_v42  ;;  %v489_v27 = vadd.f32 0.5, %v473_v52  ;;  %v490_v28 = vadd.f32 0.5, %v474_v53  ;;  %v491_v29 = vadd.f32 0.5, %v475_v54  ;;  %v7028_v42 = vld [vmem:[#allocation17_spill] sm:$0xff] }
  0x81   :  { %v492_v30 = vadd.f32 0.5, %v476_v43  ;;  %v493_v11 = vadd.f32 0.5, %v477_v56  ;;  %v494_v31 = vadd.f32 0.5, %v478_v57  ;;  %v495_v32 = vadd.f32 0.5, %v479_v22 }
  0x82   :  { %v496_v33 = vadd.f32 0.5, %v480_v58  ;;  %v497_v3 = vadd.f32 0.5, %v481_v59  ;;  %v498_v34 = vmul.f32 1.1920929e-07, %v482_v24  ;;  %v499_v35 = vmul.f32 1.1920929e-07, %v483_v45 }
  0x83   :  { %v500_v36 = vmul.f32 1.1920929e-07, %v484_v25  ;;  %v501_v37 = vmul.f32 1.1920929e-07, %v485_v61  ;;  %v502_v38 = vmul.f32 1.1920929e-07, %v486_v23  ;;  %v503_v39 = vmul.f32 1.1920929e-07, %v487_v62 }
  0x84   :  { %v504_v40 = vmul.f32 1.1920929e-07, %v488_v63  ;;  %v505_v41 = vmul.f32 1.1920929e-07, %v489_v27  ;;  %v515_v13 = vmul.f32 0.6931472, %v3645_v55  ;;  %v506_v46 = vmul.f32 1.1920929e-07, %v490_v28 }
  0x85   :  { %v3659_v16 = vmul.f32 1.1920929e-07, %v491_v29  ;;  %v517_v47 = vmul.f32 0.6931472, %v3647_v44  ;;  %v3663_v48 = vmul.f32 1.1920929e-07, %v492_v30  ;;  %v519_v15 = vmul.f32 0.6931472, %v3649_v60  ;;  %v3412_v44 = vpop.eup %3411 }
  0x86   :  { %v521_v18 = vmul.f32 0.6931472, %v3651_v26  ;;  %v3668_v55 = vmul.f32 1.1920929e-07, %v493_v11  ;;  %v3670_v49 = vmul.f32 1.1920929e-07, %v494_v31  ;;  %v3672_v14 = vmul.f32 1.1920929e-07, %v495_v32  ;;  %v3414_v26 = vpop.eup %3413 }
  0x87   :  { %7015 = vst [vmem:[#allocation10_spill] sm:$0xff] %v3659_v16  ;;  %3421 = vlog2.f32 %v3615_v50  ;;  %v3675_v51 = vmul.f32 1.1920929e-07, %v496_v33  ;;  %v3677_v0 = vmul.f32 1.1920929e-07, %v497_v3  ;;  %v3680_v60 = vmul.f32 -2.0, %v515_v13  ;;  %v3416_v20 = vpop.eup %3415  ;;  %v7026_v50 = vld [vmem:[#allocation16_spill] sm:$0xff] }
  0x88   :  { %7016 = vst [vmem:[#allocation11_spill] sm:$0xff] %v3663_v48  ;;  %3423 = vlog2.f32 %v7022_v1  ;;  %v3683_v2 = vmul.f32 -2.0, %v517_v47  ;;  %v3685_v17 = vmul.f32 6.2831855, %v498_v34  ;;  %v3687_v4 = vmul.f32 6.2831855, %v499_v35  ;;  %v3418_v9 = vpop.eup %3417 }
  0x89   :  { %7017 = vst [vmem:[#allocation12_spill] sm:$0xff] %v3668_v55  ;;  %3425 = vlog2.f32 %v7023_v7  ;;  %v3690_v5 = vmul.f32 -2.0, %v519_v15  ;;  %v3692_v6 = vmul.f32 -2.0, %v521_v18  ;;  %v3694_v8 = vmul.f32 6.2831855, %v500_v36  ;;  %v3420_v53 = vpop.eup %3419 }
  0x8a   :  { %7018 = vst [vmem:[#allocation13_spill] sm:$0xff] %v3670_v49  ;;  %3427 = vlog2.f32 %v7026_v50  ;;  %v523_v10 = vmul.f32 0.6931472, %v3408_v21  ;;  %v525_v12 = vmul.f32 0.6931472, %v3410_v19  ;;  %v773_v31 = vand.u32 2139095040, %v3685_v17 }
  0x8b   :  { %7019 = vst [vmem:[#allocation18_spill] sm:$0xff] %v3672_v14  ;;  %3429 = vlog2.f32 %v7028_v42  ;;  %v527_v22 = vmul.f32 0.6931472, %v3412_v44  ;;  %v529_v58 = vmul.f32 0.6931472, %v3414_v26  ;;  %v6919_v55 = vmov 0  }
  0x8c   :  { %7020 = vst [vmem:[#allocation19_spill] sm:$0xff] %v3675_v51  ;;  %3431 = vrsqrt.f32 %v3680_v60  ;;  %v3702_v59 = vmul.f32 6.2831855, %v501_v37  ;;  %v531_v45 = vmul.f32 0.6931472, %v3416_v20  ;;  %v3708_v62 = vmul.f32 -2.0, %v523_v10 }
  0x8d   :  { %7021 = vst [vmem:[#allocation20_spill] sm:$0xff] %v3677_v0  ;;  %v3422_v57 = vpop.eup %3421  ;;  %v3704_v25 = vmul.f32 6.2831855, %v502_v38  ;;  %v3706_v61 = vmul.f32 6.2831855, %v503_v39  ;;  %v3710_v63 = vmul.f32 -2.0, %v525_v12  ;;  %3433 = vrsqrt.f32 %v3683_v2 }
  0x8e   :  { %7024 = vst [vmem:[#allocation14_spill] sm:$0xff] %v3685_v17  ;;  %v3424_v24 = vpop.eup %3423  ;;  %v3712_v27 = vmul.f32 6.2831855, %v504_v40  ;;  %v3714_v28 = vmul.f32 6.2831855, %v505_v41  ;;  %v3720_v34 = vmul.f32 -2.0, %v527_v22  ;;  %3435 = vrsqrt.f32 %v3690_v5 }
  0x8f   :  { %7025 = vst [vmem:[#allocation15_spill] sm:$0xff] %v3687_v4  ;;  %v3426_v23 = vpop.eup %3425  ;;  %v533_v30 = vmul.f32 0.6931472, %v3418_v9  ;;  %v3717_v11 = vmul.f32 6.2831855, %v506_v46  ;;  %v3722_v35 = vmul.f32 -2.0, %v529_v58  ;;  %3437 = vrsqrt.f32 %v3692_v6 }
  0x90   :  { %7027 = vst [vmem:[#allocation16_spill] sm:$0xff] %v3694_v8  ;;  %v3428_v29 = vpop.eup %3427  ;;  %v535_v33 = vmul.f32 0.6931472, %v3420_v53  ;;  %v537_v3 = vmul.f32 0.6931472, %v3422_v57  ;;  %v3726_v37 = vmul.f32 -2.0, %v531_v45  ;;  %3439 = vrsqrt.f32 %v3708_v62 }
  0x91   :  { %7029 = vst [vmem:[#allocation17_spill] sm:$0xff] %v3702_v59  ;;  %v3430_v32 = vpop.eup %3429  ;;  %v6897_v39 = vand.u32 2147483647, %v3685_v17  ;;  %v774_v40 = vshrl.u32 %v773_v31, 23  ;;  %v539_v41 = vmul.f32 0.6931472, %v3424_v24  ;;  %3441 = vrsqrt.f32 %v3710_v63 }
  0x92   :  { %7030 = vst [vmem:[#allocation21_spill] sm:$0xff] %v3704_v25  ;;  %v3724_v36 = vpop.eup %3431  ;;  %v541_v13 = vmul.f32 0.6931472, %v3426_v23  ;;  %v543_v46 = vmul.f32 0.6931472, %v3428_v29  ;;  %v3731_v21 = vmul.f32 -2.0, %v533_v30  ;;  %3443 = vrsqrt.f32 %v3720_v34 }
  0x93   :  { %7031 = vst [vmem:[#allocation22_spill] sm:$0xff] %v3706_v61  ;;  %v545_v47 = vmul.f32 0.6931472, %v3430_v32  ;;  %v3342_v15 = vadd.s32 4294967169, %v774_v40  ;;  %v3734_v18 = vmul.f32 -2.0, %v535_v33  ;;  %v3736_v19 = vmul.f32 -2.0, %v537_v3  ;;  %v3741_v1 = vpop.eup %3433 }
  0x94   :  { %7032 = vst [vmem:[#allocation23_spill] sm:$0xff] %v3712_v27  ;;  %v563_v44 = vmul.f32 %v3724_v36, %v3680_v60  ;;  %v777_v7 = vand.u32 8388607, %v6897_v39  ;;  %v3747_v50 = vmul.f32 -2.0, %v539_v41  ;;  %v3749_v9 = vmul.f32 -2.0, %v541_v13  ;;  %v3758_v53 = vpop.eup %3435 }
  0x95   :  { %7033 = vst [vmem:[#allocation24_spill] sm:$0xff] %v3714_v28  ;;  %v780_v20 = vadd.s32 1, %v3342_v15  ;;  %v3751_v10 = vmul.f32 -2.0, %v543_v46  ;;  %v3754_v12 = vmul.f32 -2.0, %v545_v47  ;;  %3445 = vrsqrt.f32 %v3722_v35  ;;  %v3763_v24 = vpop.eup %3437 }
  0x96   :  { %7034 = vst [vmem:[#allocation25_spill] sm:$0xff] %v3717_v11  ;;  %v564_v57 = vmul.f32 %v3724_v36, %v563_v44  ;;  %v575_v22 = vmul.f32 %v3741_v1, %v3683_v2  ;;  %v778_v45 = vor.u32 8388608, %v777_v7  ;;  %v3765_v29 = vpop.eup %3439  ;;  %v927_v31 = vand.u32 2139095040, %v3687_v4 }
  0x97   :  { %7035 = vst [vmem:[#allocation26_spill] sm:$0xff] %v3726_v37  ;;  %vm781_vm0 = vcmp.gt.s32.totalorder %v780_v20, 0  ;;  %v3770_v32 = vpop.eup %3441  ;;  %v6900_v3 = vmov 683565275   ;;  %v6898_v41 = vmov 2475754826   ;;  %v587_v44 = vmul.f32 %v3758_v53, %v3690_v5 }
  0x98   :  { %7036 = vst [vmem:[#allocation27_spill] sm:$0xff] %v3731_v21  ;;  %v782_v58 = vsel %vm781_vm0, %v780_v20, 0  ;;  %v6902_v46 = vmov 2131351028   ;;  %v3777_v15 = vpop.eup %3443  ;;  %v6904_v7 = vmov 2102212464   ;;  %3447 = vrsqrt.f32 %v3726_v37 }
  0x99   :  { %7037 = vst [vmem:[#allocation28_spill] sm:$0xff] %v3734_v18  ;;  %v784_v23 = vand.u32 31, %v782_v58  ;;  %v3767_v30 = vshrl.u32 %v782_v58, 5  ;;  %v6910_v58 = vmov 920167782   ;;  %v3791_v43 = vshll.u32 %v778_v45, 8 }
  0x9a   :  { %7038 = vst [vmem:[#allocation29_spill] sm:$0xff] %v3736_v19  ;;  %v6908_v52 = vmov 1326507024   ;;  %v3835_v27 = vmul.f32 0.5, %v564_v57  ;;  %v3859_v61 = vmul.f32 %v3770_v32, %v3710_v63  ;;  %3449 = vrsqrt.f32 %v3731_v21 }
  0x9b   :  { %7039 = vst [vmem:[#allocation30_spill] sm:$0xff] %v3747_v50  ;;  %v3772_v33 = vsub.s32 32, %v784_v23  ;;  %v787_v40 = vshll.u32 %v6900_v3, %v784_v23  ;;  %v790_v13 = vshll.u32 %v6898_v41, %v784_v23  ;;  %v793_v47 = vshll.u32 %v6902_v46, %v784_v23  ;;  %v3783_v42 = vpop.eup %3445 }
  0x9c   :  { %7040 = vst [vmem:[#allocation31_spill] sm:$0xff] %v3749_v9  ;;  %v796_v20 = vshll.u32 %v6904_v7, %v784_v23  ;;  %v799_v39 = vshll.u32 %v6910_v58, %v784_v23  ;;  %vm802_vm1 = vcmp.lt.s32.totalorder %v3767_v30, 1  ;;  %vm805_vm2 = vcmp.lt.s32.totalorder %v3767_v30, 4 }
  0x9d   :  { %7041 = vst [vmem:[#allocation32_spill] sm:$0xff] %v3751_v10  ;;  %v788_v26 = vshrl.u32 %v6898_v41, %v3772_v33  ;;  %v791_v38 = vshrl.u32 %v6902_v46, %v3772_v33  ;;  %v794_v56 = vshrl.u32 %v6904_v7, %v3772_v33  ;;  %v797_v54 = vshrl.u32 %v6910_v58, %v3772_v33 }
  0x9e   :  { %7042 = vst [vmem:[#allocation33_spill] sm:$0xff] %v3754_v12  ;;  %v800_v23 = vshrl.u32 %v6908_v52, %v3772_v33  ;;  %v928_v7 = vshrl.u32 %v927_v31, 23  ;;  %vm804_vm3 = vcmp.lt.s32.totalorder %v3767_v30, 3  ;;  %vm803_vm4 = vcmp.lt.s32.totalorder %v3767_v30, 2  ;;  %v3841_v17 = vpop.eup %3447 }
  0x9f   :  { %v3799_v41 = vor.u32 %v788_v26, %v787_v40  ;;  %v3801_v3 = vor.u32 %v791_v38, %v790_v13  ;;  %v3803_v46 = vor.u32 %v794_v56, %v793_v47  ;;  %v798_v11 = vor.u32 %v797_v54, %v796_v20  ;;  %7043 = vst [vmem:[#allocation34_spill] sm:$0xff] %v3841_v17 }
  0xa0   :  { %v801_v28 = vor.u32 %v800_v23, %v799_v39  ;;  %v576_v38 = vmul.f32 %v3741_v1, %v575_v22  ;;  %v3345_v31 = vadd.s32 4294967169, %v928_v7  ;;  %v819_v47 = vand.u32 65535, %v3791_v43 }
  0xa1   :  { %v810_v26 = vsel %vm802_vm1, %v3799_v41, %v3801_v3  ;;  %v814_v56 = vsel %vm802_vm1, %v3801_v3, %v3803_v46  ;;  %v811_v54 = vsel %vm805_vm2, %v798_v11, 920167782  ;;  %v820_v20 = vshrl.u32 %v3791_v43, 16 }
  0xa2   :  { %v815_v39 = vsel %vm805_vm2, %v801_v28, 1326507024  ;;  %v812_v40 = vsel %vm804_vm3, %v3803_v46, %v811_v54  ;;  %v599_v22 = vmul.f32 %v3763_v24, %v3692_v6  ;;  %v934_v7 = vadd.s32 1, %v3345_v31 }
  0xa3   :  { %v816_v13 = vsel %vm804_vm3, %v798_v11, %v815_v39  ;;  %v813_v23 = vsel %vm803_vm4, %v810_v26, %v812_v40  ;;  %v588_v11 = vmul.f32 %v3758_v53, %v587_v44  ;;  %v611_v39 = vmul.f32 %v3765_v29, %v3708_v62 }
  0xa4   :  { %v817_v28 = vsel %vm803_vm4, %v814_v56, %v816_v13  ;;  %v843_v54 = vand.u32 65535, %v813_v23  ;;  %v844_v58 = vshrl.u32 %v813_v23, 16  ;;  %vm935_vm5 = vcmp.gt.s32.totalorder %v934_v7, 0 }
  0xa5   :  { %v821_v45 = vand.u32 65535, %v817_v28  ;;  %v822_v52 = vshrl.u32 %v817_v28, 16  ;;  %v3852_v44 = vmul.f32 0.5, %v576_v38  ;;  %v3855_v28 = vmul.f32 %v3763_v24, %v599_v22 }
  0xa6   :  { %v845_v13 = vmul.u32 %v843_v54, %v819_v47  ;;  %v3848_v23 = vmul.u32 %v844_v58, %v819_v47  ;;  %v3850_v57 = vmul.u32 %v843_v54, %v820_v20  ;;  %v7044_v54 = vand.u32 2147483647, %v3687_v4 }
  0xa7   :  { %v823_v40 = vmul.u32 %v821_v45, %v819_v47  ;;  %v3844_v56 = vmul.u32 %v822_v52, %v819_v47  ;;  %v3846_v31 = vmul.u32 %v821_v45, %v820_v20  ;;  %v936_v0 = vsel %vm935_vm5, %v934_v7, 0 }
  0xa8   :  { %v849_v47 = vshll.u32 %v3848_v23, 16  ;;  %v931_v25 = vand.u32 8388607, %v7044_v54  ;;  %v6924_v22 = vshll.u32 %v3850_v57, 16  ;;  %v826_v51 = vmul.u32 %v822_v52, %v820_v20 }
  0xa9   :  { %v827_v26 = vshll.u32 %v3844_v56, 16  ;;  %v829_v45 = vshll.u32 %v3846_v31, 16  ;;  %v566_v49 = vsub.f32 1.5, %v3835_v27  ;;  %v848_v16 = vmul.u32 %v844_v58, %v820_v20 }
  0xaa   :  { %vm853_vm7 = vc.u32 %v845_v13, %v849_v47  ;;  %v3868_v14 = vadd.s32 %v849_v47, %v845_v13  ;;  %v938_v12 = vand.u32 31, %v936_v0  ;;  %v3872_v10 = vmul.f32 0.5, %v588_v11  ;;  %v3883_v13 = vpop.eup %3449 }
  0xab   :  { %vm831_vm6 = vc.u32 %v823_v40, %v827_v26  ;;  %v833_v38 = vadd.s32 %v827_v26, %v823_v40  ;;  %v854_v54 = vsel %vm853_vm7, 1, %v6919_v55  ;;  %v932_v26 = vor.u32 8388608, %v931_v25  ;;  %7046 = vst [vmem:[#allocation35_spill] sm:$0xff] %v3883_v13 }
  0xac   :  { %v832_v48 = vsel %vm831_vm6, 1, %v6919_v55  ;;  %vm857_vm9 = vc.u32 %v3868_v14, %v6924_v22  ;;  %v3878_v52 = vshrl.u32 %v936_v0, 5  ;;  %v3880_v7 = vsub.s32 32, %v938_v12 }
  0xad   :  { %vm835_vm8 = vc.u32 %v833_v38, %v829_v45  ;;  %v7045_v27 = vmov 683565275   ;;  %v834_v58 = vadd.s32 %v832_v48, %v826_v51  ;;  %v7047_v20 = vmov 2475754826  }
  0xae   :  { %v941_v40 = vshll.u32 %v7045_v27, %v938_v12  ;;  %v944_v11 = vshll.u32 %v7047_v20, %v938_v12  ;;  %v7048_v47 = vmov 2131351028   ;;  %v7049_v38 = vmov 2102212464  }
  0xaf   :  { %v947_v45 = vshll.u32 %v7048_v47, %v938_v12  ;;  %v950_v55 = vshll.u32 %v7049_v38, %v938_v12  ;;  %v7050_v25 = vmov 0   ;;  %v856_v9 = vadd.s32 %v854_v54, %v848_v16 }
  0xb0   :  { %v836_v4 = vsel %vm835_vm8, 1, %v7050_v25  ;;  %v942_v0 = vshrl.u32 %v7047_v20, %v3880_v7  ;;  %v945_v22 = vshrl.u32 %v7048_v47, %v3880_v7  ;;  %v858_v50 = vsel %vm857_vm9, 1, %v7050_v25 }
  0xb1   :  { %v948_v48 = vshrl.u32 %v7049_v38, %v3880_v7  ;;  %v7051_v51 = vmov 920167782   ;;  %v612_v18 = vmul.f32 %v3765_v29, %v611_v39  ;;  %v7052_v54 = vmov 1326507024  }
  0xb2   :  { %v951_v19 = vshrl.u32 %v7051_v51, %v3880_v7  ;;  %v953_v59 = vshll.u32 %v7051_v51, %v938_v12  ;;  %v3900_v13 = vor.u32 %v942_v0, %v941_v40  ;;  %v3902_v16 = vor.u32 %v945_v22, %v944_v11 }
  0xb3   :  { %v954_v20 = vshrl.u32 %v7052_v54, %v3880_v7  ;;  %v3906_v47 = vor.u32 %v948_v48, %v947_v45  ;;  %vm956_vm10 = vcmp.lt.s32.totalorder %v3878_v52, 1  ;;  %v3909_v38 = vshll.u32 %v932_v26, 8 }
  0xb4   :  { %v952_v21 = vor.u32 %v951_v19, %v950_v55  ;;  %v828_v17 = vshrl.u32 %v3844_v56, 16  ;;  %v838_v37 = vadd.s32 %v836_v4, %v834_v58  ;;  %v850_v12 = vshrl.u32 %v3848_v23, 16 }
  0xb5   :  { %v860_v39 = vadd.s32 %v858_v50, %v856_v9  ;;  %v955_v40 = vor.u32 %v954_v20, %v953_v59  ;;  %vm6938_vm11 = vcmp.lt.s32.totalorder %v3878_v52, 2  ;;  %vm958_vm12 = vcmp.lt.s32.totalorder %v3878_v52, 3 }
  0xb6   :  { %vm959_vm13 = vcmp.lt.s32.totalorder %v3878_v52, 4  ;;  %v578_v22 = vsub.f32 1.5, %v3852_v44  ;;  %v635_v55 = vmul.f32 %v3777_v15, %v3720_v34  ;;  %v964_v4 = vsel %vm956_vm10, %v3900_v13, %v3902_v16 }
  0xb7   :  { %v965_v19 = vsel %vm959_vm13, %v952_v21, 920167782  ;;  %v786_v59 = vshrl.u32 %v7045_v27, %v3772_v33  ;;  %v807_v50 = vsel %vm805_vm2, %v3803_v46, 2102212464  ;;  %v830_v9 = vshrl.u32 %v3846_v31, 16 }
  0xb8   :  { %v966_v56 = vsel %vm958_vm12, %v3906_v47, %v965_v19  ;;  %v852_v23 = vshrl.u32 %v3850_v57, 16  ;;  %v861_v44 = vadd.s32 %v860_v39, %v850_v12  ;;  %v968_v33 = vsel %vm956_vm10, %v3902_v16, %v3906_v47 }
  0xb9   :  { %v3937_v26 = vsel %vm6938_vm11, %v964_v4, %v966_v56  ;;  %v839_v58 = vadd.s32 %v838_v37, %v828_v17  ;;  %v969_v46 = vsel %vm959_vm13, %v955_v40, 1326507024  ;;  %v973_v31 = vand.u32 65535, %v3909_v38 }
  0xba   :  { %v998_v20 = vshrl.u32 %v3937_v26, 16  ;;  %v601_v11 = vmul.f32 0.5, %v3855_v28  ;;  %v624_v45 = vmul.f32 %v3770_v32, %v3859_v61  ;;  %v970_v0 = vsel %vm958_vm12, %v952_v21, %v969_v46 }
  0xbb   :  { %v1081_v48 = vand.u32 2139095040, %v3694_v8  ;;  %v567_v12 = vmul.f32 %v3724_v36, %v566_v49  ;;  %v647_v17 = vmul.f32 %v3783_v42, %v3722_v35  ;;  %v806_v37 = vsel %vm802_vm1, %v786_v59, %v3799_v41 }
  0xbc   :  { %v971_v28 = vsel %vm6938_vm11, %v968_v33, %v970_v0  ;;  %vm569_vm14 = vcmp.eq.f32.partialorder %v3680_v60, inf  ;;  %v808_v61 = vsel %vm804_vm3, %v3801_v3, %v807_v50  ;;  %v7053_v21 = vshll.u32 %v3850_v57, 16 }
  0xbd   :  { %v862_v36 = vadd.s32 %v861_v44, %v852_v23  ;;  %v976_v39 = vshrl.u32 %v971_v28, 16  ;;  %v3970_v40 = vadd.s32 %v839_v58, %v830_v9  ;;  %v974_v41 = vshrl.u32 %v3909_v38, 16 }
  0xbe   :  { %v3968_v49 = vadd.s32 %v3868_v14, %v7053_v21  ;;  %v997_v4 = vand.u32 65535, %v3937_v26  ;;  %v3976_v19 = vmul.u32 %v998_v20, %v973_v31  ;;  %v590_v59 = vsub.f32 1.5, %v3872_v10 }
  0xbf   :  { %v975_v3 = vand.u32 65535, %v971_v28  ;;  %v3979_v50 = vmul.u32 %v976_v39, %v973_v31  ;;  %v1082_v57 = vshrl.u32 %v1081_v48, 23  ;;  %vm571_vm15 = vcmp.eq.f32.partialorder %v3680_v60, 0.0 }
  0xc0   :  { %v579_v14 = vmul.f32 %v3741_v1, %v578_v22  ;;  %vm581_vm0 = vcmp.eq.f32.partialorder %v3683_v2, inf  ;;  %v602_v9 = vsub.f32 1.5, %v601_v11  ;;  %v613_v56 = vmul.f32 0.5, %v612_v18 }
  0xc1   :  { %v636_v23 = vmul.f32 %v3777_v15, %v635_v55  ;;  %vm593_vm1 = vcmp.eq.f32.partialorder %v3690_v5, inf  ;;  %v625_v44 = vmul.f32 0.5, %v624_v45  ;;  %v648_v33 = vmul.f32 %v3783_v42, %v647_v17 }
  0xc2   :  { %v809_v10 = vsel %vm803_vm4, %v806_v37, %v808_v61  ;;  %v866_v58 = vadd.s32 1, %v862_v36  ;;  %vm865_vm2 = vc.u32 %v3970_v40, %v3968_v49  ;;  %v999_v46 = vmul.u32 %v997_v4, %v973_v31 }
  0xc3   :  { %v3991_v1 = vmul.u32 %v997_v4, %v974_v41  ;;  %v1003_v22 = vshll.u32 %v3976_v19, 16  ;;  %v977_v18 = vmul.u32 %v975_v3, %v973_v31  ;;  %v3994_v11 = vmul.u32 %v975_v3, %v974_v41 }
  0xc4   :  { %v981_v55 = vshll.u32 %v3979_v50, 16  ;;  %v3348_v45 = vadd.s32 4294967169, %v1082_v57  ;;  %v568_v0 = vmul.f32 %v567_v12, %v3680_v60  ;;  %vm583_vm3 = vcmp.eq.f32.partialorder %v3683_v2, 0.0 }
  0xc5   :  { %v591_v30 = vmul.f32 %v3758_v53, %v590_v59  ;;  %vm595_vm4 = vcmp.eq.f32.partialorder %v3690_v5, 0.0  ;;  %v614_v48 = vsub.f32 1.5, %v613_v56  ;;  %v863_v17 = vmul.u32 %v3791_v43, %v809_v10  ;;  %v7065_v53 = vld [vmem:[#allocation35_spill] sm:$0xff] }
  0xc6   :  { %v580_v37 = vmul.f32 %v579_v14, %v3683_v2  ;;  %v603_v31 = vmul.f32 %v3763_v24, %v602_v9  ;;  %vm605_vm5 = vcmp.eq.f32.partialorder %v3692_v6, inf  ;;  %v637_v28 = vmul.f32 0.5, %v636_v23 }
  0xc7   :  { %v867_v12 = vsel %vm865_vm2, %v866_v58, %v862_v36  ;;  %v626_v61 = vsub.f32 1.5, %v625_v44  ;;  %v6939_v21 = vshll.u32 %v3991_v1, 16  ;;  %vm4009_vm6 = vc.u32 %v999_v46, %v1003_v22 }
  0xc8   :  { %v4013_v4 = vadd.s32 %v1003_v22, %v999_v46  ;;  %vm617_vm7 = vcmp.eq.f32.partialorder %v3708_v62, inf  ;;  %vm629_vm8 = vcmp.eq.f32.partialorder %v3710_v63, inf  ;;  %v983_v43 = vshll.u32 %v3994_v11, 16 }
  0xc9   :  { %vm985_vm9 = vc.u32 %v977_v18, %v981_v55  ;;  %v987_v24 = vadd.s32 %v981_v55, %v977_v18  ;;  %v1088_v59 = vadd.s32 1, %v3348_v45  ;;  %v570_v36 = vsel %vm569_vm14, %v3680_v60, %v568_v0  ;;  %v7058_v0 = vld [vmem:[#allocation26_spill] sm:$0xff] }
  0xca   :  { %v592_v3 = vmul.f32 %v591_v30, %v3690_v5  ;;  %v615_v57 = vmul.f32 %v3765_v29, %v614_v48  ;;  %v4023_v14 = vadd.s32 %v867_v12, %v863_v17  ;;  %v638_v9 = vsub.f32 1.5, %v637_v28  ;;  %v7059_v30 = vld [vmem:[#allocation34_spill] sm:$0xff] }
  0xcb   :  { %v980_v56 = vmul.u32 %v976_v39, %v974_v41  ;;  %v1002_v23 = vmul.u32 %v998_v20, %v974_v41  ;;  %vm1089_vm2 = vcmp.gt.s32.totalorder %v1088_v59, 0  ;;  %v627_v44 = vmul.f32 %v3770_v32, %v626_v61  ;;  %v7064_v61 = vld [vmem:[#allocation27_spill] sm:$0xff] }
  0xcc   :  { %v649_v10 = vmul.f32 0.5, %v648_v33  ;;  %v986_v58 = vsel %vm985_vm9, 1, %v7050_v25  ;;  %v1008_v46 = vsel %vm4009_vm6, 1, %v7050_v25  ;;  %v7056_v22 = vand.u32 2147483648, %v3680_v60 }
  0xcd   :  { %v582_v26 = vsel %vm581_vm0, %v3683_v2, %v580_v37  ;;  %vm989_vm14 = vc.u32 %v987_v24, %v983_v43  ;;  %vm1011_vm11 = vc.u32 %v4013_v4, %v6939_v21  ;;  %v594_v32 = vsel %vm593_vm1, %v3690_v5, %v592_v3 }
  0xce   :  { %v4036_v29 = vsel %vm571_vm15, %v7056_v22, %v570_v36  ;;  %v604_v20 = vmul.f32 %v603_v31, %v3692_v6  ;;  %v869_v39 = vadd.s32 536870912, %v4023_v14  ;;  %v1090_v60 = vsel %vm1089_vm2, %v1088_v59, 0 }
  0xcf   :  { %7057 = vst [vmem:[#allocation36_spill] sm:$0xff] %v4036_v29  ;;  %v616_v41 = vmul.f32 %v615_v57, %v3708_v62  ;;  %v639_v33 = vmul.f32 %v3777_v15, %v638_v9  ;;  %v988_v18 = vadd.s32 %v986_v58, %v980_v56  ;;  %v1010_v55 = vadd.s32 %v1008_v46, %v1002_v23 }
  0xd0   :  { %v628_v45 = vmul.f32 %v627_v44, %v3710_v63  ;;  %v659_v48 = vmul.f32 %v7059_v30, %v7058_v0  ;;  %v990_v17 = vsel %vm989_vm14, 1, %v7050_v25  ;;  %v1012_v37 = vsel %vm1011_vm11, 1, %v7050_v25 }
  0xd1   :  { %v7060_v31 = vand.u32 2147483648, %v3683_v2  ;;  %v7062_v12 = vand.u32 2147483648, %v3690_v5  ;;  %v671_v43 = vmul.f32 %v7065_v53, %v7064_v61  ;;  %v1092_v24 = vand.u32 31, %v1090_v60 }
  0xd2   :  { %v4073_v59 = vsel %vm605_vm5, %v3692_v6, %v604_v20  ;;  %v650_v36 = vsub.f32 1.5, %v649_v10  ;;  %v4075_v3 = vshrl.u32 %v869_v39, 30  ;;  %v1004_v2 = vshrl.u32 %v3976_v19, 16 }
  0xd3   :  { %v4060_v28 = vsel %vm583_vm3, %v7060_v31, %v582_v26  ;;  %v4066_v15 = vsel %vm595_vm4, %v7062_v12, %v594_v32  ;;  %v982_v57 = vshrl.u32 %v3979_v50, 16  ;;  %v992_v9 = vadd.s32 %v990_v17, %v988_v18 }
  0xd4   :  { %7061 = vst [vmem:[#allocation26_spill] sm:$0xff] %v4060_v28  ;;  %v1014_v5 = vadd.s32 %v1012_v37, %v1010_v55  ;;  %v4079_v56 = vsub.s32 32, %v1092_v24  ;;  %v4084_v23 = vsel %vm617_vm7, %v3708_v62, %v616_v41  ;;  %v4089_v44 = vsel %vm629_vm8, %v3710_v63, %v628_v45 }
  0xd5   :  { %7063 = vst [vmem:[#allocation34_spill] sm:$0xff] %v4066_v15  ;;  %v4092_v10 = vmul.f32 %v639_v33, %v3720_v34  ;;  %v660_v19 = vmul.f32 %v7059_v30, %v659_v48  ;;  %v672_v50 = vmul.f32 %v7065_v53, %v671_v43  ;;  %v940_v58 = vshrl.u32 %v7045_v27, %v3880_v7 }
  0xd6   :  { %7066 = vst [vmem:[#allocation27_spill] sm:$0xff] %v4075_v3  ;;  %v961_v46 = vsel %vm959_vm13, %v3906_v47, 2102212464  ;;  %v871_v26 = vshll.u32 %v4075_v3, 30  ;;  %v984_v32 = vshrl.u32 %v3994_v11, 16  ;;  %v1006_v20 = vshrl.u32 %v3991_v1, 16 }
  0xd7   :  { %v7067_v39 = vmov 2102212464   ;;  %v993_v33 = vadd.s32 %v992_v9, %v982_v57  ;;  %v1015_v18 = vadd.s32 %v1014_v5, %v1004_v2  ;;  %v4106_v55 = vshrl.u32 %v1090_v60, 5 }
  0xd8   :  { %v1104_v41 = vshll.u32 %v7067_v39, %v1092_v24  ;;  %v1105_v7 = vshrl.u32 %v7051_v51, %v4079_v56  ;;  %v1095_v45 = vshll.u32 %v7045_v27, %v1092_v24  ;;  %v7068_v47 = vmov 2475754826  }
  0xd9   :  { %v1098_v48 = vshll.u32 %v7068_v47, %v1092_v24  ;;  %v1107_v17 = vshll.u32 %v7051_v51, %v1092_v24  ;;  %v1108_v11 = vshrl.u32 %v7052_v54, %v4079_v56  ;;  %vm607_vm11 = vcmp.eq.f32.partialorder %v3692_v6, 0.0 }
  0xda   :  { %vm619_vm13 = vcmp.eq.f32.partialorder %v3708_v62, 0.0  ;;  %vm631_vm15 = vcmp.eq.f32.partialorder %v3710_v63, 0.0  ;;  %v1096_v60 = vshrl.u32 %v7068_v47, %v4079_v56  ;;  %v7069_v37 = vmov 2131351028  }
  0xdb   :  { %v1099_v31 = vshrl.u32 %v7069_v37, %v4079_v56  ;;  %v1101_v12 = vshll.u32 %v7069_v37, %v1092_v24  ;;  %v1102_v43 = vshrl.u32 %v7067_v39, %v4079_v56  ;;  %vm641_vm0 = vcmp.eq.f32.partialorder %v3720_v34, inf }
  0xdc   :  { %v651_v2 = vmul.f32 %v3783_v42, %v650_v36  ;;  %v661_v57 = vmul.f32 0.5, %v660_v19  ;;  %v4128_v9 = vsub.s32 %v4023_v14, %v871_v26  ;;  %v1106_v5 = vor.u32 %v1105_v7, %v1104_v41 }
  0xdd   :  { %vm653_vm1 = vcmp.eq.f32.partialorder %v3722_v35, inf  ;;  %v960_v21 = vsel %vm956_vm10, %v940_v58, %v3900_v13  ;;  %v1016_v22 = vadd.s32 %v1015_v18, %v1006_v20  ;;  %v7070_v24 = vand.u32 2147483647, %v3694_v8 }
  0xde   :  { %vm1113_vm3 = vcmp.lt.s32.totalorder %v4106_v55, 4  ;;  %v962_v42 = vsel %vm958_vm12, %v3902_v16, %v961_v46  ;;  %v4140_v36 = vadd.s32 %v993_v33, %v984_v32  ;;  %v7071_v14 = vshll.u32 %v3991_v1, 16  ;;  %v7073_v32 = vld [vmem:[#allocation28_spill] sm:$0xff] }
  0xdf   :  { %v1085_v29 = vand.u32 8388607, %v7070_v24  ;;  %v1109_v26 = vor.u32 %v1108_v11, %v1107_v17  ;;  %vm643_vm10 = vcmp.eq.f32.partialorder %v3720_v34, 0.0  ;;  %v673_v13 = vmul.f32 0.5, %v672_v50  ;;  %v7074_v17 = vld [vmem:[#allocation17_spill] sm:$0xff] }
  0xe0   :  { %v4145_v19 = vadd.s32 %v4013_v4, %v7071_v14  ;;  %v4148_v58 = vor.u32 %v1096_v60, %v1095_v45  ;;  %v4150_v20 = vor.u32 %v1099_v31, %v1098_v48  ;;  %v4152_v41 = vor.u32 %v1102_v43, %v1101_v12 }
  0xe1   :  { %v874_v18 = vsub.s32 0, %v4128_v9  ;;  %vm1110_vm12 = vcmp.lt.s32.totalorder %v4106_v55, 1  ;;  %vm1112_vm4 = vcmp.lt.s32.totalorder %v4106_v55, 3  ;;  %v1119_v16 = vsel %vm1113_vm3, %v1106_v5, 920167782 }
  0xe2   :  { %vm655_vm5 = vcmp.eq.f32.partialorder %v3722_v35, 0.0  ;;  %vm873_vm6 = vcmp.lt.s32.totalorder %v4128_v9, 0  ;;  %vm7072_vm7 = vcmp.lt.s32.totalorder %v3878_v52, 2  ;;  %v1020_v4 = vadd.s32 1, %v1016_v22 }
  0xe3   :  { %v963_v1 = vsel %vm7072_vm7, %v960_v21, %v962_v42  ;;  %v1086_v50 = vor.u32 8388608, %v1085_v29  ;;  %v662_v46 = vsub.f32 1.5, %v661_v57  ;;  %3451 = vrsqrt.f32 %v7073_v32 }
  0xe4   :  { %vm1019_vm8 = vc.u32 %v4140_v36, %v4145_v19  ;;  %v1123_v33 = vsel %vm1113_vm3, %v1109_v26, 1326507024  ;;  %v674_v7 = vsub.f32 1.5, %v673_v13  ;;  %vm1111_vm9 = vcmp.lt.s32.totalorder %v4106_v55, 2  ;;  %v7112_v55 = vld [vmem:[#allocation20_spill] sm:$0xff] }
  0xe5   :  { %v1118_v52 = vsel %vm1110_vm12, %v4148_v58, %v4150_v20  ;;  %v1120_v21 = vsel %vm1112_vm4, %v4152_v41, %v1119_v16  ;;  %v652_v29 = vmul.f32 %v651_v2, %v3722_v35  ;;  %vm665_vm2 = vcmp.eq.f32.partialorder %v7058_v0, inf }
  0xe6   :  { %v875_v45 = vsel %vm873_vm6, %v874_v18, %v4128_v9  ;;  %v1017_v48 = vmul.u32 %v3909_v38, %v963_v1  ;;  %v1235_v11 = vand.u32 2139095040, %v7074_v17  ;;  %v1021_v60 = vsel %vm1019_vm8, %v1020_v4, %v1016_v22  ;;  %v7084_v4 = vld [vmem:[#allocation30_spill] sm:$0xff] }
  0xe7   :  { %v1122_v31 = vsel %vm1110_vm12, %v4150_v20, %v4152_v41  ;;  %v1124_v12 = vsel %vm1112_vm4, %v1106_v5, %v1123_v33  ;;  %v4187_v43 = vshll.u32 %v1086_v50, 8  ;;  %v7075_v2 = vand.u32 2147483648, %v3692_v6 }
  0xe8   :  { %v7077_v38 = vand.u32 2147483648, %v3708_v62  ;;  %v7079_v24 = vand.u32 2147483648, %v3710_v63  ;;  %v4212_v42 = vsel %vm1111_vm9, %v1118_v52, %v1120_v21  ;;  %v642_v6 = vsel %vm641_vm0, %v3720_v34, %v4092_v10 }
  0xe9   :  { %v4194_v57 = vsel %vm607_vm11, %v7075_v2, %v4073_v59  ;;  %v663_v62 = vmul.f32 %v7059_v30, %v662_v46  ;;  %vm667_vm14 = vcmp.eq.f32.partialorder %v7058_v0, 0.0  ;;  %v675_v59 = vmul.f32 %v7065_v53, %v674_v7  ;;  %v4222_v63 = vpop.eup %3451  ;;  %v7081_v30 = vld [vmem:[#allocation29_spill] sm:$0xff] }
  0xea   :  { %7076 = vst [vmem:[#allocation35_spill] sm:$0xff] %v4194_v57  ;;  %v4201_v22 = vsel %vm619_vm13, %v7077_v38, %v4084_v23  ;;  %v4208_v5 = vsel %vm631_vm15, %v7079_v24, %v4089_v44  ;;  %vm677_vm11 = vcmp.eq.f32.partialorder %v7064_v61, inf  ;;  %v654_v23 = vsel %vm653_vm1, %v3722_v35, %v652_v29 }
  0xeb   :  { %7078 = vst [vmem:[#allocation28_spill] sm:$0xff] %v4201_v22  ;;  %v876_v44 = vclz %v875_v45  ;;  %v4227_v14 = vadd.s32 %v1021_v60, %v1017_v48  ;;  %v4231_v10 = vsel %vm1111_vm9, %v1122_v31, %v1124_v12  ;;  %3453 = vrsqrt.f32 %v7081_v30  ;;  %v7093_v12 = vld [vmem:[#allocation33_spill] sm:$0xff] }
  0xec   :  { %7080 = vst [vmem:[#allocation37_spill] sm:$0xff] %v4208_v5  ;;  %v1127_v26 = vand.u32 65535, %v4187_v43  ;;  %v1152_v53 = vshrl.u32 %v4212_v42, 16  ;;  %v1236_v13 = vshrl.u32 %v1235_v11, 23  ;;  %v7082_v18 = vand.u32 2147483648, %v3720_v34 }
  0xed   :  { %vm679_vm13 = vcmp.eq.f32.partialorder %v7064_v61, 0.0  ;;  %v680_v1 = vand.u32 2147483648, %v7064_v61  ;;  %3455 = vrsqrt.f32 %v7084_v4  ;;  %v664_v50 = vmul.f32 %v663_v62, %v7058_v0 }
  0xee   :  { %v4240_v16 = vsel %vm643_vm10, %v7082_v18, %v642_v6  ;;  %v676_v46 = vmul.f32 %v675_v59, %v7064_v61  ;;  %v1130_v7 = vshrl.u32 %v4231_v10, 16  ;;  %v7085_v52 = vand.u32 2147483648, %v3722_v35  ;;  %v7087_v35 = vld [vmem:[#allocation31_spill] sm:$0xff] }
  0xef   :  { %7083 = vst [vmem:[#allocation29_spill] sm:$0xff] %v4240_v16  ;;  %v683_v21 = vmul.f32 %v4222_v63, %v7073_v32  ;;  %v3343_v29 = vadd.s32 4294967294, %v876_v44  ;;  %v1023_v45 = vadd.s32 536870912, %v4227_v14  ;;  %v1128_v48 = vshrl.u32 %v4187_v43, 16 }
  0xf0   :  { %v4253_v34 = vsel %vm655_vm5, %v7085_v52, %v654_v23  ;;  %v1151_v11 = vand.u32 65535, %v4212_v42  ;;  %v4260_v60 = vmul.u32 %v1152_v53, %v1127_v26  ;;  %v3351_v31 = vadd.s32 4294967169, %v1236_v13  ;;  %v7088_v13 = vld [vmem:[#allocation32_spill] sm:$0xff] }
  0xf1   :  { %7086 = vst [vmem:[#allocation30_spill] sm:$0xff] %v4253_v34  ;;  %3457 = vrsqrt.f32 %v7087_v35  ;;  %v4266_v24 = vpop.eup %3453  ;;  %v666_v6 = vsel %vm665_vm2, %v7058_v0, %v664_v50  ;;  %v678_v42 = vsel %vm677_vm11, %v7064_v61, %v676_v46  ;;  %v1129_v62 = vand.u32 65535, %v4231_v10  ;;  %v7094_v61 = vld [vmem:[#allocation10_spill] sm:$0xff] }
  0xf2   :  { %v4275_v59 = vmul.u32 %v1130_v7, %v1127_v26  ;;  %v684_v44 = vmul.f32 %v4222_v63, %v683_v21  ;;  %3459 = vrsqrt.f32 %v7088_v13  ;;  %vm3344_vm15 = vcmp.lt.s32.totalorder %v3343_v29, 0 }
  0xf3   :  { %v4277_v23 = vpop.eup %3455  ;;  %v4281_v18 = vshrl.u32 %v1023_v45, 30  ;;  %v1153_v52 = vmul.u32 %v1151_v11, %v1127_v26  ;;  %v4283_v38 = vmul.u32 %v1151_v11, %v1128_v48  ;;  %v1157_v50 = vshll.u32 %v4260_v60, 16 }
  0xf4   :  { %v1242_v2 = vadd.s32 1, %v3351_v31  ;;  %v7090_v46 = vand.u32 2147483648, %v7058_v0  ;;  %v4294_v21 = vsel %vm679_vm13, %v680_v1, %v678_v42  ;;  %v695_v45 = vmul.f32 %v4266_v24, %v7081_v30 }
  0xf5   :  { %7089 = vst [vmem:[#allocation38_spill] sm:$0xff] %v4281_v18  ;;  %3461 = vrsqrt.f32 %v7093_v12  ;;  %v707_v11 = vmul.f32 %v4277_v23, %v7084_v4  ;;  %v1131_v33 = vmul.u32 %v1129_v62, %v1127_v26  ;;  %v4301_v31 = vmul.u32 %v1129_v62, %v1128_v48 }
  0xf6   :  { %v4290_v10 = vsel %vm667_vm14, %v7090_v46, %v666_v6  ;;  %7092 = vst [vmem:[#allocation40_spill] sm:$0xff] %v4294_v21  ;;  %v1135_v34 = vshll.u32 %v4275_v59, 16  ;;  %v4306_v6 = vmul.f32 0.5, %v684_v44  ;;  %v4309_v1 = vmul.f32 6.2831855, %v7094_v61 }
  0xf7   :  { %7091 = vst [vmem:[#allocation39_spill] sm:$0xff] %v4290_v10  ;;  %v4304_v0 = vpop.eup %3457  ;;  %v879_v42 = vsel %vm3344_vm15, 0, %v3343_v29  ;;  %v1025_v46 = vshll.u32 %v4281_v18, 30  ;;  %vm1161_vm0 = vc.u32 %v1153_v52, %v1157_v50  ;;  %v4314_v21 = vadd.s32 %v1157_v50, %v1153_v52  ;;  %v7097_v10 = vld [vmem:[#allocation11_spill] sm:$0xff]  ;;  %v7099_v50 = vld [vmem:[#allocation12_spill] sm:$0xff] }
  0xf8   :  { %7095 = vst [vmem:[#allocation10_spill] sm:$0xff] %v4309_v1  ;;  %vm1243_vm1 = vcmp.gt.s32.totalorder %v1242_v2, 0  ;;  %v4316_v26 = vpop.eup %3459  ;;  %v696_v62 = vmul.f32 %v4266_v24, %v695_v45  ;;  %v864_v44 = vadd.s32 %v3968_v49, %v3970_v40  ;;  %v880_v16 = vsub.s32 32, %v879_v42 }
  0xf9   :  { %v1244_v61 = vsel %vm1243_vm1, %v1242_v2, 0  ;;  %v1137_v5 = vshll.u32 %v4301_v31, 16  ;;  %vm1139_vm10 = vc.u32 %v1131_v33, %v1135_v34  ;;  %v1141_v29 = vadd.s32 %v1135_v34, %v1131_v33 }
  0xfa   :  { %v1156_v22 = vmul.u32 %v1152_v53, %v1128_v48  ;;  %v4325_v52 = vmul.f32 6.2831855, %v7097_v10  ;;  %v4328_v15 = vmul.f32 6.2831855, %v7099_v50  ;;  %v1162_v45 = vsel %vm1161_vm0, 1, %v7050_v25 }
  0xfb   :  { %v4322_v57 = vpop.eup %3461  ;;  %v1246_v28 = vand.u32 31, %v1244_v61  ;;  %v884_v1 = vsub.s32 4294967266, %v879_v42  ;;  %v4332_v49 = vsub.s32 %v4227_v14, %v1025_v46  ;;  %v1134_v40 = vmul.u32 %v1130_v7, %v1128_v48  ;;  %v7102_v48 = vld [vmem:[#allocation13_spill] sm:$0xff] }
  0xfc   :  { %7096 = vst [vmem:[#allocation41_spill] sm:$0xff] %v4322_v57  ;;  %v7101_v2 = vshll.u32 %v4283_v38, 16  ;;  %v4338_v53 = vmul.f32 %v4277_v23, %v707_v11  ;;  %v4342_v33 = vmul.f32 %v4304_v0, %v7087_v35  ;;  %v1140_v34 = vsel %vm1139_vm10, 1, %v7050_v25 }
  0xfd   :  { %7098 = vst [vmem:[#allocation11_spill] sm:$0xff] %v4325_v52  ;;  %v881_v50 = vshll.u32 %v4128_v9, %v879_v42  ;;  %v882_v14 = vshrl.u32 %v864_v44, %v880_v16  ;;  %vm1143_vm6 = vc.u32 %v1141_v29, %v1137_v5  ;;  %v1164_v7 = vadd.s32 %v1162_v45, %v1156_v22 }
  0xfe   :  { %7100 = vst [vmem:[#allocation12_spill] sm:$0xff] %v4328_v15  ;;  %vm1165_vm5 = vc.u32 %v4314_v21, %v7101_v2  ;;  %v4348_v46 = vmul.f32 6.2831855, %v7102_v48  ;;  %v7104_v2 = vld [vmem:[#allocation18_spill] sm:$0xff]  ;;  %v4354_v52 = vsub.s32 32, %v1246_v28  ;;  %v885_v18 = vadd.s32 127, %v884_v1 }
  0xff   :  { %v4351_v15 = vmul.f32 6.2831855, %v7104_v2  ;;  %v1166_v11 = vsel %vm1165_vm5, 1, %v7050_v25  ;;  %v1028_v10 = vsub.s32 0, %v4332_v49  ;;  %v1142_v35 = vadd.s32 %v1140_v34, %v1134_v40 }
 0x100   :  { %7103 = vst [vmem:[#allocation13_spill] sm:$0xff] %v4348_v46  ;;  %v4358_v9 = vmul.f32 0.5, %v696_v62  ;;  %vm1027_vm7 = vcmp.lt.s32.totalorder %v4332_v49, 0  ;;  %v1144_v22 = vsel %vm1143_vm6, 1, %v7050_v25  ;;  %v7107_v5 = vand.u32 2147483647, %v7074_v17 }
 0x101   :  { %7105 = vst [vmem:[#allocation18_spill] sm:$0xff] %v4351_v15  ;;  %v4364_v42 = vor.u32 %v882_v14, %v881_v50  ;;  %v1158_v44 = vshrl.u32 %v4260_v60, 16  ;;  %v1168_v29 = vadd.s32 %v1166_v11, %v1164_v7  ;;  %v1261_v45 = vshll.u32 %v7051_v51, %v1246_v28 }
 0x102   :  { %7106 = vst [vmem:[#allocation42_spill] sm:$0xff] %v4354_v52  ;;  %v1239_v16 = vand.u32 8388607, %v7107_v5  ;;  %v4368_v1 = vshrl.u32 %v1244_v61, 5  ;;  %v1258_v40 = vshll.u32 %v7067_v39, %v1246_v28  ;;  %v1259_v62 = vshrl.u32 %v7051_v51, %v4354_v52 }
 0x103   :  { %v1262_v34 = vshrl.u32 %v7052_v54, %v4354_v52  ;;  %v886_v48 = vshll.u32 %v885_v18, 23  ;;  %v1029_v2 = vsel %vm1027_vm7, %v1028_v10, %v4332_v49  ;;  %v1136_v50 = vshrl.u32 %v4275_v59, 16 }
 0x104   :  { %v1146_v14 = vadd.s32 %v1144_v22, %v1142_v35  ;;  %v1252_v60 = vshll.u32 %v7068_v47, %v1246_v28  ;;  %v1253_v61 = vshrl.u32 %v7069_v37, %v4354_v52  ;;  %v1255_v7 = vshll.u32 %v7069_v37, %v1246_v28 }
 0x105   :  { %v1256_v11 = vshrl.u32 %v7067_v39, %v4354_v52  ;;  %v1094_v5 = vshrl.u32 %v7045_v27, %v4079_v56  ;;  %v1249_v18 = vshll.u32 %v7045_v27, %v1246_v28  ;;  %v1250_v10 = vshrl.u32 %v7068_v47, %v4354_v52 }
 0x106   :  { %v1263_v59 = vor.u32 %v1262_v34, %v1261_v45  ;;  %v1160_v35 = vshrl.u32 %v4283_v38, 16  ;;  %v1169_v22 = vadd.s32 %v1168_v29, %v1158_v44  ;;  %v1260_v8 = vor.u32 %v1259_v62, %v1258_v40 }
 0x107   :  { %vm1267_vm8 = vcmp.lt.s32.totalorder %v4368_v1, 4  ;;  %v1030_v15 = vclz %v1029_v2  ;;  %v1138_v46 = vshrl.u32 %v4301_v31, 16  ;;  %v1147_v17 = vadd.s32 %v1146_v14, %v1136_v50 }
 0x108   :  { %v1240_v3 = vor.u32 8388608, %v1239_v16  ;;  %v887_v54 = vor.u32 4788187, %v886_v48  ;;  %v1115_v28 = vsel %vm1113_vm3, %v4152_v41, 2102212464  ;;  %v4394_v56 = vor.u32 %v1253_v61, %v1252_v60 }
 0x109   :  { %v4396_v52 = vor.u32 %v1256_v11, %v1255_v7  ;;  %v4398_v45 = vor.u32 %v1250_v10, %v1249_v18  ;;  %vm1264_vm2 = vcmp.lt.s32.totalorder %v4368_v1, 1  ;;  %vm1266_vm14 = vcmp.lt.s32.totalorder %v4368_v1, 3 }
 0x10a   :  { %v1277_v31 = vsel %vm1267_vm8, %v1263_v59, 1326507024  ;;  %v890_v16 = vcvt.s32.f32 %v4364_v42  ;;  %v1114_v44 = vsel %vm1110_vm12, %v1094_v5, %v4148_v58  ;;  %v1170_v41 = vadd.s32 %v1169_v22, %v1160_v35  ;;  %v7114_v59 = vld [vmem:[#allocation21_spill] sm:$0xff] }
 0x10b   :  { %v1273_v29 = vsel %vm1267_vm8, %v1260_v8, 920167782  ;;  %v3346_v40 = vadd.s32 4294967294, %v1030_v15  ;;  %v1116_v62 = vsel %vm1112_vm4, %v4150_v20, %v1115_v28  ;;  %v4413_v34 = vadd.s32 %v1147_v17, %v1138_v46  ;;  %v7109_v17 = vld [vmem:[#allocation19_spill] sm:$0xff] }
 0x10c   :  { %v7108_v48 = vshll.u32 %v4283_v38, 16  ;;  %v888_v42 = vand.u32 2147483647, %v887_v54  ;;  %vm1265_vm3 = vcmp.lt.s32.totalorder %v4368_v1, 2  ;;  %v1276_v58 = vsel %vm1264_vm2, %v4394_v56, %v4396_v52  ;;  %v7137_v1 = vld [vmem:[#allocation27_spill] sm:$0xff] }
 0x10d   :  { %v1278_v15 = vsel %vm1266_vm14, %v1260_v8, %v1277_v31  ;;  %vm689_vm12 = vcmp.eq.f32.partialorder %v7073_v32, inf  ;;  %v731_v20 = vmul.f32 %v4316_v26, %v7088_v13  ;;  %v4431_v38 = vmul.f32 6.2831855, %v7109_v17 }
 0x10e   :  { %v4418_v2 = vadd.s32 %v4314_v21, %v7108_v48  ;;  %v1272_v54 = vsel %vm1264_vm2, %v4398_v45, %v4394_v56  ;;  %v1274_v21 = vsel %vm1266_vm14, %v4396_v52, %v1273_v29  ;;  %v709_v46 = vmul.f32 0.5, %v4338_v53 }
 0x10f   :  { %7110 = vst [vmem:[#allocation19_spill] sm:$0xff] %v4431_v38  ;;  %v1117_v8 = vsel %vm1111_vm9, %v1114_v44, %v1116_v62  ;;  %v1174_v50 = vadd.s32 1, %v1170_v41  ;;  %v4443_v14 = vshll.u32 %v1240_v3, 8  ;;  %v720_v60 = vmul.f32 %v4304_v0, %v4342_v33  ;;  %v7115_v62 = vld [vmem:[#allocation14_spill] sm:$0xff] }
 0x110   :  { %vm3347_vm4 = vcmp.lt.s32.totalorder %v3346_v40, 0  ;;  %vm1173_vm11 = vc.u32 %v4413_v34, %v4418_v2  ;;  %v4451_v61 = vsel %vm1265_vm3, %v1276_v58, %v1278_v15  ;;  %v7111_v7 = vsub.f32 1.5, %v4306_v6 }
 0x111   :  { %v4457_v11 = vmul.f32 6.2831855, %v7112_v55  ;;  %v891_v3 = vmul.f32 %v890_v16, %v888_v42  ;;  %v4461_v5 = vsel %vm1265_vm3, %v1272_v54, %v1274_v21  ;;  %v698_v33 = vsub.f32 1.5, %v4358_v9 }
 0x112   :  { %v687_v53 = vmul.f32 %v4222_v63, %v7111_v7  ;;  %v732_v18 = vmul.f32 %v4316_v26, %v731_v20  ;;  %v1171_v10 = vmul.u32 %v4187_v43, %v1117_v8  ;;  %v1389_v35 = vand.u32 2139095040, %v7114_v59 }
 0x113   :  { %7113 = vst [vmem:[#allocation20_spill] sm:$0xff] %v4457_v11  ;;  %v1033_v22 = vsel %vm3347_vm4, 0, %v3346_v40  ;;  %v1175_v6 = vsel %vm1173_vm11, %v1174_v50, %v1170_v41  ;;  %v1281_v63 = vand.u32 65535, %v4443_v14  ;;  %v1284_v28 = vshrl.u32 %v4451_v61, 16 }
 0x114   :  { %v710_v31 = vsub.f32 1.5, %v709_v46  ;;  %v4469_v16 = vmul.f32 0.5, %v720_v60  ;;  %v743_v44 = vmul.f32 %v4322_v57, %v7093_v12  ;;  %v1306_v9 = vshrl.u32 %v4461_v5, 16 }
 0x115   :  { %v688_v29 = vmul.f32 %v687_v53, %v7073_v32  ;;  %v7116_v43 = vand.u32 2147483647, %v7115_v62  ;;  %vm772_vm13 = vcmp.lt.s32.totalorder %v7115_v62, 0  ;;  %v892_v41 = vxor.u32 2147483648, %v891_v3 }
 0x116   :  { %vm691_vm15 = vcmp.eq.f32.partialorder %v7073_v32, 0.0  ;;  %v699_v40 = vmul.f32 %v4266_v24, %v698_v33  ;;  %v1038_v42 = vsub.s32 4294967266, %v1033_v22  ;;  %v4484_v58 = vadd.s32 %v1175_v6, %v1171_v10 }
 0x117   :  { %vm4477_vm9 = vcmp.le.f32.partialorder %v7116_v43, 0.7853982  ;;  %v1390_v15 = vshrl.u32 %v1389_v35, 23  ;;  %v4486_v20 = vmul.f32 0.5, %v732_v18  ;;  %v1282_v17 = vshrl.u32 %v4443_v14, 16 }
 0x118   :  { %v1283_v54 = vand.u32 65535, %v4451_v61  ;;  %v4490_v21 = vmul.u32 %v1284_v28, %v1281_v63  ;;  %v711_v46 = vmul.f32 %v4277_v23, %v710_v31  ;;  %v744_v8 = vmul.f32 %v4322_v57, %v743_v44 }
 0x119   :  { %v1305_v50 = vand.u32 65535, %v4461_v5  ;;  %v4495_v60 = vmul.u32 %v1306_v9, %v1281_v63  ;;  %v690_v24 = vsel %vm689_vm12, %v7073_v32, %v688_v29  ;;  %v893_v53 = vsel %vm772_vm13, %v892_v41, %v891_v3 }
 0x11a   :  { %v1018_v61 = vadd.s32 %v4145_v19, %v4140_v36  ;;  %v1034_v55 = vsub.s32 32, %v1033_v22  ;;  %v1039_v23 = vadd.s32 127, %v1038_v42  ;;  %v1177_v33 = vadd.s32 536870912, %v4484_v58 }
 0x11b   :  { %v3354_v18 = vadd.s32 4294967169, %v1390_v15  ;;  %v4507_v5 = vmul.f32 %v699_v40, %v7081_v30  ;;  %v1285_v10 = vmul.u32 %v1283_v54, %v1281_v63  ;;  %v4509_v35 = vmul.u32 %v1283_v54, %v1282_v17 }
 0x11c   :  { %v1289_v6 = vshll.u32 %v4490_v21, 16  ;;  %v1307_v31 = vmul.u32 %v1305_v50, %v1281_v63  ;;  %v4512_v44 = vmul.u32 %v1305_v50, %v1282_v17  ;;  %v1311_v3 = vshll.u32 %v4495_v60, 16 }
 0x11d   :  { %v1396_v29 = vadd.s32 1, %v3354_v18  ;;  %v4516_v19 = vmul.f32 0.5, %v744_v8  ;;  %v4521_v43 = vsel %vm4477_vm9, %v7115_v62, %v893_v53  ;;  %v1035_v41 = vshll.u32 %v4332_v49, %v1033_v22 }
 0x11e   :  { %v1036_v40 = vshrl.u32 %v1018_v61, %v1034_v55  ;;  %v1040_v42 = vshll.u32 %v1039_v23, 23  ;;  %v4524_v15 = vshrl.u32 %v1177_v33, 30  ;;  %v1291_v63 = vshll.u32 %v4509_v35, 16 }
 0x11f   :  { %7119 = vst [vmem:[#allocation14_spill] sm:$0xff] %v4516_v19  ;;  %vm1397_vm0 = vcmp.gt.s32.totalorder %v1396_v29, 0  ;;  %vm4527_vm1 = vc.u32 %v1285_v10, %v1289_v6  ;;  %v6955_v8 = vand.u32 2147483647, %v7114_v59  ;;  %v1295_v18 = vadd.s32 %v1289_v6, %v1285_v10 }
 0x120   :  { %7120 = vst [vmem:[#allocation43_spill] sm:$0xff] %v4524_v15  ;;  %v1398_v50 = vsel %vm1397_vm0, %v1396_v29, 0  ;;  %v6956_v53 = vshll.u32 %v4512_v44, 16  ;;  %v4533_v36 = vadd.s32 %v1311_v3, %v1307_v31  ;;  %v7123_v22 = vand.u32 2147483648, %v7073_v32 }
 0x121   :  { %v1400_v49 = vand.u32 31, %v1398_v50  ;;  %v4542_v55 = vmul.f32 %v711_v46, %v7084_v4  ;;  %v4546_v23 = vmul.f32 %v4521_v43, %v4521_v43  ;;  %vm1315_vm10 = vc.u32 %v1307_v31, %v1311_v3 }
 0x122   :  { %v4539_v61 = vsel %vm691_vm15, %v7123_v22, %v690_v24  ;;  %v1037_v33 = vor.u32 %v1036_v40, %v1035_v41  ;;  %v1041_v10 = vor.u32 4788187, %v1040_v42  ;;  %v1179_v6 = vshll.u32 %v4524_v15, 30 }
 0x123   :  { %7124 = vst [vmem:[#allocation44_spill] sm:$0xff] %v4539_v61  ;;  %v4549_v29 = vsub.s32 32, %v1400_v49  ;;  %v1288_v7 = vmul.u32 %v1284_v28, %v1282_v17  ;;  %v1294_v32 = vsel %vm4527_vm1, 1, %v7050_v25  ;;  %v1310_v24 = vmul.u32 %v1306_v9, %v1282_v17 }
 0x124   :  { %v1393_v46 = vand.u32 8388607, %v6955_v8  ;;  %vm4556_vm5 = vc.u32 %v1295_v18, %v1291_v63  ;;  %v1316_v31 = vsel %vm1315_vm10, 1, %v7050_v25  ;;  %vm1319_vm6 = vc.u32 %v4533_v36, %v6956_v53 }
 0x125   :  { %v1412_v28 = vshll.u32 %v7067_v39, %v1400_v49  ;;  %v4565_v3 = vshrl.u32 %v1398_v50, 5  ;;  %v1403_v41 = vshll.u32 %v7045_v27, %v1400_v49  ;;  %v1406_v9 = vshll.u32 %v7068_v47, %v1400_v49 }
 0x126   :  { %v1413_v17 = vshrl.u32 %v7051_v51, %v4549_v29  ;;  %v1404_v40 = vshrl.u32 %v7068_v47, %v4549_v29  ;;  %v1407_v42 = vshrl.u32 %v7069_v37, %v4549_v29  ;;  %v1409_v63 = vshll.u32 %v7069_v37, %v1400_v49 }
 0x127   :  { %v1410_v54 = vshrl.u32 %v7067_v39, %v4549_v29  ;;  %v1042_v50 = vand.u32 2147483647, %v1041_v10  ;;  %v1044_v18 = vcvt.s32.f32 %v1037_v33  ;;  %v1318_v8 = vadd.s32 %v1316_v31, %v1310_v24 }
 0x128   :  { %v1415_v53 = vshll.u32 %v7051_v51, %v1400_v49  ;;  %v1296_v12 = vadd.s32 %v1294_v32, %v1288_v7  ;;  %v1320_v57 = vsel %vm1319_vm6, 1, %v7050_v25  ;;  %v1414_v61 = vor.u32 %v1413_v17, %v1412_v28 }
 0x129   :  { %v7127_v11 = vmov 1326507024   ;;  %v4583_v59 = vsub.s32 %v4484_v58, %v1179_v6  ;;  %v1298_v15 = vsel %vm4556_vm5, 1, %v7050_v25  ;;  %v1312_v10 = vshrl.u32 %v4495_v60, 16 }
 0x12a   :  { %v1416_v38 = vshrl.u32 %v7127_v11, %v4549_v29  ;;  %v1394_v33 = vor.u32 8388608, %v1393_v46  ;;  %vm701_vm7 = vcmp.eq.f32.partialorder %v7081_v30, inf  ;;  %v4590_v49 = vor.u32 %v1404_v40, %v1403_v41  ;;  %v7128_v41 = vld [vmem:[#allocation42_spill] sm:$0xff] }
 0x12b   :  { %v4592_v7 = vor.u32 %v1407_v42, %v1406_v9  ;;  %v4594_v32 = vor.u32 %v1410_v54, %v1409_v63  ;;  %vm1421_vm12 = vcmp.lt.s32.totalorder %v4565_v3, 4  ;;  %v1322_v24 = vadd.s32 %v1320_v57, %v1318_v8 }
 0x12c   :  { %v1417_v58 = vor.u32 %v1416_v38, %v1415_v53  ;;  %vm1418_vm4 = vcmp.lt.s32.totalorder %v4565_v3, 1  ;;  %vm1420_vm11 = vcmp.lt.s32.totalorder %v4565_v3, 3  ;;  %v906_v6 = vmul.f32 -0.00019511016, %v4546_v23 }
 0x12d   :  { %v1290_v60 = vshrl.u32 %v4490_v21, 16  ;;  %v1300_v46 = vadd.s32 %v1298_v15, %v1296_v12  ;;  %v1427_v22 = vsel %vm1421_vm12, %v1414_v61, 920167782  ;;  %v1045_v31 = vmul.f32 %v1044_v18, %v1042_v50 }
 0x12e   :  { %vm1181_vm15 = vcmp.lt.s32.totalorder %v4583_v59, 0  ;;  %v1182_v28 = vsub.s32 0, %v4583_v59  ;;  %v1248_v57 = vshrl.u32 %v7045_v27, %v7128_v41  ;;  %vm1419_vm0 = vcmp.lt.s32.totalorder %v4565_v3, 2 }
 0x12f   :  { %v1426_v38 = vsel %vm1418_vm4, %v4590_v49, %v4592_v7  ;;  %v1428_v12 = vsel %vm1420_vm11, %v4594_v32, %v1427_v22  ;;  %v1430_v21 = vsel %vm1418_vm4, %v4592_v7, %v4594_v32  ;;  %v1314_v15 = vshrl.u32 %v4512_v44, 16 }
 0x130   :  { %v1323_v8 = vadd.s32 %v1322_v24, %v1312_v10  ;;  %v1431_v53 = vsel %vm1421_vm12, %v1417_v58, 1326507024  ;;  %v4622_v9 = vshll.u32 %v1394_v33, 8  ;;  %v7129_v17 = vsub.f32 1.5, %v4469_v16 }
 0x131   :  { %v1292_v42 = vshrl.u32 %v4509_v35, 16  ;;  %v1301_v63 = vadd.s32 %v1300_v46, %v1290_v60  ;;  %v1432_v54 = vsel %vm1420_vm11, %v1414_v61, %v1431_v53  ;;  %vm703_vm1 = vcmp.eq.f32.partialorder %v7081_v30, 0.0  ;;  %v7130_v61 = vld [vmem:[#allocation15_spill] sm:$0xff] }
 0x132   :  { %v4627_v40 = vmul.f32 %v4304_v0, %v7129_v17  ;;  %v899_v50 = vmul.f32 -0.001358992, %v4546_v23  ;;  %v1269_v18 = vsel %vm1267_vm8, %v4396_v52, 2102212464  ;;  %v4639_v16 = vsel %vm1419_vm0, %v1426_v38, %v1428_v12 }
 0x133   :  { %v4643_v0 = vsel %vm1419_vm0, %v1430_v21, %v1432_v54  ;;  %vm713_vm10 = vcmp.eq.f32.partialorder %v7084_v4, inf  ;;  %v907_v35 = vadd.f32 0.008332121, %v906_v6  ;;  %vm926_vm5 = vcmp.lt.s32.totalorder %v7130_v61, 0 }
 0x134   :  { %v1046_v10 = vxor.u32 2147483648, %v1045_v31  ;;  %v1183_v33 = vsel %vm1181_vm15, %v1182_v28, %v4583_v59  ;;  %v1268_v52 = vsel %vm1264_vm2, %v1248_v57, %v4398_v45  ;;  %v1324_v24 = vadd.s32 %v1323_v8, %v1314_v15 }
 0x135   :  { %v1435_v58 = vand.u32 65535, %v4622_v9  ;;  %v1438_v60 = vshrl.u32 %v4643_v0, 16  ;;  %v1270_v6 = vsel %vm1266_vm14, %v4394_v56, %v1269_v18  ;;  %v4658_v46 = vadd.s32 %v1301_v63, %v1292_v42  ;;  %v7136_v42 = vld [vmem:[#allocation22_spill] sm:$0xff] }
 0x136   :  { %v7131_v22 = vshll.u32 %v4512_v44, 16  ;;  %v1460_v28 = vshrl.u32 %v4639_v16, 16  ;;  %v702_v45 = vsel %vm701_vm7, %v7081_v30, %v4507_v5  ;;  %v7132_v57 = vsub.f32 1.5, %v4486_v20 }
 0x137   :  { %v900_v56 = vadd.f32 0.041655596, %v899_v50  ;;  %v1184_v12 = vclz %v1183_v33  ;;  %v7133_v21 = vand.u32 2147483647, %v7130_v61  ;;  %v1436_v15 = vshrl.u32 %v4622_v9, 16 }
 0x138   :  { %v4663_v41 = vadd.s32 %v4533_v36, %v7131_v22  ;;  %v4673_v38 = vmul.f32 %v4316_v26, %v7132_v57  ;;  %v1047_v36 = vsel %vm926_vm5, %v1046_v10, %v1045_v31  ;;  %v1459_v5 = vand.u32 65535, %v4639_v16 }
 0x139   :  { %vm4677_vm8 = vcmp.le.f32.partialorder %v7133_v21, 0.7853982  ;;  %v1271_v20 = vsel %vm1265_vm3, %v1268_v52, %v1270_v6  ;;  %v1328_v26 = vadd.s32 1, %v1324_v24  ;;  %v1437_v8 = vand.u32 65535, %v4643_v0 }
 0x13a   :  { %v4688_v53 = vmul.u32 %v1438_v60, %v1435_v58  ;;  %vm715_vm2 = vcmp.eq.f32.partialorder %v7084_v4, 0.0  ;;  %v908_v17 = vmul.f32 %v907_v35, %v4546_v23  ;;  %vm1327_vm14 = vc.u32 %v4658_v46, %v4663_v41 }
 0x13b   :  { %v4694_v31 = vmul.u32 %v1460_v28, %v1435_v58  ;;  %v1543_v63 = vand.u32 2139095040, %v7136_v42  ;;  %v894_v50 = vsub.s32 4, %v7137_v1  ;;  %v901_v18 = vmul.f32 %v900_v56, %v4546_v23 }
 0x13c   :  { %v3349_v16 = vadd.s32 4294967294, %v1184_v12  ;;  %v4703_v0 = vsel %vm4677_vm8, %v7130_v61, %v1047_v36  ;;  %v1325_v35 = vmul.u32 %v4443_v14, %v1271_v20  ;;  %v1461_v10 = vmul.u32 %v1459_v5, %v1435_v58 }
 0x13d   :  { %v4706_v33 = vmul.u32 %v1459_v5, %v1436_v15  ;;  %v1329_v52 = vsel %vm1327_vm14, %v1328_v26, %v1324_v24  ;;  %v1439_v6 = vmul.u32 %v1437_v8, %v1435_v58  ;;  %v4708_v22 = vmul.u32 %v1437_v8, %v1436_v15 }
 0x13e   :  { %v1443_v57 = vshll.u32 %v4688_v53, 16  ;;  %v7138_v21 = vand.u32 2147483648, %v7081_v30  ;;  %v909_v12 = vadd.f32 -0.16666654, %v908_v17  ;;  %v1465_v36 = vshll.u32 %v4694_v31, 16 }
 0x13f   :  { %v1544_v54 = vshrl.u32 %v1543_v63, 23  ;;  %v714_v14 = vsel %vm713_vm10, %v7084_v4, %v4542_v55  ;;  %v895_v24 = vsel %vm772_vm13, %v894_v50, %v7137_v1  ;;  %v4727_v58 = vmul.f32 %v4703_v0, %v4703_v0  ;;  %v7140_v50 = vld [vmem:[#allocation31_spill] sm:$0xff] }
 0x140   :  { %v4715_v56 = vsel %vm703_vm1, %v7138_v21, %v702_v45  ;;  %vm3350_vm3 = vcmp.lt.s32.totalorder %v3349_v16, 0  ;;  %v4729_v30 = vadd.s32 %v1329_v52, %v1325_v35  ;;  %v6964_v45 = vshll.u32 %v4706_v33, 16 }
 0x141   :  { %7139 = vst [vmem:[#allocation42_spill] sm:$0xff] %v4715_v56  ;;  %vm1469_vm6 = vc.u32 %v1461_v10, %v1465_v36  ;;  %v4732_v5 = vadd.s32 %v1465_v36, %v1461_v10  ;;  %v902_v20 = vadd.f32 -0.4999988, %v901_v18  ;;  %v1445_v26 = vshll.u32 %v4708_v22, 16 }
 0x142   :  { %vm1447_vm7 = vc.u32 %v1439_v6, %v1443_v57  ;;  %v1449_v55 = vadd.s32 %v1443_v57, %v1439_v6  ;;  %v910_v8 = vmul.f32 %v909_v12, %v4546_v23  ;;  %v4736_v17 = vsel %vm3350_vm3, 0, %v3349_v16 }
 0x143   :  { %v1464_v63 = vmul.u32 %v1460_v28, %v1436_v15  ;;  %v3357_v1 = vadd.s32 4294967169, %v1544_v54  ;;  %v4740_v35 = vmul.f32 %v4627_v40, %v7140_v50  ;;  %v1060_v52 = vmul.f32 -0.00019511016, %v4727_v58 }
 0x144   :  { %v1442_v21 = vmul.u32 %v1438_v60, %v1436_v15  ;;  %v1470_v10 = vsel %vm1469_vm6, 1, %v7050_v25  ;;  %v1331_v18 = vadd.s32 536870912, %v4729_v30  ;;  %v1448_v36 = vsel %vm1447_vm7, 1, %v7050_v25 }
 0x145   :  { %vm1473_vm13 = vc.u32 %v4732_v5, %v6964_v45  ;;  %v1550_v16 = vadd.s32 1, %v3357_v1  ;;  %v7141_v28 = vand.u32 2147483648, %v7084_v4  ;;  %v897_v60 = vsel %vm4477_vm9, 0, %v895_v24 }
 0x146   :  { %v1192_v15 = vsub.s32 4294967266, %v4736_v17  ;;  %vm1451_vm15 = vc.u32 %v1449_v55, %v1445_v26  ;;  %v903_v54 = vmul.f32 %v902_v20, %v4546_v23  ;;  %v911_v6 = vadd.f32 1.0, %v910_v8  ;;  %v7143_v55 = vld [vmem:[#allocation38_spill] sm:$0xff] }
 0x147   :  { %v4753_v40 = vsel %vm715_vm2, %v7141_v28, %v714_v14  ;;  %v1472_v57 = vadd.s32 %v1470_v10, %v1464_v63  ;;  %vm1551_vm1 = vcmp.gt.s32.totalorder %v1550_v16, 0  ;;  %v1053_v12 = vmul.f32 -0.001358992, %v4727_v58 }
 0x148   :  { %7142 = vst [vmem:[#allocation15_spill] sm:$0xff] %v4753_v40  ;;  %v1450_v1 = vadd.s32 %v1448_v36, %v1442_v21  ;;  %v1474_v45 = vsel %vm1473_vm13, 1, %v7050_v25  ;;  %v1552_v19 = vsel %vm1551_vm1, %v1550_v16, 0  ;;  %v1061_v4 = vadd.f32 0.008332121, %v1060_v52 }
 0x149   :  { %v4761_v14 = vshrl.u32 %v1331_v18, 30  ;;  %v1452_v48 = vsel %vm1451_vm15, 1, %v7050_v25  ;;  %v1554_v24 = vand.u32 31, %v1552_v19  ;;  %v4764_v28 = vand.u32 3, %v897_v60 }
 0x14a   :  { %v1172_v23 = vadd.s32 %v4418_v2, %v4413_v34  ;;  %v1188_v20 = vsub.s32 32, %v4736_v17  ;;  %v1193_v26 = vadd.s32 127, %v1192_v15  ;;  %v1402_v63 = vshrl.u32 %v7045_v27, %v4549_v29 }
 0x14b   :  { %v1466_v52 = vshrl.u32 %v4694_v31, 16  ;;  %v1476_v21 = vadd.s32 %v1474_v45, %v1472_v57  ;;  %v4773_v10 = vadd.f32 1.0, %v903_v54  ;;  %v1444_v18 = vshrl.u32 %v4688_v53, 16 }
 0x14c   :  { %v1454_v36 = vadd.s32 %v1452_v48, %v1450_v1  ;;  %v4776_v16 = vsub.s32 32, %v1554_v24  ;;  %v4779_v34 = vmul.f32 %v911_v6, %v4521_v43  ;;  %v1054_v2 = vadd.f32 0.041655596, %v1053_v12 }
 0x14d   :  { %v1062_v60 = vmul.f32 %v1061_v4, %v4727_v58  ;;  %v1333_v15 = vshll.u32 %v4761_v14, 30  ;;  %v1189_v29 = vshll.u32 %v4583_v59, %v4736_v17  ;;  %v1190_v31 = vshrl.u32 %v1172_v23, %v1188_v20 }
 0x14e   :  { %v1194_v45 = vshll.u32 %v1193_v26, 23  ;;  %v6966_v54 = vand.u32 2147483647, %v7136_v42  ;;  %v1422_v53 = vsel %vm1418_vm4, %v1402_v63, %v4590_v49  ;;  %v1423_v43 = vsel %vm1421_vm12, %v4594_v32, 2102212464 }
 0x14f   :  { %v1468_v6 = vshrl.u32 %v4706_v33, 16  ;;  %v1477_v57 = vadd.s32 %v1476_v21, %v1466_v52  ;;  %v1446_v12 = vshrl.u32 %v4708_v22, 16  ;;  %v1455_v1 = vadd.s32 %v1454_v36, %v1444_v18 }
 0x150   :  { %v1566_v59 = vshll.u32 %v7067_v39, %v1554_v24  ;;  %v1567_v17 = vshrl.u32 %v7051_v51, %v4776_v16  ;;  %v4798_v4 = vsub.s32 %v4729_v30, %v1333_v15  ;;  %v4800_v48 = vshrl.u32 %v1552_v19, 5 }
 0x151   :  { %v1569_v49 = vshll.u32 %v7051_v51, %v1554_v24  ;;  %v1570_v32 = vshrl.u32 %v7127_v11, %v4776_v16  ;;  %vm725_vm9 = vcmp.eq.f32.partialorder %v7140_v50, inf  ;;  %v1560_v22 = vshll.u32 %v7068_v47, %v1554_v24 }
 0x152   :  { %v1561_v23 = vshrl.u32 %v7069_v37, %v4776_v16  ;;  %v1563_v20 = vshll.u32 %v7069_v37, %v1554_v24  ;;  %v1564_v30 = vshrl.u32 %v7067_v39, %v4776_v16  ;;  %v1424_v19 = vsel %vm1420_vm11, %v4592_v7, %v1423_v43 }
 0x153   :  { %v1478_v26 = vadd.s32 %v1477_v57, %v1468_v6  ;;  %v1557_v63 = vshll.u32 %v7045_v27, %v1554_v24  ;;  %v1558_v52 = vshrl.u32 %v7068_v47, %v4776_v16  ;;  %v4818_v21 = vadd.s32 %v1455_v1, %v1446_v12 }
 0x154   :  { %v7144_v18 = vshll.u32 %v4706_v33, 16  ;;  %v1547_v15 = vand.u32 8388607, %v6966_v54  ;;  %v1568_v8 = vor.u32 %v1567_v17, %v1566_v59  ;;  %v1191_v40 = vor.u32 %v1190_v31, %v1189_v29  ;;  %v7145_v59 = vld [vmem:[#allocation23_spill] sm:$0xff] }
 0x155   :  { %v1336_v7 = vsub.s32 0, %v4798_v4  ;;  %v1571_v43 = vor.u32 %v1570_v32, %v1569_v49  ;;  %vm1575_vm12 = vcmp.lt.s32.totalorder %v4800_v48, 4  ;;  %vm727_vm4 = vcmp.eq.f32.partialorder %v7140_v50, 0.0 }
 0x156   :  { %v4823_v36 = vadd.s32 %v4732_v5, %v7144_v18  ;;  %vm1335_vm11 = vcmp.lt.s32.totalorder %v4798_v4, 0  ;;  %v1425_v33 = vsel %vm1419_vm0, %v1422_v53, %v1424_v19  ;;  %v4833_v24 = vor.u32 %v1561_v23, %v1560_v22 }
 0x157   :  { %v4835_v5 = vor.u32 %v1564_v30, %v1563_v20  ;;  %v1482_v6 = vadd.s32 1, %v1478_v26  ;;  %v4837_v57 = vor.u32 %v1558_v52, %v1557_v63  ;;  %vm1572_vm10 = vcmp.lt.s32.totalorder %v4800_v48, 1 }
 0x158   :  { %vm1574_vm2 = vcmp.lt.s32.totalorder %v4800_v48, 3  ;;  %v1195_v29 = vor.u32 4788187, %v1194_v45  ;;  %vm1481_vm14 = vc.u32 %v4818_v21, %v4823_v36  ;;  %v1548_v31 = vor.u32 8388608, %v1547_v15 }
 0x159   :  { %v1581_v3 = vsel %vm1575_vm12, %v1568_v8, 920167782  ;;  %v1055_v53 = vmul.f32 %v1054_v2, %v4727_v58  ;;  %v1337_v12 = vsel %vm1335_vm11, %v1336_v7, %v4798_v4  ;;  %v1585_v1 = vsel %vm1575_vm12, %v1571_v43, 1326507024 }
 0x15a   :  { %v1697_v17 = vand.u32 2139095040, %v7145_v59  ;;  %v1479_v49 = vmul.u32 %v4622_v9, %v1425_v33  ;;  %vm1573_vm0 = vcmp.lt.s32.totalorder %v4800_v48, 2  ;;  %v1584_v45 = vsel %vm1572_vm10, %v4833_v24, %v4835_v5 }
 0x15b   :  { %v1586_v32 = vsel %vm1574_vm2, %v1568_v8, %v1585_v1  ;;  %v1063_v2 = vadd.f32 -0.16666654, %v1062_v60  ;;  %v1483_v22 = vsel %vm1481_vm14, %v1482_v6, %v1478_v26  ;;  %v1580_v23 = vsel %vm1572_vm10, %v4837_v57, %v4833_v24 }
 0x15c   :  { %v1582_v9 = vsel %vm1574_vm2, %v4835_v5, %v1581_v3  ;;  %v4867_v20 = vmul.f32 %v4673_v38, %v7088_v13  ;;  %v1196_v30 = vand.u32 2147483647, %v1195_v29  ;;  %v1198_v19 = vcvt.s32.f32 %v1191_v40 }
 0x15d   :  { %v4869_v63 = vshll.u32 %v1548_v31, 8  ;;  %v726_v8 = vsel %vm725_vm9, %v7140_v50, %v4740_v35  ;;  %v1338_v60 = vclz %v1337_v12  ;;  %v4877_v26 = vsel %vm1573_vm0, %v1584_v45, %v1586_v32 }
 0x15e   :  { %7146 = vst [vmem:[#allocation27_spill] sm:$0xff] %v4867_v20  ;;  %v1698_v52 = vshrl.u32 %v1697_v17, 23  ;;  %vm916_vm3 = vcmp.eq.s32.totalorder %v4764_v28, 0  ;;  %v7147_v38 = vsub.s32 4, %v7143_v55  ;;  %v1484_v18 = vadd.s32 %v1483_v22, %v1479_v49  ;;  %v7150_v49 = vld [vmem:[#allocation16_spill] sm:$0xff] }
 0x15f   :  { %v4887_v15 = vsel %vm1573_vm0, %v1580_v23, %v1582_v9  ;;  %v917_v35 = vxor.u32 2147483648, %v4779_v34  ;;  %v920_v7 = vxor.u32 2147483648, %v4773_v10  ;;  %v1056_v43 = vadd.f32 -0.4999988, %v1055_v53 }
 0x160   :  { %v1049_v40 = vsel %vm926_vm5, %v7147_v38, %v7143_v55  ;;  %v1064_v33 = vmul.f32 %v1063_v2, %v4727_v58  ;;  %vm919_vm6 = vcmp.eq.s32.totalorder %v4764_v28, 2  ;;  %v1199_v6 = vmul.f32 %v1198_v19, %v1196_v30 }
 0x161   :  { %v1589_v29 = vand.u32 65535, %v4869_v63  ;;  %v1592_v31 = vshrl.u32 %v4877_v26, 16  ;;  %v7148_v55 = vand.u32 2147483648, %v7140_v50  ;;  %v3352_v12 = vadd.s32 4294967294, %v1338_v60 }
 0x162   :  { %v1614_v1 = vshrl.u32 %v4887_v15, 16  ;;  %v3360_v17 = vadd.s32 4294967169, %v1698_v52  ;;  %vm915_vm5 = vcmp.lt.s32.totalorder %v4764_v28, 2  ;;  %v1051_v53 = vsel %vm4677_vm8, 0, %v1049_v40 }
 0x163   :  { %v4899_v3 = vsel %vm727_vm4, %v7148_v55, %v726_v8  ;;  %vm1080_vm7 = vcmp.lt.s32.totalorder %v7150_v49, 0  ;;  %v1485_v45 = vadd.s32 536870912, %v1484_v18  ;;  %v918_v32 = vsel %vm916_vm3, %v4773_v10, %v917_v35  ;;  %v7155_v35 = vld [vmem:[#allocation43_spill] sm:$0xff] }
 0x164   :  { %7149 = vst [vmem:[#allocation31_spill] sm:$0xff] %v4899_v3  ;;  %v921_v50 = vsel %vm919_vm6, %v920_v7, %v4779_v34  ;;  %v1057_v2 = vmul.f32 %v1056_v43, %v4727_v58  ;;  %v1065_v22 = vadd.f32 1.0, %v1064_v33  ;;  %v7151_v23 = vand.u32 2147483647, %v7150_v49 }
 0x165   :  { %v1200_v44 = vxor.u32 2147483648, %v1199_v6  ;;  %v1591_v30 = vand.u32 65535, %v4877_v26  ;;  %v4918_v19 = vmul.u32 %v1592_v31, %v1589_v29  ;;  %vm3353_vm8 = vcmp.lt.s32.totalorder %v3352_v12, 0 }
 0x166   :  { %vm4913_vm13 = vcmp.le.f32.partialorder %v7151_v23, 0.7853982  ;;  %v1613_v8 = vand.u32 65535, %v4887_v15  ;;  %v4921_v10 = vmul.u32 %v1614_v1, %v1589_v29  ;;  %v1704_v34 = vadd.s32 1, %v3360_v17 }
 0x167   :  { %v4925_v58 = vsel %vm915_vm5, %v918_v32, %v921_v50  ;;  %v4927_v60 = vand.u32 3, %v1051_v53  ;;  %v4929_v52 = vshrl.u32 %v1485_v45, 30  ;;  %v1590_v38 = vshrl.u32 %v4869_v63, 16 }
 0x168   :  { %v4932_v40 = vadd.f32 1.0, %v1057_v2  ;;  %v4935_v26 = vmul.f32 %v1065_v22, %v4703_v0  ;;  %v1202_v15 = vsub.s32 4, %v7155_v35  ;;  %v1326_v7 = vadd.s32 %v4663_v41, %v4658_v46 }
 0x169   :  { %7154 = vst [vmem:[#allocation38_spill] sm:$0xff] %v4929_v52  ;;  %v1201_v28 = vsel %vm1080_vm7, %v1200_v44, %v1199_v6  ;;  %v4942_v43 = vsel %vm3353_vm8, 0, %v3352_v12  ;;  %v1593_v33 = vmul.u32 %v1591_v30, %v1589_v29  ;;  %v1597_v55 = vshll.u32 %v4918_v19, 16 }
 0x16a   :  { %v1342_v17 = vsub.s32 32, %v4942_v43  ;;  %v1615_v53 = vmul.u32 %v1613_v8, %v1589_v29  ;;  %v1619_v45 = vshll.u32 %v4921_v10, 16  ;;  %vm1705_vm15 = vcmp.gt.s32.totalorder %v1704_v34, 0 }
 0x16b   :  { %v1487_v0 = vshll.u32 %v4929_v52, 30  ;;  %v4948_v32 = vmul.u32 %v1613_v8, %v1590_v38  ;;  %v6967_v46 = vand.u32 2147483647, %v7145_v59  ;;  %v1706_v41 = vsel %vm1705_vm15, %v1704_v34, 0 }
 0x16c   :  { %v4955_v12 = vsel %vm1080_vm7, %v1202_v15, %v7155_v35  ;;  %v4957_v50 = vmul.u32 %v1591_v30, %v1590_v38  ;;  %v1708_v29 = vand.u32 31, %v1706_v41  ;;  %v4963_v22 = vsel %vm4913_vm13, %v7150_v49, %v1201_v28 }
 0x16d   :  { %v1343_v23 = vshll.u32 %v4798_v4, %v4942_v43  ;;  %vm1601_vm1 = vc.u32 %v1593_v33, %v1597_v55  ;;  %v1344_v44 = vshrl.u32 %v1326_v7, %v1342_v17  ;;  %v1346_v8 = vsub.s32 4294967266, %v4942_v43 }
 0x16e   :  { %vm1623_vm9 = vc.u32 %v1615_v53, %v1619_v45  ;;  %v4968_v34 = vsub.s32 32, %v1708_v29  ;;  %v4970_v30 = vsub.s32 %v1484_v18, %v1487_v0  ;;  %v6969_v35 = vshll.u32 %v4948_v32, 16 }
 0x16f   :  { %v4973_v15 = vadd.s32 %v1619_v45, %v1615_v53  ;;  %v1701_v28 = vand.u32 8388607, %v6967_v46  ;;  %v1596_v54 = vmul.u32 %v1592_v31, %v1590_v38  ;;  %v1599_v2 = vshll.u32 %v4957_v50, 16 }
 0x170   :  { %v1602_v4 = vsel %vm1601_vm1, 1, %v7050_v25  ;;  %v1603_v7 = vadd.s32 %v1597_v55, %v1593_v33  ;;  %v1618_v17 = vmul.u32 %v1614_v1, %v1590_v38  ;;  %v1624_v43 = vsel %vm1623_vm9, 1, %v7050_v25 }
 0x171   :  { %v1714_v6 = vshll.u32 %v7068_v47, %v1708_v29  ;;  %v1720_v18 = vshll.u32 %v7067_v39, %v1708_v29  ;;  %v1715_v53 = vshrl.u32 %v7069_v37, %v4968_v34  ;;  %v1717_v45 = vshll.u32 %v7069_v37, %v1708_v29 }
 0x172   :  { %v1718_v31 = vshrl.u32 %v7067_v39, %v4968_v34  ;;  %v1721_v0 = vshrl.u32 %v7051_v51, %v4968_v34  ;;  %vm1627_vm4 = vc.u32 %v4973_v15, %v6969_v35  ;;  %v4992_v1 = vshrl.u32 %v1706_v41, 5 }
 0x173   :  { %v1723_v38 = vshll.u32 %v7051_v51, %v1708_v29  ;;  %v1724_v33 = vshrl.u32 %v7127_v11, %v4968_v34  ;;  %vm1073_vm11 = vcmp.eq.s32.totalorder %v4927_v60, 2  ;;  %v1347_v55 = vadd.s32 127, %v1346_v8 }
 0x174   :  { %vm1605_vm14 = vc.u32 %v1603_v7, %v1599_v2  ;;  %v1711_v46 = vshll.u32 %v7045_v27, %v1708_v29  ;;  %v1712_v20 = vshrl.u32 %v7068_v47, %v4968_v34  ;;  %vm1070_vm3 = vcmp.eq.s32.totalorder %v4927_v60, 0 }
 0x175   :  { %v1626_v13 = vadd.s32 %v1624_v43, %v1618_v17  ;;  %v1702_v35 = vor.u32 8388608, %v1701_v28  ;;  %v1722_v41 = vor.u32 %v1721_v0, %v1720_v18  ;;  %v1725_v3 = vor.u32 %v1724_v33, %v1723_v38 }
 0x176   :  { %v1604_v56 = vadd.s32 %v1602_v4, %v1596_v54  ;;  %v1628_v59 = vsel %vm1627_vm4, 1, %v7050_v25  ;;  %v5003_v42 = vor.u32 %v1715_v53, %v1714_v6  ;;  %v5005_v52 = vor.u32 %v1718_v31, %v1717_v45 }
 0x177   :  { %v1490_v2 = vsub.s32 0, %v4970_v30  ;;  %v1606_v29 = vsel %vm1605_vm14, 1, %v7050_v25  ;;  %vm1726_vm6 = vcmp.lt.s32.totalorder %v4992_v1, 1  ;;  %vm1729_vm5 = vcmp.lt.s32.totalorder %v4992_v1, 4 }
 0x178   :  { %v1348_v8 = vshll.u32 %v1347_v55, 23  ;;  %vm1489_vm7 = vcmp.lt.s32.totalorder %v4970_v30, 0  ;;  %v5012_v28 = vor.u32 %v1712_v20, %v1711_v46  ;;  %vm1728_vm8 = vcmp.lt.s32.totalorder %v4992_v1, 3 }
 0x179   :  { %vm913_vm15 = vweird.f32 %v7115_v62  ;;  %v1620_v54 = vshrl.u32 %v4921_v10, 16  ;;  %v1630_v6 = vadd.s32 %v1628_v59, %v1626_v13  ;;  %v1735_v4 = vsel %vm1729_vm5, %v1722_v41, 920167782 }
 0x17a   :  { %v1739_v7 = vsel %vm1729_vm5, %v1725_v3, 1326507024  ;;  %v1598_v17 = vshrl.u32 %v4918_v19, 16  ;;  %v1608_v43 = vadd.s32 %v1606_v29, %v1604_v56  ;;  %vm1727_vm1 = vcmp.lt.s32.totalorder %v4992_v1, 2 }
 0x17b   :  { %v1738_v20 = vsel %vm1726_vm6, %v5003_v42, %v5005_v52  ;;  %vm1069_vm9 = vcmp.lt.s32.totalorder %v4927_v60, 2  ;;  %v5030_v13 = vmul.f32 %v4963_v22, %v4963_v22  ;;  %v1491_v59 = vsel %vm1489_vm7, %v1490_v2, %v4970_v30 }
 0x17c   :  { %v1740_v3 = vsel %vm1728_vm8, %v1722_v41, %v1739_v7  ;;  %v5035_v19 = vshll.u32 %v1702_v35, 8  ;;  %v1345_v56 = vor.u32 %v1344_v44, %v1343_v23  ;;  %v1349_v10 = vor.u32 4788187, %v1348_v8 }
 0x17d   :  { %v1734_v46 = vsel %vm1726_vm6, %v5012_v28, %v5003_v42  ;;  %v1736_v18 = vsel %vm1728_vm8, %v5005_v52, %v1735_v4  ;;  %v1556_v53 = vshrl.u32 %v7045_v27, %v4776_v16  ;;  %v1622_v45 = vshrl.u32 %v4948_v32, 16 }
 0x17e   :  { %v1631_v31 = vadd.s32 %v1630_v6, %v1620_v54  ;;  %v5049_v35 = vsel %vm1727_vm1, %v1738_v20, %v1740_v3  ;;  %v1492_v23 = vclz %v1491_v59  ;;  %v1577_v44 = vsel %vm1575_vm12, %v4835_v5, 2102212464 }
 0x17f   :  { %v1600_v0 = vshrl.u32 %v4957_v50, 16  ;;  %v1609_v38 = vadd.s32 %v1608_v43, %v1598_v17  ;;  %vm1067_vm4 = vweird.f32 %v7130_v61  ;;  %v7156_v16 = vxor.u32 2147483648, %v4932_v40 }
 0x180   :  { %v1737_v55 = vsel %vm1727_vm1, %v1734_v46, %v1736_v18  ;;  %v1743_v41 = vand.u32 65535, %v5035_v19  ;;  %v1746_v2 = vshrl.u32 %v5049_v35, 16  ;;  %v7157_v5 = vxor.u32 2147483648, %v4935_v26 }
 0x181   :  { %v1075_v33 = vsel %vm1073_vm11, %v7156_v16, %v4935_v26  ;;  %v1207_v29 = vmul.f32 -0.001358992, %v5030_v13  ;;  %v1214_v8 = vmul.f32 -0.00019511016, %v5030_v13  ;;  %v1352_v54 = vcvt.s32.f32 %v1345_v56 }
 0x182   :  { %v1072_v50 = vsel %vm1070_vm3, %v4932_v40, %v7157_v5  ;;  %v1350_v6 = vand.u32 2147483647, %v1349_v10  ;;  %v1576_v4 = vsel %vm1572_vm10, %v1556_v53, %v4837_v57  ;;  %v1578_v7 = vsel %vm1574_vm2, %v4833_v24, %v1577_v44 }
 0x183   :  { %v1632_v17 = vadd.s32 %v1631_v31, %v1622_v45  ;;  %v3355_v26 = vadd.s32 4294967294, %v1492_v23  ;;  %v5078_v43 = vadd.s32 %v1609_v38, %v1600_v0  ;;  %v7158_v40 = vshll.u32 %v4948_v32, 16  ;;  %v7161_v31 = vld [vmem:[#allocation17_spill] sm:$0xff] }
 0x184   :  { %v1768_v59 = vshrl.u32 %v1737_v55, 16  ;;  %v1744_v3 = vshrl.u32 %v5035_v19, 16  ;;  %v1745_v56 = vand.u32 65535, %v5049_v35  ;;  %v5087_v10 = vmul.u32 %v1746_v2, %v1743_v41 }
 0x185   :  { %v5083_v20 = vadd.s32 %v4973_v15, %v7158_v40  ;;  %v1767_v57 = vand.u32 65535, %v1737_v55  ;;  %v5092_v24 = vsel %vm913_vm15, nan, %v4925_v58  ;;  %v1205_v32 = vsel %vm4913_vm13, 0, %v4955_v12  ;;  %v7160_v15 = vld [vmem:[#allocation24_spill] sm:$0xff] }
 0x186   :  { %7159 = vst [vmem:[#allocation16_spill] sm:$0xff] %v5092_v24  ;;  %v5097_v46 = vmul.u32 %v1768_v59, %v1743_v41  ;;  %v1851_v18 = vand.u32 2139095040, %v7160_v15  ;;  %v1208_v53 = vadd.f32 0.041655596, %v1207_v29  ;;  %v1215_v45 = vadd.f32 0.008332121, %v1214_v8 }
 0x187   :  { %vm1234_vm12 = vcmp.lt.s32.totalorder %v7161_v31, 0  ;;  %v1579_v35 = vsel %vm1573_vm0, %v1576_v4, %v1578_v7  ;;  %v1636_v23 = vadd.s32 1, %v1632_v17  ;;  %v1076_v62 = vsel %vm1069_vm9, %v1072_v50, %v1075_v33 }
 0x188   :  { %v1353_v58 = vmul.f32 %v1352_v54, %v1350_v6  ;;  %vm3356_vm10 = vcmp.lt.s32.totalorder %v3355_v26, 0  ;;  %vm1635_vm2 = vc.u32 %v5078_v43, %v5083_v20  ;;  %v1747_v9 = vmul.u32 %v1745_v56, %v1743_v41 }
 0x189   :  { %v5107_v12 = vmul.u32 %v1745_v56, %v1744_v3  ;;  %v1751_v44 = vshll.u32 %v5087_v10, 16  ;;  %v5110_v0 = vmul.u32 %v1767_v57, %v1744_v3  ;;  %v1633_v38 = vmul.u32 %v4869_v63, %v1579_v35 }
 0x18a   :  { %v1769_v48 = vmul.u32 %v1767_v57, %v1743_v41  ;;  %v1773_v16 = vshll.u32 %v5097_v46, 16  ;;  %v1852_v55 = vshrl.u32 %v1851_v18, 23  ;;  %v1209_v60 = vmul.f32 %v1208_v53, %v5030_v13 }
 0x18b   :  { %v1216_v33 = vmul.f32 %v1215_v45, %v5030_v13  ;;  %v7162_v5 = vand.u32 2147483647, %v7161_v31  ;;  %v1637_v29 = vsel %vm1635_vm2, %v1636_v23, %v1632_v17  ;;  %v5124_v8 = vsel %vm1067_vm4, nan, %v1076_v62 }
 0x18c   :  { %7165 = vst [vmem:[#allocation43_spill] sm:$0xff] %v5124_v8  ;;  %v5126_v63 = vand.u32 3, %v1205_v32  ;;  %v1354_v41 = vxor.u32 2147483648, %v1353_v58  ;;  %v5129_v54 = vsel %vm3356_vm10, 0, %v3355_v26  ;;  %v1753_v6 = vshll.u32 %v5107_v12, 16 }
 0x18d   :  { %vm5118_vm0 = vcmp.le.f32.partialorder %v7162_v5, 0.7853982  ;;  %vm1755_vm13 = vc.u32 %v1747_v9, %v1751_v44  ;;  %v1757_v4 = vadd.s32 %v1751_v44, %v1747_v9  ;;  %v6975_v7 = vshll.u32 %v5110_v0, 16 }
 0x18e   :  { %v5133_v40 = vadd.s32 %v1637_v29, %v1633_v38  ;;  %vm1777_vm11 = vc.u32 %v1769_v48, %v1773_v16  ;;  %v5135_v17 = vadd.s32 %v1773_v16, %v1769_v48  ;;  %v3363_v61 = vadd.s32 4294967169, %v1852_v55 }
 0x18f   :  { %v1210_v56 = vadd.f32 -0.4999988, %v1209_v60  ;;  %v1217_v57 = vadd.f32 -0.16666654, %v1216_v33  ;;  %v1750_v32 = vmul.u32 %v1746_v2, %v1744_v3  ;;  %v1772_v18 = vmul.u32 %v1768_v59, %v1744_v3 }
 0x190   :  { %v1480_v26 = vadd.s32 %v4823_v36, %v4818_v21  ;;  %v1756_v53 = vsel %vm1755_vm13, 1, %v7050_v25  ;;  %v1778_v45 = vsel %vm1777_vm11, 1, %v7050_v25  ;;  %v1858_v35 = vadd.s32 1, %v3363_v61 }
 0x191   :  { %v1496_v23 = vsub.s32 32, %v5129_v54  ;;  %v1500_v62 = vsub.s32 4294967266, %v5129_v54  ;;  %vm1759_vm14 = vc.u32 %v1757_v4, %v1753_v6  ;;  %vm1781_vm3 = vc.u32 %v5135_v17, %v6975_v7 }
 0x192   :  { %v1355_v2 = vsel %vm1234_vm12, %v1354_v41, %v1353_v58  ;;  %v1639_v59 = vadd.s32 536870912, %v5133_v40  ;;  %v6974_v21 = vand.u32 2147483647, %v7160_v15  ;;  %vm1859_vm7 = vcmp.gt.s32.totalorder %v1858_v35, 0 }
 0x193   :  { %v5151_v36 = vmul.f32 %v1210_v56, %v5030_v13  ;;  %v1758_v3 = vadd.s32 %v1756_v53, %v1750_v32  ;;  %v1780_v9 = vadd.s32 %v1778_v45, %v1772_v18  ;;  %v1860_v44 = vsel %vm1859_vm7, %v1858_v35, 0 }
 0x194   :  { %v1218_v38 = vmul.f32 %v1217_v57, %v5030_v13  ;;  %v1760_v48 = vsel %vm1759_vm14, 1, %v7050_v25  ;;  %v1782_v16 = vsel %vm1781_vm3, 1, %v7050_v25  ;;  %v1862_v55 = vand.u32 31, %v1860_v44 }
 0x195   :  { %v5159_v58 = vsel %vm5118_vm0, %v7161_v31, %v1355_v2  ;;  %v1497_v60 = vshll.u32 %v4970_v30, %v5129_v54  ;;  %v1498_v33 = vshrl.u32 %v1480_v26, %v1496_v23  ;;  %v1501_v5 = vadd.s32 127, %v1500_v62 }
 0x196   :  { %v5163_v29 = vshrl.u32 %v1639_v59, 30  ;;  %v1710_v13 = vshrl.u32 %v7045_v27, %v4968_v34  ;;  %v1855_v41 = vand.u32 8388607, %v6974_v21  ;;  %v5169_v6 = vsub.s32 32, %v1862_v55 }
 0x197   :  { %v1752_v4 = vshrl.u32 %v5087_v10, 16  ;;  %v1762_v61 = vadd.s32 %v1760_v48, %v1758_v3  ;;  %v1774_v56 = vshrl.u32 %v5097_v46, 16  ;;  %v1784_v57 = vadd.s32 %v1782_v16, %v1780_v9 }
 0x198   :  { %v1868_v30 = vshll.u32 %v7068_v47, %v1862_v55  ;;  %v1871_v54 = vshll.u32 %v7069_v37, %v1862_v55  ;;  %v1874_v32 = vshll.u32 %v7067_v39, %v1862_v55  ;;  %v1877_v18 = vshll.u32 %v7051_v51, %v1862_v55 }
 0x199   :  { %v1869_v34 = vshrl.u32 %v7069_v37, %v5169_v6  ;;  %v1872_v26 = vshrl.u32 %v7067_v39, %v5169_v6  ;;  %v1875_v10 = vshrl.u32 %v7051_v51, %v5169_v6  ;;  %v1878_v46 = vshrl.u32 %v7127_v11, %v5169_v6 }
 0x19a   :  { %v1641_v53 = vshll.u32 %v5163_v29, 30  ;;  %v1731_v45 = vsel %vm1729_vm5, %v5005_v52, 2102212464  ;;  %v1754_v35 = vshrl.u32 %v5107_v12, 16  ;;  %v5190_v23 = vshrl.u32 %v1860_v44, 5 }
 0x19b   :  { %v1776_v62 = vshrl.u32 %v5110_v0, 16  ;;  %v1785_v2 = vadd.s32 %v1784_v57, %v1774_v56  ;;  %v1865_v59 = vshll.u32 %v7045_v27, %v1862_v55  ;;  %v1866_v3 = vshrl.u32 %v7068_v47, %v5169_v6 }
 0x19c   :  { %v1763_v9 = vadd.s32 %v1762_v61, %v1752_v4  ;;  %v1856_v48 = vor.u32 8388608, %v1855_v41  ;;  %v1876_v16 = vor.u32 %v1875_v10, %v1874_v32  ;;  %v1879_v21 = vor.u32 %v1878_v46, %v1877_v18 }
 0x19d   :  { %v1502_v7 = vshll.u32 %v1501_v5, 23  ;;  %v1730_v52 = vsel %vm1726_vm6, %v1710_v13, %v5012_v28  ;;  %v5199_v12 = vor.u32 %v1869_v34, %v1868_v30  ;;  %v5201_v44 = vor.u32 %v1872_v26, %v1871_v54 }
 0x19e   :  { %v5204_v56 = vsub.s32 %v5133_v40, %v1641_v53  ;;  %v1732_v55 = vsel %vm1728_vm8, %v5003_v42, %v1731_v45  ;;  %vm1880_vm5 = vcmp.lt.s32.totalorder %v5190_v23, 1  ;;  %vm1883_vm15 = vcmp.lt.s32.totalorder %v5190_v23, 4 }
 0x19f   :  { %v7166_v5 = vshll.u32 %v5110_v0, 16  ;;  %v1786_v28 = vadd.s32 %v1785_v2, %v1776_v62  ;;  %v5216_v13 = vor.u32 %v1866_v3, %v1865_v59  ;;  %vm1882_vm6 = vcmp.lt.s32.totalorder %v5190_v23, 3 }
 0x1a0   :  { %v5219_v40 = vadd.s32 %v1763_v9, %v1754_v35  ;;  %v1889_v4 = vsel %vm1883_vm15, %v1876_v16, 920167782  ;;  %v1893_v42 = vsel %vm1883_vm15, %v1879_v21, 1326507024  ;;  %v5225_v61 = vshll.u32 %v1856_v48, 8 }
 0x1a1   :  { %v5214_v41 = vadd.s32 %v5135_v17, %v7166_v5  ;;  %v1219_v57 = vadd.f32 1.0, %v1218_v38  ;;  %v5229_v0 = vmul.f32 %v5159_v58, %v5159_v58  ;;  %vm1881_vm8 = vcmp.lt.s32.totalorder %v5190_v23, 2 }
 0x1a2   :  { %v1892_v17 = vsel %vm1880_vm5, %v5199_v12, %v5201_v44  ;;  %v1499_v30 = vor.u32 %v1498_v33, %v1497_v60  ;;  %v1503_v54 = vor.u32 4788187, %v1502_v7  ;;  %v1733_v32 = vsel %vm1727_vm1, %v1730_v52, %v1732_v55 }
 0x1a3   :  { %v1894_v21 = vsel %vm1882_vm6, %v1876_v16, %v1893_v42  ;;  %v1644_v38 = vsub.s32 0, %v5204_v56  ;;  %v1790_v18 = vadd.s32 1, %v1786_v28  ;;  %v1888_v34 = vsel %vm1880_vm5, %v5216_v13, %v5199_v12 }
 0x1a4   :  { %v1890_v26 = vsel %vm1882_vm6, %v5201_v44, %v1889_v4  ;;  %vm1643_vm9 = vcmp.lt.s32.totalorder %v5204_v56, 0  ;;  %vm1789_vm1 = vc.u32 %v5219_v40, %v5214_v41  ;;  %v1895_v1 = vsel %vm1881_vm8, %v1892_v17, %v1894_v21 }
 0x1a5   :  { %v1897_v7 = vand.u32 65535, %v5225_v61  ;;  %v1212_v60 = vadd.f32 1.0, %v5151_v36  ;;  %vm1224_vm4 = vcmp.eq.s32.totalorder %v5126_v63, 0  ;;  %v1356_v33 = vsub.s32 4, %v4761_v14 }
 0x1a6   :  { %v1898_v10 = vshrl.u32 %v5225_v61, 16  ;;  %v1787_v46 = vmul.u32 %v5035_v19, %v1733_v32  ;;  %v1891_v53 = vsel %vm1881_vm8, %v1888_v34, %v1890_v26  ;;  %v1899_v45 = vand.u32 65535, %v1895_v1  ;;  %v7167_v32 = vld [vmem:[#allocation21_spill] sm:$0xff] }
 0x1a7   :  { %v1900_v35 = vshrl.u32 %v1895_v1, 16  ;;  %v1220_v62 = vmul.f32 %v1219_v57, %v4963_v22  ;;  %vm1223_vm10 = vcmp.lt.s32.totalorder %v5126_v63, 2  ;;  %v1361_v2 = vmul.f32 -0.001358992, %v5229_v0 }
 0x1a8   :  { %v1645_v36 = vsel %vm1643_vm9, %v1644_v38, %v5204_v56  ;;  %v1791_v59 = vsel %vm1789_vm1, %v1790_v18, %v1786_v28  ;;  %v1368_v3 = vmul.f32 -0.00019511016, %v5229_v0  ;;  %v1504_v9 = vand.u32 2147483647, %v1503_v54  ;;  %v7168_v38 = vld [vmem:[#allocation25_spill] sm:$0xff] }
 0x1a9   :  { %v1506_v48 = vcvt.s32.f32 %v1499_v30  ;;  %v5266_v16 = vmul.u32 %v1900_v35, %v1897_v7  ;;  %vm1227_vm2 = vcmp.eq.s32.totalorder %v5126_v63, 2  ;;  %v1901_v19 = vmul.u32 %v1899_v45, %v1897_v7 }
 0x1aa   :  { %v5269_v52 = vmul.u32 %v1899_v45, %v1898_v10  ;;  %v1922_v55 = vshrl.u32 %v1891_v53, 16  ;;  %v1228_v22 = vxor.u32 2147483648, %v1212_v60  ;;  %v1646_v5 = vclz %v1645_v36 }
 0x1ab   :  { %v5271_v4 = vadd.s32 %v1791_v59, %v1787_v46  ;;  %v1905_v42 = vshll.u32 %v5266_v16, 16  ;;  %v1225_v57 = vxor.u32 2147483648, %v1220_v62  ;;  %v1357_v28 = vsel %vm1234_vm12, %v1356_v33, %v4761_v14 }
 0x1ac   :  { %v1362_v17 = vadd.f32 0.041655596, %v1361_v2  ;;  %v1921_v30 = vand.u32 65535, %v1891_v53  ;;  %v1369_v54 = vadd.f32 0.008332121, %v1368_v3  ;;  %vm1388_vm13 = vcmp.lt.s32.totalorder %v7167_v32, 0 }
 0x1ad   :  { %v1507_v21 = vmul.f32 %v1506_v48, %v1504_v9  ;;  %v2005_v18 = vand.u32 2139095040, %v7168_v38  ;;  %vm1221_vm11 = vweird.f32 %v7150_v49  ;;  %v7169_v34 = vand.u32 2147483647, %v7167_v32 }
 0x1ae   :  { %v1907_v1 = vshll.u32 %v5269_v52, 16  ;;  %vm1909_vm3 = vc.u32 %v1901_v19, %v1905_v42  ;;  %v1911_v14 = vadd.s32 %v1905_v42, %v1901_v19  ;;  %v1924_v33 = vmul.u32 %v1922_v55, %v1897_v7 }
 0x1af   :  { %vm5282_vm14 = vcmp.le.f32.partialorder %v7169_v34, 0.7853982  ;;  %v1229_v46 = vsel %vm1227_vm2, %v1228_v22, %v1220_v62  ;;  %v1359_v53 = vsel %vm5118_vm0, 0, %v1357_v28  ;;  %v3358_v45 = vadd.s32 4294967294, %v1646_v5 }
 0x1b0   :  { %v1793_v2 = vadd.s32 536870912, %v5271_v4  ;;  %v1226_v36 = vsel %vm1224_vm4, %v1212_v60, %v1225_v57  ;;  %v1363_v59 = vmul.f32 %v1362_v17, %v5229_v0  ;;  %v1904_v3 = vmul.u32 %v1900_v35, %v1898_v10 }
 0x1b1   :  { %v1923_v9 = vmul.u32 %v1921_v30, %v1897_v7  ;;  %v1370_v48 = vmul.f32 %v1369_v54, %v5229_v0  ;;  %v1508_v19 = vxor.u32 2147483648, %v1507_v21  ;;  %v1910_v42 = vsel %vm1909_vm3, 1, %v7050_v25 }
 0x1b2   :  { %v2006_v34 = vshrl.u32 %v2005_v18, 23  ;;  %vm1913_vm12 = vc.u32 %v1911_v14, %v1907_v1  ;;  %v1925_v62 = vmul.u32 %v1921_v30, %v1898_v10  ;;  %v1926_v50 = vmul.u32 %v1922_v55, %v1898_v10 }
 0x1b3   :  { %v1927_v22 = vshll.u32 %v1924_v33, 16  ;;  %v1230_v5 = vsel %vm1223_vm10, %v1226_v36, %v1229_v46  ;;  %v5299_v28 = vand.u32 3, %v1359_v53  ;;  %vm3359_vm0 = vcmp.lt.s32.totalorder %v3358_v45, 0 }
 0x1b4   :  { %v5301_v60 = vshrl.u32 %v1793_v2, 30  ;;  %v1912_v35 = vadd.s32 %v1910_v42, %v1904_v3  ;;  %v1929_v7 = vshll.u32 %v1925_v62, 16  ;;  %v1364_v17 = vadd.f32 -0.4999988, %v1363_v59 }
 0x1b5   :  { %vm1931_vm7 = vc.u32 %v1923_v9, %v1927_v22  ;;  %v1933_v57 = vadd.s32 %v1927_v22, %v1923_v9  ;;  %v1371_v54 = vadd.f32 -0.16666654, %v1370_v48  ;;  %v1914_v18 = vsel %vm1913_vm12, 1, %v7050_v25 }
 0x1b6   :  { %v1932_v30 = vsel %vm1931_vm7, 1, %v7050_v25  ;;  %v1509_v10 = vsel %vm1388_vm13, %v1508_v19, %v1507_v21  ;;  %v3366_v55 = vadd.s32 4294967169, %v2006_v34  ;;  %v5307_v1 = vsel %vm3359_vm0, 0, %v3358_v45 }
 0x1b7   :  { %v1934_v63 = vadd.s32 %v1932_v30, %v1926_v50  ;;  %vm1935_vm9 = vc.u32 %v1933_v57, %v1929_v7  ;;  %v1795_v14 = vshll.u32 %v5301_v60, 30  ;;  %v1928_v46 = vshrl.u32 %v1924_v33, 16 }
 0x1b8   :  { %v1936_v53 = vsel %vm1935_vm9, 1, %v7050_v25  ;;  %v1906_v2 = vshrl.u32 %v5266_v16, 16  ;;  %v1916_v36 = vadd.s32 %v1914_v18, %v1912_v35  ;;  %v2012_v3 = vadd.s32 1, %v3366_v55 }
 0x1b9   :  { %v1938_v59 = vadd.s32 %v1936_v53, %v1934_v63  ;;  %v5314_v9 = vsel %vm1221_vm11, nan, %v1230_v5  ;;  %v1365_v21 = vmul.f32 %v1364_v17, %v5229_v0  ;;  %v1372_v48 = vmul.f32 %v1371_v54, %v5229_v0 }
 0x1ba   :  { %7172 = vst [vmem:[#allocation17_spill] sm:$0xff] %v5314_v9  ;;  %v5321_v45 = vsel %vm5282_vm14, %v7167_v32, %v1509_v10  ;;  %v1654_v33 = vsub.s32 4294967266, %v5307_v1  ;;  %v1864_v16 = vshrl.u32 %v7045_v27, %v5169_v6  ;;  %v6976_v19 = vand.u32 2147483647, %v7168_v38 }
 0x1bb   :  { %vm2013_vm1 = vcmp.gt.s32.totalorder %v2012_v3, 0  ;;  %v5328_v49 = vsub.s32 %v5271_v4, %v1795_v14  ;;  %v1930_v42 = vshrl.u32 %v1925_v62, 16  ;;  %v1939_v34 = vadd.s32 %v1938_v59, %v1928_v46 }
 0x1bc   :  { %v2014_v50 = vsel %vm2013_vm1, %v2012_v3, 0  ;;  %v1885_v0 = vsel %vm1883_vm15, %v5201_v44, 2102212464  ;;  %v1908_v22 = vshrl.u32 %v5269_v52, 16  ;;  %v1917_v5 = vadd.s32 %v1916_v36, %v1906_v2 }
 0x1bd   :  { %v2016_v35 = vand.u32 31, %v2014_v50  ;;  %v1373_v17 = vadd.f32 1.0, %v1372_v48  ;;  %v5336_v6 = vmul.f32 %v5321_v45, %v5321_v45  ;;  %v1634_v4 = vadd.s32 %v5083_v20, %v5078_v43 }
 0x1be   :  { %v1650_v62 = vsub.s32 32, %v5307_v1  ;;  %v1651_v54 = vshll.u32 %v5204_v56, %v5307_v1  ;;  %v1655_v18 = vadd.s32 127, %v1654_v33  ;;  %v1884_v44 = vsel %vm1880_vm5, %v1864_v16, %v5216_v13 }
 0x1bf   :  { %v5346_v52 = vsub.s32 32, %v2016_v35  ;;  %vm1797_vm15 = vcmp.lt.s32.totalorder %v5328_v49, 0  ;;  %v1798_v30 = vsub.s32 0, %v5328_v49  ;;  %v1886_v43 = vsel %vm1882_vm6, %v5199_v12, %v1885_v0 }
 0x1c0   :  { %v1940_v20 = vadd.s32 %v1939_v34, %v1930_v42  ;;  %v5353_v10 = vadd.s32 %v1917_v5, %v1908_v22  ;;  %v5355_v63 = vadd.s32 %v1933_v57, %v1929_v7  ;;  %v2009_v56 = vand.u32 8388607, %v6976_v19 }
 0x1c1   :  { %v2028_v13 = vshll.u32 %v7067_v39, %v2016_v35  ;;  %v2019_v55 = vshll.u32 %v7045_v27, %v2016_v35  ;;  %v2020_v1 = vshrl.u32 %v7068_v47, %v5346_v52  ;;  %v2022_v14 = vshll.u32 %v7068_v47, %v2016_v35 }
 0x1c2   :  { %v2023_v12 = vshrl.u32 %v7069_v37, %v5346_v52  ;;  %v5366_v46 = vshrl.u32 %v2014_v50, 5  ;;  %v2025_v7 = vshll.u32 %v7069_v37, %v2016_v35  ;;  %v2026_v57 = vshrl.u32 %v7067_v39, %v5346_v52 }
 0x1c3   :  { %v2029_v53 = vshrl.u32 %v7051_v51, %v5346_v52  ;;  %v1652_v2 = vshrl.u32 %v1634_v4, %v1650_v62  ;;  %v1656_v36 = vshll.u32 %v1655_v18, 23  ;;  %v1887_v59 = vsel %vm1881_vm8, %v1884_v44, %v1886_v43 }
 0x1c4   :  { %v1944_v3 = vadd.s32 1, %v1940_v20  ;;  %vm1943_vm5 = vc.u32 %v5353_v10, %v5355_v63  ;;  %v2031_v33 = vshll.u32 %v7051_v51, %v2016_v35  ;;  %v2032_v16 = vshrl.u32 %v7127_v11, %v5346_v52 }
 0x1c5   :  { %v2030_v48 = vor.u32 %v2029_v53, %v2028_v13  ;;  %v1799_v42 = vsel %vm1797_vm15, %v1798_v30, %v5328_v49  ;;  %v2010_v34 = vor.u32 8388608, %v2009_v56  ;;  %v5383_v50 = vor.u32 %v2020_v1, %v2019_v55  ;;  %v7173_v13 = vld [vmem:[#allocation38_spill] sm:$0xff] }
 0x1c6   :  { %v5385_v0 = vor.u32 %v2023_v12, %v2022_v14  ;;  %vm1378_vm6 = vcmp.eq.s32.totalorder %v5299_v28, 0  ;;  %v1941_v23 = vmul.u32 %v5225_v61, %v1887_v59  ;;  %v5389_v22 = vor.u32 %v2026_v57, %v2025_v7  ;;  %v7174_v57 = vld [vmem:[#allocation10_spill] sm:$0xff] }
 0x1c7   :  { %vm2034_vm8 = vcmp.lt.s32.totalorder %v5366_v46, 1  ;;  %vm2037_vm4 = vcmp.lt.s32.totalorder %v5366_v46, 4  ;;  %v1366_v5 = vadd.f32 1.0, %v1365_v21  ;;  %vm1381_vm10 = vcmp.eq.s32.totalorder %v5299_v28, 2 }
 0x1c8   :  { %v1945_v35 = vsel %vm1943_vm5, %v1944_v3, %v1940_v20  ;;  %vm2036_vm2 = vcmp.lt.s32.totalorder %v5366_v46, 3  ;;  %v1374_v4 = vmul.f32 %v1373_v17, %v5159_v58  ;;  %v1522_v62 = vmul.f32 -0.00019511016, %v5336_v6 }
 0x1c9   :  { %v2033_v18 = vor.u32 %v2032_v16, %v2031_v33  ;;  %v2043_v61 = vsel %vm2037_vm4, %v2030_v48, 920167782  ;;  %vm1377_vm11 = vcmp.lt.s32.totalorder %v5299_v28, 2  ;;  %v1800_v44 = vclz %v1799_v42 }
 0x1ca   :  { %vm2035_vm3 = vcmp.lt.s32.totalorder %v5366_v46, 2  ;;  %v2042_v21 = vsel %vm2034_vm8, %v5383_v50, %v5385_v0  ;;  %v5405_v30 = vshll.u32 %v2010_v34, 8  ;;  %v1653_v43 = vor.u32 %v1652_v2, %v1651_v54 }
 0x1cb   :  { %v1657_v58 = vor.u32 4788187, %v1656_v36  ;;  %v5407_v17 = vadd.s32 %v1945_v35, %v1941_v23  ;;  %v2044_v20 = vsel %vm2036_vm2, %v5389_v22, %v2043_v61  ;;  %v1382_v56 = vxor.u32 2147483648, %v1366_v5 }
 0x1cc   :  { %v1510_v55 = vsub.s32 4, %v7173_v13  ;;  %v1515_v1 = vmul.f32 -0.001358992, %v5336_v6  ;;  %v2046_v14 = vsel %vm2034_vm8, %v5385_v0, %v5389_v22  ;;  %vm1375_vm12 = vweird.f32 %v7161_v31 }
 0x1cd   :  { %v1379_v54 = vxor.u32 2147483648, %v1374_v4  ;;  %v2045_v12 = vsel %vm2035_vm3, %v2042_v21, %v2044_v20  ;;  %v2047_v7 = vsel %vm2037_vm4, %v2033_v18, 1326507024  ;;  %v2159_v53 = vand.u32 2139095040, %v7174_v57 }
 0x1ce   :  { %v1523_v2 = vadd.f32 0.008332121, %v1522_v62  ;;  %v3361_v36 = vadd.s32 4294967294, %v1800_v44  ;;  %v2048_v59 = vsel %vm2036_vm2, %v2030_v48, %v2047_v7  ;;  %v2051_v3 = vand.u32 65535, %v5405_v30 }
 0x1cf   :  { %v1658_v33 = vand.u32 2147483647, %v1657_v58  ;;  %v1660_v16 = vcvt.s32.f32 %v1653_v43  ;;  %v1947_v42 = vadd.s32 536870912, %v5407_v17  ;;  %v2049_v34 = vsel %vm2035_vm3, %v2046_v14, %v2048_v59 }
 0x1d0   :  { %v1511_v23 = vsel %vm1388_vm13, %v1510_v55, %v7173_v13  ;;  %v1516_v35 = vadd.f32 0.041655596, %v1515_v1  ;;  %v2054_v18 = vshrl.u32 %v2049_v34, 16  ;;  %v2076_v62 = vshrl.u32 %v2045_v12, 16  ;;  %v7175_v13 = vld [vmem:[#allocation22_spill] sm:$0xff] }
 0x1d1   :  { %v1383_v61 = vsel %vm1381_vm10, %v1382_v56, %v1374_v4  ;;  %v2052_v48 = vshrl.u32 %v5405_v30, 16  ;;  %v2053_v44 = vand.u32 65535, %v2049_v34  ;;  %v2160_v21 = vshrl.u32 %v2159_v53, 23 }
 0x1d2   :  { %v1380_v43 = vsel %vm1378_vm6, %v1366_v5, %v1379_v54  ;;  %vm3362_vm0 = vcmp.lt.s32.totalorder %v3361_v36, 0  ;;  %v5438_v58 = vmul.u32 %v2054_v18, %v2051_v3  ;;  %v2075_v20 = vand.u32 65535, %v2045_v12 }
 0x1d3   :  { %v1524_v14 = vmul.f32 %v1523_v2, %v5336_v6  ;;  %vm1542_vm13 = vcmp.lt.s32.totalorder %v7175_v13, 0  ;;  %v1661_v55 = vmul.f32 %v1660_v16, %v1658_v33  ;;  %v5442_v1 = vshrl.u32 %v1947_v42, 30 }
 0x1d4   :  { %v1513_v4 = vsel %vm5282_vm14, 0, %v1511_v23  ;;  %v1517_v56 = vmul.f32 %v1516_v35, %v5336_v6  ;;  %v7176_v7 = vand.u32 2147483647, %v7175_v13  ;;  %v5453_v54 = vmul.u32 %v2076_v62, %v2051_v3 }
 0x1d5   :  { %v1384_v12 = vsel %vm1377_vm11, %v1380_v43, %v1383_v61  ;;  %v1803_v53 = vsel %vm3362_vm0, 0, %v3361_v36  ;;  %v5457_v2 = vmul.u32 %v2053_v44, %v2052_v48  ;;  %v3369_v59 = vadd.s32 4294967169, %v2160_v21 }
 0x1d6   :  { %vm5449_vm7 = vcmp.le.f32.partialorder %v7176_v7, 0.7853982  ;;  %v2055_v33 = vmul.u32 %v2053_v44, %v2051_v3  ;;  %v2059_v26 = vshll.u32 %v5438_v58, 16  ;;  %v2077_v16 = vmul.u32 %v2075_v20, %v2051_v3 }
 0x1d7   :  { %v5460_v42 = vmul.u32 %v2075_v20, %v2052_v48  ;;  %v1525_v34 = vadd.f32 -0.16666654, %v1524_v14  ;;  %v5462_v23 = vand.u32 3, %v1513_v4  ;;  %v1662_v35 = vxor.u32 2147483648, %v1661_v55 }
 0x1d8   :  { %v1949_v7 = vshll.u32 %v5442_v1, 30  ;;  %v5467_v28 = vsel %vm1375_vm12, nan, %v1384_v12  ;;  %v1518_v36 = vadd.f32 -0.4999988, %v1517_v56  ;;  %v1788_v61 = vadd.s32 %v5214_v41, %v5219_v40 }
 0x1d9   :  { %7179 = vst [vmem:[#allocation21_spill] sm:$0xff] %v5467_v28  ;;  %v2081_v44 = vshll.u32 %v5453_v54, 16  ;;  %v1804_v21 = vsub.s32 32, %v1803_v53  ;;  %v1808_v3 = vsub.s32 4294967266, %v1803_v53  ;;  %v2061_v43 = vshll.u32 %v5457_v2, 16 }
 0x1da   :  { %v2166_v20 = vadd.s32 1, %v3369_v59  ;;  %vm2063_vm14 = vc.u32 %v2055_v33, %v2059_v26  ;;  %v2065_v14 = vadd.s32 %v2059_v26, %v2055_v33  ;;  %v1526_v31 = vmul.f32 %v1525_v34, %v5336_v6 }
 0x1db   :  { %vm2085_vm9 = vc.u32 %v2077_v16, %v2081_v44  ;;  %v1663_v56 = vsel %vm1542_vm13, %v1662_v35, %v1661_v55  ;;  %v5478_v12 = vsub.s32 %v5407_v17, %v1949_v7  ;;  %v6977_v41 = vand.u32 2147483647, %v7174_v57 }
 0x1dc   :  { %v1805_v40 = vshll.u32 %v5328_v49, %v1803_v53  ;;  %v2058_v19 = vmul.u32 %v2054_v18, %v2052_v48  ;;  %v2080_v24 = vmul.u32 %v2076_v62, %v2052_v48  ;;  %v5482_v59 = vadd.s32 %v2081_v44, %v2077_v16 }
 0x1dd   :  { %v1806_v33 = vshrl.u32 %v1788_v61, %v1804_v21  ;;  %v2064_v26 = vsel %vm2063_vm14, 1, %v7050_v25  ;;  %v2086_v4 = vsel %vm2085_vm9, 1, %v7050_v25  ;;  %vm2167_vm1 = vcmp.gt.s32.totalorder %v2166_v20, 0 }
 0x1de   :  { %v1809_v34 = vadd.s32 127, %v1808_v3  ;;  %vm2067_vm15 = vc.u32 %v2065_v14, %v2061_v43  ;;  %v7180_v55 = vshll.u32 %v5460_v42, 16  ;;  %v2168_v17 = vsel %vm2167_vm1, %v2166_v20, 0 }
 0x1df   :  { %v5492_v49 = vsel %vm5449_vm7, %v7175_v13, %v1663_v56  ;;  %v1952_v18 = vsub.s32 0, %v5478_v12  ;;  %v2163_v62 = vand.u32 8388607, %v6977_v41  ;;  %v2170_v48 = vand.u32 31, %v2168_v17 }
 0x1e0   :  { %vm2089_vm5 = vc.u32 %v5482_v59, %v7180_v55  ;;  %v1519_v53 = vmul.f32 %v1518_v36, %v5336_v6  ;;  %vm1951_vm6 = vcmp.lt.s32.totalorder %v5478_v12, 0  ;;  %v2066_v16 = vadd.s32 %v2064_v26, %v2058_v19 }
 0x1e1   :  { %v2088_v35 = vadd.s32 %v2086_v4, %v2080_v24  ;;  %v2068_v61 = vsel %vm2067_vm15, 1, %v7050_v25  ;;  %v2090_v44 = vsel %vm2089_vm5, 1, %v7050_v25  ;;  %v5502_v21 = vsub.s32 32, %v2170_v48 }
 0x1e2   :  { %v1527_v3 = vadd.f32 1.0, %v1526_v31  ;;  %v5506_v43 = vmul.f32 %v5492_v49, %v5492_v49  ;;  %v5508_v20 = vor.u32 %v1806_v33, %v1805_v40  ;;  %v1810_v6 = vshll.u32 %v1809_v34, 23 }
 0x1e3   :  { %v1953_v36 = vsel %vm1951_vm6, %v1952_v18, %v5478_v12  ;;  %v2060_v24 = vshrl.u32 %v5438_v58, 16  ;;  %v2082_v19 = vshrl.u32 %v5453_v54, 16  ;;  %v2164_v14 = vor.u32 8388608, %v2163_v62 }
 0x1e4   :  { %v2070_v4 = vadd.s32 %v2068_v61, %v2066_v16  ;;  %v2092_v56 = vadd.s32 %v2090_v44, %v2088_v35  ;;  %v2176_v26 = vshll.u32 %v7068_v47, %v2170_v48  ;;  %v2182_v31 = vshll.u32 %v7067_v39, %v2170_v48 }
 0x1e5   :  { %v2177_v55 = vshrl.u32 %v7069_v37, %v5502_v21  ;;  %v2179_v40 = vshll.u32 %v7069_v37, %v2170_v48  ;;  %v2180_v33 = vshrl.u32 %v7067_v39, %v5502_v21  ;;  %v2183_v58 = vshrl.u32 %v7051_v51, %v5502_v21 }
 0x1e6   :  { %v2018_v54 = vshrl.u32 %v7045_v27, %v5346_v52  ;;  %v5524_v34 = vshrl.u32 %v2168_v17, 5  ;;  %v2185_v18 = vshll.u32 %v7051_v51, %v2170_v48  ;;  %v2186_v62 = vshrl.u32 %v7127_v11, %v5502_v21 }
 0x1e7   :  { %v1954_v16 = vclz %v1953_v36  ;;  %v2039_v35 = vsel %vm2037_vm4, %v5389_v22, 2102212464  ;;  %v2173_v61 = vshll.u32 %v7045_v27, %v2170_v48  ;;  %v2174_v44 = vshrl.u32 %v7068_v47, %v5502_v21 }
 0x1e8   :  { %v2084_v41 = vshrl.u32 %v5460_v42, 16  ;;  %v2093_v52 = vadd.s32 %v2092_v56, %v2082_v19  ;;  %v2184_v17 = vor.u32 %v2183_v58, %v2182_v31  ;;  %v2187_v7 = vor.u32 %v2186_v62, %v2185_v18 }
 0x1e9   :  { %v2062_v28 = vshrl.u32 %v5457_v2, 16  ;;  %v2071_v9 = vadd.s32 %v2070_v4, %v2060_v24  ;;  %v5537_v8 = vor.u32 %v2177_v55, %v2176_v26  ;;  %v5539_v36 = vor.u32 %v2180_v33, %v2179_v40 }
 0x1ea   :  { %v1811_v57 = vor.u32 4788187, %v1810_v6  ;;  %v2038_v22 = vsel %vm2034_vm8, %v2018_v54, %v5383_v50  ;;  %vm2188_vm4 = vcmp.lt.s32.totalorder %v5524_v34, 1  ;;  %vm2191_vm10 = vcmp.lt.s32.totalorder %v5524_v34, 4  ;;  %v7183_v54 = vld [vmem:[#allocation23_spill] sm:$0xff] }
 0x1eb   :  { %v3364_v48 = vadd.s32 4294967294, %v1954_v16  ;;  %v2040_v19 = vsel %vm2036_vm2, %v5385_v0, %v2039_v35  ;;  %v5549_v2 = vor.u32 %v2174_v44, %v2173_v61  ;;  %vm2190_vm11 = vcmp.lt.s32.totalorder %v5524_v34, 3 }
 0x1ec   :  { %v2094_v24 = vadd.s32 %v2093_v52, %v2084_v41  ;;  %v2197_v6 = vsel %vm2191_vm10, %v2184_v17, 920167782  ;;  %v2201_v50 = vsel %vm2191_vm10, %v2187_v7, 1326507024  ;;  %v5556_v4 = vshll.u32 %v2164_v14, 8 }
 0x1ed   :  { %vm1532_vm8 = vcmp.eq.s32.totalorder %v5462_v23, 0  ;;  %vm1535_vm12 = vcmp.eq.s32.totalorder %v5462_v23, 2  ;;  %v5560_v56 = vadd.s32 %v2071_v9, %v2062_v28  ;;  %v7181_v0 = vshll.u32 %v5460_v42, 16 }
 0x1ee   :  { %vm2189_vm2 = vcmp.lt.s32.totalorder %v5524_v34, 2  ;;  %v2200_v41 = vsel %vm2188_vm4, %v5537_v8, %v5539_v36  ;;  %v1520_v7 = vadd.f32 1.0, %v1519_v53  ;;  %v1528_v14 = vmul.f32 %v1527_v3, %v5321_v45 }
 0x1ef   :  { %v5565_v26 = vadd.s32 %v5482_v59, %v7181_v0  ;;  %v1669_v31 = vmul.f32 -0.001358992, %v5506_v43  ;;  %v2202_v9 = vsel %vm2190_vm11, %v2184_v17, %v2201_v50  ;;  %v1676_v42 = vmul.f32 -0.00019511016, %v5506_v43 }
 0x1f0   :  { %v2041_v28 = vsel %vm2035_vm3, %v2038_v22, %v2040_v19  ;;  %v2196_v59 = vsel %vm2188_vm4, %v5549_v2, %v5537_v8  ;;  %v2198_v53 = vsel %vm2190_vm11, %v5539_v36, %v2197_v6  ;;  %vm3365_vm0 = vcmp.lt.s32.totalorder %v3364_v48, 0 }
 0x1f1   :  { %v2098_v45 = vadd.s32 1, %v2094_v24  ;;  %v2203_v3 = vsel %vm2189_vm2, %v2200_v41, %v2202_v9  ;;  %v2205_v55 = vand.u32 65535, %v5556_v4  ;;  %vm1531_vm14 = vcmp.lt.s32.totalorder %v5462_v23, 2 }
 0x1f2   :  { %v7182_v46 = vsub.s32 4, %v5163_v29  ;;  %v1812_v33 = vand.u32 2147483647, %v1811_v57  ;;  %v1814_v58 = vcvt.s32.f32 %v5508_v20  ;;  %vm2097_vm3 = vc.u32 %v5560_v56, %v5565_v26 }
 0x1f3   :  { %vm1696_vm9 = vcmp.lt.s32.totalorder %v7183_v54, 0  ;;  %v2199_v18 = vsel %vm2189_vm2, %v2196_v59, %v2198_v53  ;;  %v2206_v62 = vshrl.u32 %v5556_v4, 16  ;;  %v2207_v16 = vand.u32 65535, %v2203_v3 }
 0x1f4   :  { %v5595_v40 = vsel %vm1542_vm13, %v7182_v46, %v5163_v29  ;;  %v2208_v35 = vshrl.u32 %v2203_v3, 16  ;;  %v1533_v61 = vxor.u32 2147483648, %v1528_v14  ;;  %v1536_v44 = vxor.u32 2147483648, %v1520_v7 }
 0x1f5   :  { %v1957_v29 = vsel %vm3365_vm0, 0, %v3364_v48  ;;  %v2095_v57 = vmul.u32 %v5405_v30, %v2041_v28  ;;  %v1670_v52 = vadd.f32 0.041655596, %v1669_v31  ;;  %v1677_v20 = vadd.f32 0.008332121, %v1676_v42  ;;  %v7187_v42 = vld [vmem:[#allocation11_spill] sm:$0xff] }
 0x1f6   :  { %v2099_v17 = vsel %vm2097_vm3, %v2098_v45, %v2094_v24  ;;  %v5606_v22 = vmul.u32 %v2208_v35, %v2205_v55  ;;  %v7184_v19 = vand.u32 2147483647, %v7183_v54  ;;  %v1815_v50 = vmul.f32 %v1814_v58, %v1812_v33 }
 0x1f7   :  { %v2229_v0 = vand.u32 65535, %v2199_v18  ;;  %v2230_v41 = vshrl.u32 %v2199_v18, 16  ;;  %v1962_v9 = vsub.s32 4294967266, %v1957_v29  ;;  %v2209_v59 = vmul.u32 %v2207_v16, %v2205_v55 }
 0x1f8   :  { %vm5610_vm13 = vcmp.le.f32.partialorder %v7184_v19, 0.7853982  ;;  %v5614_v53 = vmul.u32 %v2207_v16, %v2206_v62  ;;  %v2213_v30 = vshll.u32 %v5606_v22, 16  ;;  %v1667_v48 = vsel %vm5449_vm7, 0, %v5595_v40 }
 0x1f9   :  { %v5620_v24 = vadd.s32 %v2099_v17, %v2095_v57  ;;  %v5622_v31 = vmul.u32 %v2230_v41, %v2205_v55  ;;  %v2313_v28 = vand.u32 2139095040, %v7187_v42  ;;  %v1534_v45 = vsel %vm1532_vm8, %v1520_v7, %v1533_v61 }
 0x1fa   :  { %v1537_v3 = vsel %vm1535_vm12, %v1536_v44, %v1528_v14  ;;  %v1671_v46 = vmul.f32 %v1670_v52, %v5506_v43  ;;  %v1678_v33 = vmul.f32 %v1677_v20, %v5506_v43  ;;  %v1816_v58 = vxor.u32 2147483648, %v1815_v50 }
 0x1fb   :  { %v1942_v5 = vadd.s32 %v5355_v63, %v5353_v10  ;;  %v1958_v40 = vsub.s32 32, %v1957_v29  ;;  %v5633_v18 = vmul.u32 %v2229_v0, %v2206_v62  ;;  %v1963_v16 = vadd.s32 127, %v1962_v9 }
 0x1fc   :  { %v2215_v57 = vshll.u32 %v5614_v53, 16  ;;  %vm2217_vm7 = vc.u32 %v2209_v59, %v2213_v30  ;;  %v2219_v17 = vadd.s32 %v2213_v30, %v2209_v59  ;;  %v2101_v7 = vadd.s32 536870912, %v5620_v24 }
 0x1fd   :  { %v2231_v61 = vmul.u32 %v2229_v0, %v2205_v55  ;;  %v2235_v14 = vshll.u32 %v5622_v31, 16  ;;  %v2314_v44 = vshrl.u32 %v2313_v28, 23  ;;  %v5640_v52 = vsel %vm1531_vm14, %v1534_v45, %v1537_v3 }
 0x1fe   :  { %v1672_v20 = vadd.f32 -0.4999988, %v1671_v46  ;;  %v1679_v10 = vadd.f32 -0.16666654, %v1678_v33  ;;  %v2212_v63 = vmul.u32 %v2208_v35, %v2206_v62  ;;  %v1817_v19 = vsel %vm1696_vm9, %v1816_v58, %v1815_v50 }
 0x1ff   :  { %v2218_v9 = vsel %vm2217_vm7, 1, %v7050_v25  ;;  %v2234_v38 = vmul.u32 %v2230_v41, %v2206_v62  ;;  %v2237_v59 = vshll.u32 %v5633_v18, 16  ;;  %v1959_v55 = vshll.u32 %v5478_v12, %v1957_v29 }
 0x200   :  { %v1960_v0 = vshrl.u32 %v1942_v5, %v1958_v40  ;;  %v1964_v30 = vshll.u32 %v1963_v16, 23  ;;  %vm2221_vm1 = vc.u32 %v2219_v17, %v2215_v57  ;;  %v5647_v28 = vshrl.u32 %v2101_v7, 30 }
 0x201   :  { %vm2239_vm15 = vc.u32 %v2231_v61, %v2235_v14  ;;  %v2241_v23 = vadd.s32 %v2235_v14, %v2231_v61  ;;  %v3372_v45 = vadd.s32 4294967169, %v2314_v44  ;;  %v1680_v35 = vmul.f32 %v1679_v10, %v5506_v43 }
 0x202   :  { %v5653_v50 = vsel %vm5610_vm13, %v7183_v54, %v1817_v19  ;;  %v2220_v62 = vadd.s32 %v2218_v9, %v2212_v63  ;;  %v2240_v41 = vsel %vm2239_vm15, 1, %v7050_v25  ;;  %v2222_v12 = vsel %vm2221_vm1, 1, %v7050_v25 }
 0x203   :  { %v2242_v29 = vadd.s32 %v2240_v41, %v2234_v38  ;;  %vm2243_vm5 = vc.u32 %v2241_v23, %v2237_v59  ;;  %v2320_v3 = vadd.s32 1, %v3372_v45  ;;  %v1961_v46 = vor.u32 %v1960_v0, %v1959_v55 }
 0x204   :  { %v1965_v33 = vor.u32 4788187, %v1964_v30  ;;  %v2172_v58 = vshrl.u32 %v7045_v27, %v5502_v21  ;;  %v2244_v5 = vsel %vm2243_vm5, 1, %v7050_v25  ;;  %v2103_v40 = vshll.u32 %v5647_v28, 30 }
 0x205   :  { %v2214_v16 = vshrl.u32 %v5606_v22, 16  ;;  %v6980_v57 = vand.u32 2147483647, %v7187_v42  ;;  %vm2321_vm6 = vcmp.gt.s32.totalorder %v2320_v3, 0  ;;  %v2224_v17 = vadd.s32 %v2222_v12, %v2220_v62 }
 0x206   :  { %v2236_v7 = vshrl.u32 %v5622_v31, 16  ;;  %v2246_v38 = vadd.s32 %v2244_v5, %v2242_v29  ;;  %v2322_v61 = vsel %vm2321_vm6, %v2320_v3, 0  ;;  %v1673_v14 = vmul.f32 %v1672_v20, %v5506_v43 }
 0x207   :  { %v1681_v44 = vadd.f32 1.0, %v1680_v35  ;;  %v5665_v10 = vand.u32 3, %v1667_v48  ;;  %v2324_v21 = vand.u32 31, %v2322_v61  ;;  %v5669_v63 = vmul.f32 %v5653_v50, %v5653_v50 }
 0x208   :  { %v1966_v19 = vand.u32 2147483647, %v1965_v33  ;;  %v1968_v22 = vcvt.s32.f32 %v1961_v46  ;;  %v2192_v9 = vsel %vm2188_vm4, %v2172_v58, %v5549_v2  ;;  %v5675_v31 = vsub.s32 %v5620_v24, %v2103_v40 }
 0x209   :  { %v2193_v43 = vsel %vm2191_vm10, %v5539_v36, 2102212464  ;;  %v2317_v48 = vand.u32 8388607, %v6980_v57  ;;  %v5682_v20 = vsub.s32 32, %v2324_v21  ;;  %v2216_v55 = vshrl.u32 %v5614_v53, 16 }
 0x20a   :  { %v2225_v0 = vadd.s32 %v2224_v17, %v2214_v16  ;;  %v2238_v30 = vshrl.u32 %v5633_v18, 16  ;;  %v2247_v45 = vadd.s32 %v2246_v38, %v2236_v7  ;;  %v2330_v2 = vshll.u32 %v7068_v47, %v2324_v21 }
 0x20b   :  { %v2333_v24 = vshll.u32 %v7069_v37, %v2324_v21  ;;  %v2336_v35 = vshll.u32 %v7067_v39, %v2324_v21  ;;  %v2339_v62 = vshll.u32 %v7051_v51, %v2324_v21  ;;  %v2331_v36 = vshrl.u32 %v7069_v37, %v5682_v20 }
 0x20c   :  { %v2334_v41 = vshrl.u32 %v7067_v39, %v5682_v20  ;;  %v2337_v53 = vshrl.u32 %v7051_v51, %v5682_v20  ;;  %v2340_v18 = vshrl.u32 %v7127_v11, %v5682_v20  ;;  %vm2105_vm4 = vcmp.lt.s32.totalorder %v5675_v31, 0 }
 0x20d   :  { %v2106_v12 = vsub.s32 0, %v5675_v31  ;;  %v2194_v29 = vsel %vm2190_vm11, %v5537_v8, %v2193_v43  ;;  %v5703_v3 = vshrl.u32 %v2322_v61, 5  ;;  %v2248_v46 = vadd.s32 %v2247_v45, %v2238_v30 }
 0x20e   :  { %v2318_v33 = vor.u32 8388608, %v2317_v48  ;;  %v2327_v58 = vshll.u32 %v7045_v27, %v2324_v21  ;;  %v2328_v5 = vshrl.u32 %v7068_v47, %v5682_v20  ;;  %v5708_v40 = vadd.s32 %v2225_v0, %v2216_v55 }
 0x20f   :  { %v5710_v16 = vadd.s32 %v2241_v23, %v2237_v59  ;;  %v2338_v17 = vor.u32 %v2337_v53, %v2336_v35  ;;  %v2341_v7 = vor.u32 %v2340_v18, %v2339_v62  ;;  %v1823_v38 = vmul.f32 -0.001358992, %v5669_v63 }
 0x210   :  { %v1830_v57 = vmul.f32 -0.00019511016, %v5669_v63  ;;  %v5714_v8 = vor.u32 %v2331_v36, %v2330_v2  ;;  %v5716_v61 = vor.u32 %v2334_v41, %v2333_v24  ;;  %v1969_v43 = vmul.f32 %v1968_v22, %v1966_v19 }
 0x211   :  { %v2107_v21 = vsel %vm2105_vm4, %v2106_v12, %v5675_v31  ;;  %vm2342_vm10 = vcmp.lt.s32.totalorder %v5703_v3, 1  ;;  %vm2345_vm11 = vcmp.lt.s32.totalorder %v5703_v3, 4  ;;  %v2195_v59 = vsel %vm2189_vm2, %v2192_v9, %v2194_v29 }
 0x212   :  { %v2252_v23 = vadd.s32 1, %v2248_v46  ;;  %v5725_v48 = vor.u32 %v2328_v5, %v2327_v58  ;;  %vm2344_vm8 = vcmp.lt.s32.totalorder %v5703_v3, 3  ;;  %vm1686_vm12 = vcmp.eq.s32.totalorder %v5665_v10, 0 }
 0x213   :  { %vm2251_vm0 = vc.u32 %v5708_v40, %v5710_v16  ;;  %v2351_v19 = vsel %vm2345_vm11, %v2338_v17, 920167782  ;;  %v2355_v22 = vsel %vm2345_vm11, %v2341_v7, 1326507024  ;;  %v5735_v55 = vshll.u32 %v2318_v33, 8 }
 0x214   :  { %vm1529_vm2 = vweird.f32 %v7167_v32  ;;  %v1674_v34 = vadd.f32 1.0, %v1673_v14  ;;  %v2108_v9 = vclz %v2107_v21  ;;  %vm2343_vm14 = vcmp.lt.s32.totalorder %v5703_v3, 2 }
 0x215   :  { %v2354_v0 = vsel %vm2342_vm10, %v5714_v8, %v5716_v61  ;;  %v1682_v30 = vmul.f32 %v1681_v44, %v5492_v49  ;;  %v1818_v45 = vsub.s32 4, %v5301_v60  ;;  %v2249_v2 = vmul.u32 %v5556_v4, %v2195_v59 }
 0x216   :  { %v2356_v24 = vsel %vm2344_vm8, %v2338_v17, %v2355_v22  ;;  %vm1685_vm3 = vcmp.lt.s32.totalorder %v5665_v10, 2  ;;  %v1824_v14 = vadd.f32 0.041655596, %v1823_v38  ;;  %v2253_v35 = vsel %vm2251_vm0, %v2252_v23, %v2248_v46 }
 0x217   :  { %v2350_v62 = vsel %vm2342_vm10, %v5725_v48, %v5714_v8  ;;  %v2352_v49 = vsel %vm2344_vm8, %v5716_v61, %v2351_v19  ;;  %v1831_v44 = vadd.f32 0.008332121, %v1830_v57  ;;  %v1970_v36 = vxor.u32 2147483648, %v1969_v43 }
 0x218   :  { %v2357_v4 = vsel %vm2343_vm14, %v2354_v0, %v2356_v24  ;;  %v2359_v41 = vand.u32 65535, %v5735_v55  ;;  %v1690_v53 = vxor.u32 2147483648, %v1674_v34  ;;  %vm1850_vm7 = vcmp.lt.s32.totalorder %v7160_v15, 0 }
 0x219   :  { %v3367_v18 = vadd.s32 4294967294, %v2108_v9  ;;  %v2360_v12 = vshrl.u32 %v5735_v55, 16  ;;  %v5761_v29 = vadd.s32 %v2253_v35, %v2249_v2  ;;  %v2353_v46 = vsel %vm2343_vm14, %v2350_v62, %v2352_v49  ;;  %v7192_v49 = vld [vmem:[#allocation12_spill] sm:$0xff] }
 0x21a   :  { %v2361_v33 = vand.u32 65535, %v2357_v4  ;;  %v2362_v58 = vshrl.u32 %v2357_v4, 16  ;;  %v1687_v57 = vxor.u32 2147483648, %v1682_v30  ;;  %vm1689_vm1 = vcmp.eq.s32.totalorder %v5665_v10, 2 }
 0x21b   :  { %v1819_v5 = vsel %vm1696_vm9, %v1818_v45, %v5301_v60  ;;  %v1825_v17 = vmul.f32 %v1824_v14, %v5669_v63  ;;  %v1832_v7 = vmul.f32 %v1831_v44, %v5669_v63  ;;  %v7188_v38 = vand.u32 2147483647, %v7160_v15 }
 0x21c   :  { %v1971_v59 = vsel %vm1850_vm7, %v1970_v36, %v1969_v43  ;;  %v5779_v23 = vmul.u32 %v2362_v58, %v2359_v41  ;;  %vm3368_vm5 = vcmp.lt.s32.totalorder %v3367_v18, 0  ;;  %v2363_v19 = vmul.u32 %v2361_v33, %v2359_v41 }
 0x21d   :  { %vm5773_vm15 = vcmp.le.f32.partialorder %v7188_v38, 0.7853982  ;;  %v5781_v22 = vmul.u32 %v2361_v33, %v2360_v12  ;;  %v2384_v60 = vshrl.u32 %v2353_v46, 16  ;;  %v1691_v9 = vsel %vm1689_vm1, %v1690_v53, %v1682_v30 }
 0x21e   :  { %v1821_v0 = vsel %vm5610_vm13, 0, %v1819_v5  ;;  %v2255_v45 = vadd.s32 536870912, %v5761_v29  ;;  %v2367_v2 = vshll.u32 %v5779_v23, 16  ;;  %v1688_v24 = vsel %vm1686_vm12, %v1674_v34, %v1687_v57 }
 0x21f   :  { %v1826_v14 = vadd.f32 -0.4999988, %v1825_v17  ;;  %v5792_v43 = vsel %vm5773_vm15, %v7160_v15, %v1971_v59  ;;  %v2383_v35 = vand.u32 65535, %v2353_v46  ;;  %v5797_v30 = vsel %vm1529_vm2, nan, %v5640_v52 }
 0x220   :  { %7191 = vst [vmem:[#allocation38_spill] sm:$0xff] %v5797_v30  ;;  %v1833_v6 = vadd.f32 -0.16666654, %v1832_v7  ;;  %v5799_v62 = vsel %vm3368_vm5, 0, %v3367_v18  ;;  %v2467_v44 = vand.u32 2139095040, %v7192_v49  ;;  %v2369_v36 = vshll.u32 %v5781_v22, 16 }
 0x221   :  { %vm2371_vm9 = vc.u32 %v2363_v19, %v2367_v2  ;;  %v2373_v34 = vadd.s32 %v2367_v2, %v2363_v19  ;;  %v2386_v4 = vmul.u32 %v2384_v60, %v2359_v41  ;;  %v1692_v53 = vsel %vm1685_vm3, %v1688_v24, %v1691_v9 }
 0x222   :  { %v5805_v33 = vand.u32 3, %v1821_v0  ;;  %v5809_v32 = vmul.f32 %v5792_v43, %v5792_v43  ;;  %v5811_v52 = vshrl.u32 %v2255_v45, 30  ;;  %v1827_v18 = vmul.f32 %v1826_v14, %v5669_v63 }
 0x223   :  { %v1972_v46 = vsub.s32 4, %v5442_v1  ;;  %v2366_v57 = vmul.u32 %v2362_v58, %v2360_v12  ;;  %v2385_v5 = vmul.u32 %v2383_v35, %v2359_v41  ;;  %v1834_v17 = vmul.f32 %v1833_v6, %v5669_v63 }
 0x224   :  { %v2116_v7 = vsub.s32 4294967266, %v5799_v62  ;;  %v2372_v10 = vsel %vm2371_vm9, 1, %v7050_v25  ;;  %v2468_v38 = vshrl.u32 %v2467_v44, 23  ;;  %vm1683_vm13 = vweird.f32 %v7175_v13 }
 0x225   :  { %vm2375_vm6 = vc.u32 %v2373_v34, %v2369_v36  ;;  %v2387_v59 = vmul.u32 %v2383_v35, %v2360_v12  ;;  %v2388_v19 = vmul.u32 %v2384_v60, %v2360_v12  ;;  %v2389_v9 = vshll.u32 %v2386_v4, 16 }
 0x226   :  { %v1977_v0 = vmul.f32 -0.001358992, %v5809_v32  ;;  %v1984_v45 = vmul.f32 -0.00019511016, %v5809_v32  ;;  %v2096_v41 = vadd.s32 %v5565_v26, %v5560_v56  ;;  %v2257_v63 = vshll.u32 %v5811_v52, 30 }
 0x227   :  { %v2374_v58 = vadd.s32 %v2372_v10, %v2366_v57  ;;  %v2391_v2 = vshll.u32 %v2387_v59, 16  ;;  %vm2393_vm4 = vc.u32 %v2385_v5, %v2389_v9  ;;  %v2395_v24 = vadd.s32 %v2389_v9, %v2385_v5 }
 0x228   :  { %v2112_v14 = vsub.s32 32, %v5799_v62  ;;  %v2117_v6 = vadd.s32 127, %v2116_v7  ;;  %v2376_v35 = vsel %vm2375_vm6, 1, %v7050_v25  ;;  %v2394_v12 = vsel %vm2393_vm4, 1, %v7050_v25 }
 0x229   :  { %v2326_v60 = vshrl.u32 %v7045_v27, %v5682_v20  ;;  %v2396_v44 = vadd.s32 %v2394_v12, %v2388_v19  ;;  %vm2397_vm12 = vc.u32 %v2395_v24, %v2391_v2  ;;  %v3375_v36 = vadd.s32 4294967169, %v2468_v38 }
 0x22a   :  { %v5830_v56 = vsub.s32 %v5761_v29, %v2257_v63  ;;  %v2347_v26 = vsel %vm2345_vm11, %v5716_v61, 2102212464  ;;  %v2390_v34 = vshrl.u32 %v2386_v4, 16  ;;  %v2398_v57 = vsel %vm2397_vm12, 1, %v7050_v25 }
 0x22b   :  { %v2368_v5 = vshrl.u32 %v5779_v23, 16  ;;  %v2378_v7 = vadd.s32 %v2376_v35, %v2374_v58  ;;  %v2400_v10 = vadd.s32 %v2398_v57, %v2396_v44  ;;  %v2474_v9 = vadd.s32 1, %v3375_v36 }
 0x22c   :  { %v1985_v30 = vadd.f32 0.008332121, %v1984_v45  ;;  %v2113_v20 = vshll.u32 %v5675_v31, %v5799_v62  ;;  %v2114_v38 = vshrl.u32 %v2096_v41, %v2112_v14  ;;  %v2118_v19 = vshll.u32 %v2117_v6, 23 }
 0x22d   :  { %v2346_v29 = vsel %vm2342_vm10, %v2326_v60, %v5725_v48  ;;  %v2348_v61 = vsel %vm2344_vm8, %v5714_v8, %v2347_v26  ;;  %v6981_v4 = vand.u32 2147483647, %v7192_v49  ;;  %vm2475_vm11 = vcmp.gt.s32.totalorder %v2474_v9, 0 }
 0x22e   :  { %v2260_v23 = vsub.s32 0, %v5830_v56  ;;  %v2392_v63 = vshrl.u32 %v2387_v59, 16  ;;  %v2401_v45 = vadd.s32 %v2400_v10, %v2390_v34  ;;  %v2476_v58 = vsel %vm2475_vm11, %v2474_v9, 0 }
 0x22f   :  { %vm2259_vm0 = vcmp.lt.s32.totalorder %v5830_v56, 0  ;;  %v2370_v31 = vshrl.u32 %v5781_v22, 16  ;;  %v2379_v62 = vadd.s32 %v2378_v7, %v2368_v5  ;;  %v2478_v41 = vand.u32 31, %v2476_v58 }
 0x230   :  { %v5851_v48 = vsel %vm1683_vm13, nan, %v1692_v53  ;;  %v5853_v14 = vadd.f32 1.0, %v1827_v18  ;;  %v1835_v8 = vadd.f32 1.0, %v1834_v17  ;;  %v5858_v6 = vsel %vm1850_vm7, %v1972_v46, %v5442_v1 }
 0x231   :  { %7193 = vst [vmem:[#allocation22_spill] sm:$0xff] %v5851_v48  ;;  %v1978_v59 = vadd.f32 0.041655596, %v1977_v0  ;;  %v1986_v35 = vmul.f32 %v1985_v30, %v5809_v32  ;;  %v2115_v12 = vor.u32 %v2114_v38, %v2113_v20  ;;  %v5861_v60 = vsub.s32 32, %v2478_v41 }
 0x232   :  { %v2119_v22 = vor.u32 4788187, %v2118_v19  ;;  %v2261_v44 = vsel %vm2259_vm0, %v2260_v23, %v5830_v56  ;;  %v2349_v13 = vsel %vm2343_vm14, %v2346_v29, %v2348_v61  ;;  %v2402_v53 = vadd.s32 %v2401_v45, %v2392_v63  ;;  %v7194_v19 = vld [vmem:[#allocation25_spill] sm:$0xff] }
 0x233   :  { %v5866_v18 = vadd.s32 %v2379_v62, %v2370_v31  ;;  %v5868_v17 = vadd.s32 %v2395_v24, %v2391_v2  ;;  %v2471_v1 = vand.u32 8388607, %v6981_v4  ;;  %v2481_v46 = vshll.u32 %v7045_v27, %v2478_v41 }
 0x234   :  { %v2482_v30 = vshrl.u32 %v7068_v47, %v5861_v60  ;;  %v2484_v0 = vshll.u32 %v7068_v47, %v2478_v41  ;;  %v2485_v36 = vshrl.u32 %v7069_v37, %v5861_v60  ;;  %v2490_v3 = vshll.u32 %v7067_v39, %v2478_v41 }
 0x235   :  { %v2262_v26 = vclz %v2261_v44  ;;  %v5879_v34 = vshrl.u32 %v2476_v58, 5  ;;  %v2487_v2 = vshll.u32 %v7069_v37, %v2478_v41  ;;  %v2488_v24 = vshrl.u32 %v7067_v39, %v5861_v60 }
 0x236   :  { %v2120_v57 = vand.u32 2147483647, %v2119_v22  ;;  %v2122_v5 = vcvt.s32.f32 %v2115_v12  ;;  %v2406_v7 = vadd.s32 1, %v2402_v53  ;;  %v2491_v10 = vshrl.u32 %v7051_v51, %v5861_v60 }
 0x237   :  { %vm1843_vm10 = vcmp.eq.s32.totalorder %v5805_v33, 2  ;;  %v2403_v9 = vmul.u32 %v5735_v55, %v2349_v13  ;;  %vm2405_vm8 = vc.u32 %v5866_v18, %v5868_v17  ;;  %v2493_v20 = vshll.u32 %v7051_v51, %v2478_v41 }
 0x238   :  { %v2494_v38 = vshrl.u32 %v7127_v11, %v5861_v60  ;;  %vm2004_vm2 = vcmp.lt.s32.totalorder %v7194_v19, 0  ;;  %v2472_v29 = vor.u32 8388608, %v2471_v1  ;;  %v5894_v61 = vor.u32 %v2482_v30, %v2481_v46 }
 0x239   :  { %v5896_v23 = vor.u32 %v2485_v36, %v2484_v0  ;;  %v2492_v63 = vor.u32 %v2491_v10, %v2490_v3  ;;  %vm1840_vm14 = vcmp.eq.s32.totalorder %v5805_v33, 0  ;;  %v3370_v45 = vadd.s32 4294967294, %v2262_v26  ;;  %v7198_v26 = vld [vmem:[#allocation13_spill] sm:$0xff] }
 0x23a   :  { %v5899_v55 = vor.u32 %v2488_v24, %v2487_v2  ;;  %vm2496_vm3 = vcmp.lt.s32.totalorder %v5879_v34, 1  ;;  %vm2499_vm7 = vcmp.lt.s32.totalorder %v5879_v34, 4  ;;  %v1836_v58 = vmul.f32 %v1835_v8, %v5653_v50 }
 0x23b   :  { %v1979_v31 = vmul.f32 %v1978_v59, %v5809_v32  ;;  %v2407_v62 = vsel %vm2405_vm8, %v2406_v7, %v2402_v53  ;;  %vm2498_vm1 = vcmp.lt.s32.totalorder %v5879_v34, 3  ;;  %v7195_v41 = vand.u32 2147483647, %v7194_v19 }
 0x23c   :  { %v2123_v22 = vmul.f32 %v2122_v5, %v2120_v57  ;;  %v2495_v44 = vor.u32 %v2494_v38, %v2493_v20  ;;  %v2505_v13 = vsel %vm2499_vm7, %v2492_v63, 920167782  ;;  %v1987_v1 = vadd.f32 -0.16666654, %v1986_v35 }
 0x23d   :  { %vm5908_vm5 = vcmp.le.f32.partialorder %v7195_v41, 0.7853982  ;;  %vm2497_vm9 = vcmp.lt.s32.totalorder %v5879_v34, 2  ;;  %v2504_v50 = vsel %vm2496_vm3, %v5894_v61, %v5896_v23  ;;  %v5919_v8 = vshll.u32 %v2472_v29, 8 }
 0x23e   :  { %v1975_v59 = vsel %vm5773_vm15, 0, %v5858_v6  ;;  %vm3371_vm13 = vcmp.lt.s32.totalorder %v3370_v45, 0  ;;  %v5924_v53 = vadd.s32 %v2407_v62, %v2403_v9  ;;  %v2506_v35 = vsel %vm2498_vm1, %v5899_v55, %v2505_v13 }
 0x23f   :  { %v1841_v46 = vxor.u32 2147483648, %v1836_v58  ;;  %v1844_v30 = vxor.u32 2147483648, %v5853_v14  ;;  %v1980_v0 = vadd.f32 -0.4999988, %v1979_v31  ;;  %v2508_v36 = vsel %vm2496_vm3, %v5896_v23, %v5899_v55 }
 0x240   :  { %v2124_v3 = vxor.u32 2147483648, %v2123_v22  ;;  %v2507_v21 = vsel %vm2497_vm9, %v2504_v50, %v2506_v35  ;;  %v2509_v6 = vsel %vm2499_vm7, %v2495_v44, 1326507024  ;;  %v2621_v2 = vand.u32 2139095040, %v7198_v26 }
 0x241   :  { %v1988_v24 = vmul.f32 %v1987_v1, %v5809_v32  ;;  %v2265_v57 = vsel %vm3371_vm13, 0, %v3370_v45  ;;  %v2510_v5 = vsel %vm2498_vm1, %v2492_v63, %v2509_v6  ;;  %v2513_v7 = vand.u32 65535, %v5919_v8 }
 0x242   :  { %v2126_v10 = vsub.s32 4, %v5647_v28  ;;  %v2409_v9 = vadd.s32 536870912, %v5924_v53  ;;  %v2511_v20 = vsel %vm2497_vm9, %v2508_v36, %v2510_v5  ;;  %v2514_v38 = vshrl.u32 %v5919_v8, 16 }
 0x243   :  { %v5950_v29 = vsel %vm1843_vm10, %v1844_v30, %v1836_v58  ;;  %v2515_v31 = vand.u32 65535, %v2511_v20  ;;  %v2516_v45 = vshrl.u32 %v2511_v20, 16  ;;  %v2538_v62 = vshrl.u32 %v2507_v21, 16 }
 0x244   :  { %v5952_v41 = vand.u32 3, %v1975_v59  ;;  %v2125_v63 = vsel %vm2004_vm2, %v2124_v3, %v2123_v22  ;;  %v2270_v44 = vsub.s32 4294967266, %v2265_v57  ;;  %v2622_v13 = vshrl.u32 %v2621_v2, 23 }
 0x245   :  { %v5959_v1 = vsel %vm1840_vm14, %v5853_v14, %v1841_v46  ;;  %v1981_v50 = vmul.f32 %v1980_v0, %v5809_v32  ;;  %v5962_v35 = vmul.u32 %v2516_v45, %v2513_v7  ;;  %v2537_v58 = vand.u32 65535, %v2507_v21 }
 0x246   :  { %v1989_v30 = vadd.f32 1.0, %v1988_v24  ;;  %v5967_v59 = vsel %vm2004_vm2, %v2126_v10, %v5647_v28  ;;  %v5969_v36 = vshrl.u32 %v2409_v9, 30  ;;  %v5971_v22 = vmul.u32 %v2515_v31, %v2514_v38 }
 0x247   :  { %v5976_v14 = vsel %vm5908_vm5, %v7194_v19, %v2125_v63  ;;  %v2517_v46 = vmul.u32 %v2515_v31, %v2513_v7  ;;  %v2521_v32 = vshll.u32 %v5962_v35, 16  ;;  %v5979_v0 = vmul.u32 %v2538_v62, %v2513_v7 }
 0x248   :  { %7199 = vst [vmem:[#allocation45_spill] sm:$0xff] %v5969_v36  ;;  %vm1997_vm15 = vcmp.eq.s32.totalorder %v5952_v41, 2  ;;  %v2250_v28 = vadd.s32 %v5710_v16, %v5708_v40  ;;  %v2266_v3 = vsub.s32 32, %v2265_v57  ;;  %v2271_v21 = vadd.s32 127, %v2270_v44 }
 0x249   :  { %v3378_v6 = vadd.s32 4294967169, %v2622_v13  ;;  %v5984_v2 = vadd.f32 1.0, %v1981_v50  ;;  %v2539_v5 = vmul.u32 %v2537_v58, %v2513_v7  ;;  %v5989_v10 = vmul.u32 %v2537_v58, %v2514_v38 }
 0x24a   :  { %v5992_v9 = vmul.f32 %v1989_v30, %v5792_v43  ;;  %v5996_v20 = vmul.f32 %v5976_v14, %v5976_v14  ;;  %v2411_v40 = vshll.u32 %v5969_v36, 30  ;;  %v2523_v16 = vshll.u32 %v5971_v22, 16 }
 0x24b   :  { %vm2525_vm6 = vc.u32 %v2517_v46, %v2521_v32  ;;  %v2527_v31 = vadd.s32 %v2521_v32, %v2517_v46  ;;  %v2542_v63 = vmul.u32 %v2538_v62, %v2514_v38  ;;  %v2543_v44 = vshll.u32 %v5979_v0, 16 }
 0x24c   :  { %v2267_v7 = vshll.u32 %v5830_v56, %v2265_v57  ;;  %v2268_v13 = vshrl.u32 %v2250_v28, %v2266_v3  ;;  %v2272_v50 = vshll.u32 %v2271_v21, 23  ;;  %v2628_v58 = vadd.s32 1, %v3378_v6 }
 0x24d   :  { %v1998_v43 = vxor.u32 2147483648, %v5984_v2  ;;  %v2520_v30 = vmul.u32 %v2516_v45, %v2514_v38  ;;  %v6983_v4 = vshll.u32 %v5989_v10, 16  ;;  %vm2547_vm4 = vc.u32 %v2539_v5, %v2543_v44 }
 0x24e   :  { %v6006_v48 = vsub.s32 %v5924_v53, %v2411_v40  ;;  %v2526_v62 = vsel %vm2525_vm6, 1, %v7050_v25  ;;  %v2548_v46 = vsel %vm2547_vm4, 1, %v7050_v25  ;;  %v2131_v56 = vmul.f32 -0.001358992, %v5996_v20 }
 0x24f   :  { %vm2529_vm12 = vc.u32 %v2527_v31, %v2523_v16  ;;  %v2549_v57 = vadd.s32 %v2543_v44, %v2539_v5  ;;  %v2550_v32 = vadd.s32 %v2548_v46, %v2542_v63  ;;  %v2138_v28 = vmul.f32 -0.00019511016, %v5996_v20 }
 0x250   :  { %v2269_v38 = vor.u32 %v2268_v13, %v2267_v7  ;;  %v2273_v45 = vor.u32 4788187, %v2272_v50  ;;  %vm2629_vm11 = vcmp.gt.s32.totalorder %v2628_v58, 0  ;;  %v2528_v3 = vadd.s32 %v2526_v62, %v2520_v30 }
 0x251   :  { %vm2551_vm0 = vc.u32 %v2549_v57, %v6983_v4  ;;  %v6982_v53 = vand.u32 2147483647, %v7198_v26  ;;  %v2630_v21 = vsel %vm2629_vm11, %v2628_v58, 0  ;;  %v2414_v6 = vsub.s32 0, %v6006_v48 }
 0x252   :  { %v2530_v40 = vsel %vm2529_vm12, 1, %v7050_v25  ;;  %v2552_v16 = vsel %vm2551_vm0, 1, %v7050_v25  ;;  %v2632_v5 = vand.u32 31, %v2630_v21  ;;  %v6021_v31 = vsel %vm1997_vm15, %v1998_v43, %v5992_v9 }
 0x253   :  { %vm2413_vm10 = vcmp.lt.s32.totalorder %v6006_v48, 0  ;;  %v2544_v63 = vshrl.u32 %v5979_v0, 16  ;;  %v2554_v44 = vadd.s32 %v2552_v16, %v2550_v32  ;;  %v2132_v7 = vadd.f32 0.041655596, %v2131_v56 }
 0x254   :  { %v2139_v13 = vadd.f32 0.008332121, %v2138_v28  ;;  %v2276_v50 = vcvt.s32.f32 %v2269_v38  ;;  %v6025_v58 = vsub.s32 32, %v2632_v5  ;;  %v2274_v30 = vand.u32 2147483647, %v2273_v45 }
 0x255   :  { %v2522_v62 = vshrl.u32 %v5962_v35, 16  ;;  %v2532_v46 = vadd.s32 %v2530_v40, %v2528_v3  ;;  %v2625_v24 = vand.u32 8388607, %v6982_v53  ;;  %vm1994_vm8 = vcmp.eq.s32.totalorder %v5952_v41, 0 }
 0x256   :  { %v2415_v43 = vsel %vm2413_vm10, %v2414_v6, %v6006_v48  ;;  %v2480_v0 = vshrl.u32 %v7045_v27, %v5861_v60  ;;  %v2501_v56 = vsel %vm2499_vm7, %v5899_v55, 2102212464  ;;  %v2524_v32 = vshrl.u32 %v5971_v22, 16 }
 0x257   :  { %v2546_v28 = vshrl.u32 %v5989_v10, 16  ;;  %v2555_v35 = vadd.s32 %v2554_v44, %v2544_v63  ;;  %v2638_v38 = vshll.u32 %v7068_v47, %v2632_v5  ;;  %v2644_v45 = vshll.u32 %v7067_v39, %v2632_v5  ;;  %v7200_v44 = vld [vmem:[#allocation10_spill] sm:$0xff] }
 0x258   :  { %v2639_v3 = vshrl.u32 %v7069_v37, %v6025_v58  ;;  %v2641_v6 = vshll.u32 %v7069_v37, %v2632_v5  ;;  %v2642_v60 = vshrl.u32 %v7067_v39, %v6025_v58  ;;  %v2645_v55 = vshrl.u32 %v7051_v51, %v6025_v58 }
 0x259   :  { %vm1839_vm2 = vcmp.lt.s32.totalorder %v5805_v33, 2  ;;  %v2533_v22 = vadd.s32 %v2532_v46, %v2522_v62  ;;  %v6049_v40 = vshrl.u32 %v2630_v21, 5  ;;  %v2647_v16 = vshll.u32 %v7051_v51, %v2632_v5 }
 0x25a   :  { %v2648_v63 = vshrl.u32 %v7127_v11, %v6025_v58  ;;  %vm2158_vm14 = vcmp.lt.s32.totalorder %v7200_v44, 0  ;;  %v2277_v53 = vmul.f32 %v2276_v50, %v2274_v30  ;;  %v2416_v4 = vclz %v2415_v43 }
 0x25b   :  { %v2635_v26 = vshll.u32 %v7045_v27, %v2632_v5  ;;  %v2636_v49 = vshrl.u32 %v7068_v47, %v6025_v58  ;;  %vm1993_vm7 = vcmp.lt.s32.totalorder %v5952_v41, 2  ;;  %v2500_v21 = vsel %vm2496_vm3, %v2480_v0, %v5894_v61 }
 0x25c   :  { %v2626_v62 = vor.u32 8388608, %v2625_v24  ;;  %v2646_v46 = vor.u32 %v2645_v55, %v2644_v45  ;;  %v2649_v36 = vor.u32 %v2648_v63, %v2647_v16  ;;  %v2502_v19 = vsel %vm2498_vm1, %v5896_v23, %v2501_v56 }
 0x25d   :  { %v2556_v50 = vadd.s32 %v2555_v35, %v2546_v28  ;;  %v6065_v30 = vor.u32 %v2639_v3, %v2638_v38  ;;  %v6067_v5 = vor.u32 %v2642_v60, %v2641_v6  ;;  %v6069_v43 = vadd.s32 %v2533_v22, %v2524_v32 }
 0x25e   :  { %v7201_v15 = vshll.u32 %v5989_v10, 16  ;;  %vm2650_vm3 = vcmp.lt.s32.totalorder %v6049_v40, 1  ;;  %vm2653_vm13 = vcmp.lt.s32.totalorder %v6049_v40, 4  ;;  %v2133_v61 = vmul.f32 %v2132_v7, %v5996_v20 }
 0x25f   :  { %v3373_v24 = vadd.s32 4294967294, %v2416_v4  ;;  %v6078_v0 = vor.u32 %v2636_v49, %v2635_v26  ;;  %vm2652_vm1 = vcmp.lt.s32.totalorder %v6049_v40, 3  ;;  %v2140_v23 = vmul.f32 %v2139_v13, %v5996_v20 }
 0x260   :  { %v6073_v54 = vadd.s32 %v2549_v57, %v7201_v15  ;;  %v2659_v56 = vsel %vm2653_vm13, %v2646_v46, 920167782  ;;  %v2663_v15 = vsel %vm2653_vm13, %v2649_v36, 1326507024  ;;  %v6086_v10 = vshll.u32 %v2626_v62, 8 }
 0x261   :  { %v2503_v57 = vsel %vm2497_vm9, %v2500_v21, %v2502_v19  ;;  %v2560_v32 = vadd.s32 1, %v2556_v50  ;;  %vm2651_vm15 = vcmp.lt.s32.totalorder %v6049_v40, 2  ;;  %v2662_v49 = vsel %vm2650_vm3, %v6065_v30, %v6067_v5 }
 0x262   :  { %v7202_v4 = vxor.u32 2147483648, %v5992_v9  ;;  %v2278_v36 = vxor.u32 2147483648, %v2277_v53  ;;  %vm2559_vm6 = vc.u32 %v6069_v43, %v6073_v54  ;;  %v2664_v34 = vsel %vm2652_vm1, %v2646_v46, %v2663_v15 }
 0x263   :  { %v2134_v19 = vadd.f32 -0.4999988, %v2133_v61  ;;  %vm3374_vm9 = vcmp.lt.s32.totalorder %v3373_v24, 0  ;;  %v2658_v7 = vsel %vm2650_vm3, %v6078_v0, %v6065_v30  ;;  %v2660_v9 = vsel %vm2652_vm1, %v6067_v5, %v2659_v56 }
 0x264   :  { %v1996_v26 = vsel %vm1994_vm8, %v5984_v2, %v7202_v4  ;;  %v2557_v2 = vmul.u32 %v5919_v8, %v2503_v57  ;;  %v2665_v13 = vsel %vm2651_vm15, %v2662_v49, %v2664_v34  ;;  %v2667_v28 = vand.u32 65535, %v6086_v10  ;;  %v7207_v49 = vld [vmem:[#allocation18_spill] sm:$0xff] }
 0x265   :  { %v2668_v35 = vshrl.u32 %v6086_v10, 16  ;;  %v6120_v38 = vsel %vm1839_vm2, %v5959_v1, %v5950_v29  ;;  %v2141_v45 = vadd.f32 -0.16666654, %v2140_v23  ;;  %v7203_v3 = vand.u32 2147483647, %v7200_v44 }
 0x266   :  { %v2561_v8 = vsel %vm2559_vm6, %v2560_v32, %v2556_v50  ;;  %v2279_v60 = vsel %vm2158_vm14, %v2278_v36, %v2277_v53  ;;  %v2661_v55 = vsel %vm2651_vm15, %v2658_v7, %v2660_v9  ;;  %v2669_v22 = vand.u32 65535, %v2665_v13 }
 0x267   :  { %vm6124_vm4 = vcmp.le.f32.partialorder %v7203_v3, 0.7853982  ;;  %v2670_v16 = vshrl.u32 %v2665_v13, 16  ;;  %v6135_v33 = vsel %vm1993_vm7, %v1996_v26, %v6021_v31  ;;  %v2135_v29 = vmul.f32 %v2134_v19, %v5996_v20 }
 0x268   :  { %v7206_v1 = vsel %vm5908_vm5, 0, %v5967_v59  ;;  %v2419_v53 = vsel %vm3374_vm9, 0, %v3373_v24  ;;  %v6145_v21 = vadd.s32 %v2561_v8, %v2557_v2  ;;  %v2671_v62 = vmul.u32 %v2669_v22, %v2667_v28 }
 0x269   :  { %v6142_v63 = vand.u32 3, %v7206_v1  ;;  %v2672_v46 = vmul.u32 %v2670_v16, %v2667_v28  ;;  %v6147_v50 = vmul.u32 %v2669_v22, %v2668_v35  ;;  %v2142_v41 = vmul.f32 %v2141_v45, %v5996_v20 }
 0x26a   :  { %v6153_v31 = vsel %vm6124_vm4, %v7200_v44, %v2279_v60  ;;  %v2691_v12 = vand.u32 65535, %v2661_v55  ;;  %v2692_v61 = vshrl.u32 %v2661_v55, 16  ;;  %v2280_v59 = vsub.s32 4, %v5811_v52 }
 0x26b   :  { %v2424_v23 = vsub.s32 4294967266, %v2419_v53  ;;  %v2674_v56 = vmul.u32 %v2670_v16, %v2668_v35  ;;  %v2675_v24 = vshll.u32 %v2672_v46, 16  ;;  %v6156_v15 = vadd.f32 1.0, %v2135_v29 }
 0x26c   :  { %v2677_v57 = vshll.u32 %v6147_v50, 16  ;;  %v2694_v32 = vmul.u32 %v2692_v61, %v2667_v28  ;;  %v2775_v4 = vand.u32 2139095040, %v7207_v49  ;;  %v6162_v20 = vmul.f32 %v6153_v31, %v6153_v31 }
 0x26d   :  { %v2563_v26 = vadd.s32 536870912, %v6145_v21  ;;  %vm2679_vm5 = vc.u32 %v2671_v62, %v2675_v24  ;;  %v2681_v36 = vadd.s32 %v2675_v24, %v2671_v62  ;;  %v2143_v34 = vadd.f32 1.0, %v2142_v41 }
 0x26e   :  { %v2404_v19 = vadd.s32 %v5868_v17, %v5866_v18  ;;  %v2680_v7 = vsel %vm2679_vm5, 1, %v7050_v25  ;;  %v2695_v9 = vmul.u32 %v2691_v12, %v2668_v35  ;;  %v2420_v2 = vsub.s32 32, %v2419_v53 }
 0x26f   :  { %v2425_v13 = vadd.s32 127, %v2424_v23  ;;  %v2634_v45 = vshrl.u32 %v7045_v27, %v6025_v58  ;;  %v2682_v3 = vadd.s32 %v2680_v7, %v2674_v56  ;;  %vm2683_vm12 = vc.u32 %v2681_v36, %v2677_v57 }
 0x270   :  { %v2693_v8 = vmul.u32 %v2691_v12, %v2667_v28  ;;  %v2697_v60 = vshll.u32 %v2694_v32, 16  ;;  %v2776_v55 = vshrl.u32 %v2775_v4, 23  ;;  %v2292_v22 = vmul.f32 -0.00019511016, %v6162_v20 }
 0x271   :  { %v6171_v16 = vshrl.u32 %v2563_v26, 30  ;;  %v2655_v18 = vsel %vm2653_vm13, %v6067_v5, 2102212464  ;;  %v2676_v17 = vshrl.u32 %v2672_v46, 16  ;;  %v2421_v29 = vshll.u32 %v6006_v48, %v2419_v53 }
 0x272   :  { %v2684_v1 = vsel %vm2683_vm12, 1, %v7050_v25  ;;  %v2696_v62 = vmul.u32 %v2692_v61, %v2668_v35  ;;  %v2699_v58 = vshll.u32 %v2695_v9, 16  ;;  %v2422_v41 = vshrl.u32 %v2404_v19, %v2420_v2 }
 0x273   :  { %v2426_v23 = vshll.u32 %v2425_v13, 23  ;;  %v2654_v28 = vsel %vm2650_vm3, %v2634_v45, %v6078_v0  ;;  %v2686_v12 = vadd.s32 %v2684_v1, %v2682_v3  ;;  %v2656_v56 = vsel %vm2652_vm1, %v6065_v30, %v2655_v18 }
 0x274   :  { %vm2701_vm11 = vc.u32 %v2693_v8, %v2697_v60  ;;  %v2703_v5 = vadd.s32 %v2697_v60, %v2693_v8  ;;  %v3381_v46 = vadd.s32 4294967169, %v2776_v55  ;;  %v2565_v48 = vshll.u32 %v6171_v16, 30 }
 0x275   :  { %v2678_v53 = vshrl.u32 %v6147_v50, 16  ;;  %v2687_v35 = vadd.s32 %v2686_v12, %v2676_v17  ;;  %v2702_v61 = vsel %vm2701_vm11, 1, %v7050_v25  ;;  %v2698_v24 = vshrl.u32 %v2694_v32, 16 }
 0x276   :  { %v2704_v57 = vadd.s32 %v2702_v61, %v2696_v62  ;;  %vm2705_vm0 = vc.u32 %v2703_v5, %v2699_v58  ;;  %v2782_v4 = vadd.s32 1, %v3381_v46  ;;  %v2423_v0 = vor.u32 %v2422_v41, %v2421_v29 }
 0x277   :  { %v2427_v26 = vor.u32 4788187, %v2426_v23  ;;  %v2706_v36 = vsel %vm2705_vm0, 1, %v7050_v25  ;;  %v6992_v30 = vand.u32 2147483647, %v7207_v49  ;;  %v2657_v19 = vsel %vm2651_vm15, %v2654_v28, %v2656_v56 }
 0x278   :  { %v2700_v7 = vshrl.u32 %v2695_v9, 16  ;;  %v2708_v2 = vadd.s32 %v2706_v36, %v2704_v57  ;;  %vm2783_vm10 = vcmp.gt.s32.totalorder %v2782_v4, 0  ;;  %v6192_v50 = vsub.s32 %v6145_v21, %v2565_v48 }
 0x279   :  { %v6194_v13 = vadd.s32 %v2687_v35, %v2678_v53  ;;  %v6196_v32 = vadd.s32 %v2703_v5, %v2699_v58  ;;  %v2784_v45 = vsel %vm2783_vm10, %v2782_v4, 0  ;;  %v6199_v3 = vmul.f32 %v2143_v34, %v5976_v14  ;;  %v7208_v4 = vld [vmem:[#allocation23_spill] sm:$0xff] }
 0x27a   :  { %v2152_v8 = vxor.u32 2147483648, %v6156_v15  ;;  %v2709_v60 = vadd.s32 %v2708_v2, %v2698_v24  ;;  %v2786_v55 = vand.u32 31, %v2784_v45  ;;  %v2285_v40 = vmul.f32 -0.001358992, %v6162_v20 }
 0x27b   :  { %v2293_v9 = vadd.f32 0.008332121, %v2292_v22  ;;  %v2428_v18 = vand.u32 2147483647, %v2427_v26  ;;  %v2430_v17 = vcvt.s32.f32 %v2423_v0  ;;  %vm2151_vm8 = vcmp.eq.s32.totalorder %v6142_v63, 2 }
 0x27c   :  { %v2710_v21 = vadd.s32 %v2709_v60, %v2700_v7  ;;  %v2711_v29 = vmul.u32 %v6086_v10, %v2657_v19  ;;  %v2779_v1 = vand.u32 8388607, %v6992_v30  ;;  %v6207_v62 = vsub.s32 32, %v2786_v55 }
 0x27d   :  { %vm2148_vm2 = vcmp.eq.s32.totalorder %v6142_v63, 0  ;;  %vm2567_vm7 = vcmp.lt.s32.totalorder %v6192_v50, 0  ;;  %v2568_v14 = vsub.s32 0, %v6192_v50  ;;  %vm2713_vm3 = vc.u32 %v6194_v13, %v6196_v32 }
 0x27e   :  { %v2792_v34 = vshll.u32 %v7068_v47, %v2786_v55  ;;  %vm2312_vm13 = vcmp.lt.s32.totalorder %v7187_v42, 0  ;;  %v2714_v22 = vadd.s32 1, %v2710_v21  ;;  %v2795_v10 = vshll.u32 %v7069_v37, %v2786_v55 }
 0x27f   :  { %v2798_v58 = vshll.u32 %v7067_v39, %v2786_v55  ;;  %v2801_v41 = vshll.u32 %v7051_v51, %v2786_v55  ;;  %v2793_v23 = vshrl.u32 %v7069_v37, %v6207_v62  ;;  %v2796_v28 = vshrl.u32 %v7067_v39, %v6207_v62 }
 0x280   :  { %v2799_v12 = vshrl.u32 %v7051_v51, %v6207_v62  ;;  %v2802_v56 = vshrl.u32 %v7127_v11, %v6207_v62  ;;  %vm2147_vm1 = vcmp.lt.s32.totalorder %v6142_v63, 2  ;;  %v2286_v5 = vadd.f32 0.041655596, %v2285_v40 }
 0x281   :  { %v2294_v46 = vmul.f32 %v2293_v9, %v6162_v20  ;;  %v2715_v48 = vsel %vm2713_vm3, %v2714_v22, %v2710_v21  ;;  %v6229_v53 = vshrl.u32 %v2784_v45, 5  ;;  %v2431_v35 = vmul.f32 %v2430_v17, %v2428_v18  ;;  %v7212_v9 = vld [vmem:[#allocation24_spill] sm:$0xff] }
 0x282   :  { %v2716_v61 = vadd.s32 %v2715_v48, %v2711_v29  ;;  %v2789_v24 = vshll.u32 %v7045_v27, %v2786_v55  ;;  %v2790_v57 = vshrl.u32 %v7068_v47, %v6207_v62  ;;  %vm1837_vm15 = vweird.f32 %v7208_v4 }
 0x283   :  { %v7209_v0 = vand.u32 2147483647, %v7187_v42  ;;  %v2569_v36 = vsel %vm2567_vm7, %v2568_v14, %v6192_v50  ;;  %v2780_v19 = vor.u32 8388608, %v2779_v1  ;;  %v2800_v7 = vor.u32 %v2799_v12, %v2798_v58 }
 0x284   :  { %v2803_v2 = vor.u32 %v2802_v56, %v2801_v41  ;;  %v2149_v45 = vxor.u32 2147483648, %v6199_v3  ;;  %v2717_v60 = vadd.s32 536870912, %v2716_v61  ;;  %v6245_v55 = vor.u32 %v2793_v23, %v2792_v34 }
 0x285   :  { %vm6237_vm6 = vcmp.le.f32.partialorder %v7209_v0, 0.7853982  ;;  %v6247_v40 = vor.u32 %v2796_v28, %v2795_v10  ;;  %vm1991_vm9 = vweird.f32 %v7212_v9  ;;  %v2287_v18 = vmul.f32 %v2286_v5, %v6162_v20 }
 0x286   :  { %v2295_v17 = vadd.f32 -0.16666654, %v2294_v46  ;;  %vm2804_vm5 = vcmp.lt.s32.totalorder %v6229_v53, 1  ;;  %vm2807_vm12 = vcmp.lt.s32.totalorder %v6229_v53, 4  ;;  %v2432_v21 = vxor.u32 2147483648, %v2431_v35 }
 0x287   :  { %v2570_v29 = vclz %v2569_v36  ;;  %v6253_v1 = vor.u32 %v2790_v57, %v2789_v24  ;;  %vm2806_vm11 = vcmp.lt.s32.totalorder %v6229_v53, 3  ;;  %v6256_v14 = vshrl.u32 %v2717_v60, 30  ;;  %v7214_v36 = vld [vmem:[#allocation45_spill] sm:$0xff] }
 0x288   :  { %v2813_v34 = vsel %vm2807_vm12, %v2800_v7, 920167782  ;;  %v2817_v22 = vsel %vm2807_vm12, %v2803_v2, 1326507024  ;;  %v6262_v10 = vshll.u32 %v2780_v19, 8  ;;  %v2153_v58 = vsel %vm2151_vm8, %v2152_v8, %v6199_v3 }
 0x289   :  { %v2281_v41 = vsel %vm2158_vm14, %v2280_v59, %v5811_v52  ;;  %vm2805_vm0 = vcmp.lt.s32.totalorder %v6229_v53, 2  ;;  %v2816_v23 = vsel %vm2804_vm5, %v6245_v55, %v6247_v40  ;;  %v2150_v28 = vsel %vm2148_vm2, %v6156_v15, %v2149_v45 }
 0x28a   :  { %v2288_v12 = vadd.f32 -0.4999988, %v2287_v18  ;;  %v2296_v3 = vmul.f32 %v2295_v17, %v6162_v20  ;;  %v2818_v8 = vsel %vm2806_vm11, %v2800_v7, %v2817_v22  ;;  %v2433_v52 = vsel %vm2312_vm13, %v2432_v21, %v2431_v35  ;;  %v7213_v35 = vld [vmem:[#allocation25_spill] sm:$0xff] }
 0x28b   :  { %v3376_v59 = vadd.s32 4294967294, %v2570_v29  ;;  %v2812_v56 = vsel %vm2804_vm5, %v6253_v1, %v6245_v55  ;;  %v2814_v5 = vsel %vm2806_vm11, %v6247_v40, %v2813_v34  ;;  %v2719_v15 = vshll.u32 %v6256_v14, 30 }
 0x28c   :  { %v2819_v46 = vsel %vm2805_vm0, %v2816_v23, %v2818_v8  ;;  %v2821_v48 = vand.u32 65535, %v6262_v10  ;;  %v2822_v24 = vshrl.u32 %v6262_v10, 16  ;;  %vm2145_vm14 = vweird.f32 %v7213_v35 }
 0x28d   :  { %v2154_v57 = vsel %vm2147_vm1, %v2150_v28, %v2153_v58  ;;  %v2283_v0 = vsel %vm6124_vm4, 0, %v2281_v41  ;;  %v2434_v19 = vsub.s32 4, %v7214_v36  ;;  %v2289_v7 = vmul.f32 %v2288_v12, %v6162_v20  ;;  %v7218_v12 = vld [vmem:[#allocation19_spill] sm:$0xff] }
 0x28e   :  { %v2815_v2 = vsel %vm2805_vm0, %v2812_v56, %v2814_v5  ;;  %v2823_v45 = vand.u32 65535, %v2819_v46  ;;  %v2824_v60 = vshrl.u32 %v2819_v46, 16  ;;  %v6309_v18 = vsel %vm1837_vm15, nan, %v6120_v38 }
 0x28f   :  { %7215 = vst [vmem:[#allocation18_spill] sm:$0xff] %v6309_v18  ;;  %v2297_v17 = vadd.f32 1.0, %v2296_v3  ;;  %v6314_v6 = vsel %vm6237_vm6, %v7187_v42, %v2433_v52  ;;  %vm3377_vm4 = vcmp.lt.s32.totalorder %v3376_v59, 0  ;;  %v6316_v63 = vsub.s32 %v2716_v61, %v2719_v15 }
 0x290   :  { %v2825_v20 = vmul.u32 %v2823_v45, %v2821_v48  ;;  %v2826_v21 = vmul.u32 %v2824_v60, %v2821_v48  ;;  %v6318_v29 = vmul.u32 %v2823_v45, %v2822_v24  ;;  %v6323_v34 = vsel %vm1991_vm9, nan, %v6135_v33 }
 0x291   :  { %7216 = vst [vmem:[#allocation23_spill] sm:$0xff] %v6323_v34  ;;  %v6327_v38 = vsel %vm2145_vm14, nan, %v2154_v57  ;;  %v6329_v4 = vand.u32 3, %v2283_v0  ;;  %v2846_v22 = vshrl.u32 %v2815_v2, 16  ;;  %v6331_v58 = vadd.f32 1.0, %v2289_v7 }
 0x292   :  { %7217 = vst [vmem:[#allocation24_spill] sm:$0xff] %v6327_v38  ;;  %v6336_v61 = vsel %vm2312_vm13, %v2434_v19, %v7214_v36  ;;  %v6340_v41 = vmul.f32 %v6314_v6, %v6314_v6  ;;  %v2829_v33 = vshll.u32 %v2826_v21, 16  ;;  %v6343_v9 = vmul.f32 %v2297_v17, %v6153_v31 }
 0x293   :  { %v6345_v23 = vsel %vm3377_vm4, 0, %v3376_v59  ;;  %v2845_v28 = vand.u32 65535, %v2815_v2  ;;  %v2929_v3 = vand.u32 2139095040, %v7218_v12  ;;  %v2722_v8 = vsub.s32 0, %v6316_v63 }
 0x294   :  { %v2828_v52 = vmul.u32 %v2824_v60, %v2822_v24  ;;  %v2831_v56 = vshll.u32 %v6318_v29, 16  ;;  %vm2833_vm10 = vc.u32 %v2825_v20, %v2829_v33  ;;  %vm2721_vm8 = vcmp.lt.s32.totalorder %v6316_v63, 0 }
 0x295   :  { %v2834_v5 = vsel %vm2833_vm10, 1, %v7050_v25  ;;  %v2835_v15 = vadd.s32 %v2829_v33, %v2825_v20  ;;  %v2848_v46 = vmul.u32 %v2846_v22, %v2821_v48  ;;  %v2439_v31 = vmul.f32 -0.001358992, %v6340_v41 }
 0x296   :  { %v2446_v59 = vmul.f32 -0.00019511016, %v6340_v41  ;;  %v2558_v35 = vadd.s32 %v6073_v54, %v6069_v43  ;;  %v2578_v57 = vsub.s32 4294967266, %v6345_v23  ;;  %v2574_v0 = vsub.s32 32, %v6345_v23 }
 0x297   :  { %v2575_v36 = vshll.u32 %v6192_v50, %v6345_v23  ;;  %v2847_v19 = vmul.u32 %v2845_v28, %v2821_v48  ;;  %v2930_v7 = vshrl.u32 %v2929_v3, 23  ;;  %v2723_v2 = vsel %vm2721_vm8, %v2722_v8, %v6316_v63 }
 0x298   :  { %v2830_v45 = vshrl.u32 %v2826_v21, 16  ;;  %v2836_v60 = vadd.s32 %v2834_v5, %v2828_v52  ;;  %vm2837_vm2 = vc.u32 %v2835_v15, %v2831_v56  ;;  %vm2305_vm7 = vcmp.eq.s32.totalorder %v6329_v4, 2 }
 0x299   :  { %v2838_v17 = vsel %vm2837_vm2, 1, %v7050_v25  ;;  %v2849_v20 = vmul.u32 %v2845_v28, %v2822_v24  ;;  %v2850_v54 = vmul.u32 %v2846_v22, %v2822_v24  ;;  %v2851_v43 = vshll.u32 %v2848_v46, 16 }
 0x29a   :  { %vm2302_vm3 = vcmp.eq.s32.totalorder %v6329_v4, 0  ;;  %v2579_v33 = vadd.s32 127, %v2578_v57  ;;  %v2788_v50 = vshrl.u32 %v7045_v27, %v6207_v62  ;;  %v2809_v48 = vsel %vm2807_vm12, %v6247_v40, 2102212464 }
 0x29b   :  { %v2840_v21 = vadd.s32 %v2838_v17, %v2836_v60  ;;  %v2724_v23 = vclz %v2723_v2  ;;  %v2853_v3 = vshll.u32 %v2849_v20, 16  ;;  %vm2855_vm13 = vc.u32 %v2847_v19, %v2851_v43 }
 0x29c   :  { %v2857_v8 = vadd.s32 %v2851_v43, %v2847_v19  ;;  %v2576_v52 = vshrl.u32 %v2558_v35, %v2574_v0  ;;  %v2832_v28 = vshrl.u32 %v6318_v29, 16  ;;  %v2856_v22 = vsel %vm2855_vm13, 1, %v7050_v25 }
 0x29d   :  { %v2841_v24 = vadd.s32 %v2840_v21, %v2830_v45  ;;  %v2852_v56 = vshrl.u32 %v2848_v46, 16  ;;  %v2858_v5 = vadd.s32 %v2856_v22, %v2850_v54  ;;  %v3384_v15 = vadd.s32 4294967169, %v2930_v7 }
 0x29e   :  { %vm2859_vm1 = vc.u32 %v2857_v8, %v2853_v3  ;;  %v2580_v62 = vshll.u32 %v2579_v33, 23  ;;  %v2808_v40 = vsel %vm2804_vm5, %v2788_v50, %v6253_v1  ;;  %v2810_v57 = vsel %vm2806_vm11, %v6245_v55, %v2809_v48 }
 0x29f   :  { %v2860_v35 = vsel %vm2859_vm1, 1, %v7050_v25  ;;  %v3379_v0 = vadd.s32 4294967294, %v2724_v23  ;;  %v2854_v29 = vshrl.u32 %v2849_v20, 16  ;;  %v2936_v2 = vadd.s32 1, %v3384_v15 }
 0x2a0   :  { %v2862_v19 = vadd.s32 %v2860_v35, %v2858_v5  ;;  %v2303_v46 = vxor.u32 2147483648, %v6343_v9  ;;  %v2306_v45 = vxor.u32 2147483648, %v6331_v58  ;;  %v6380_v7 = vadd.s32 %v2841_v24, %v2832_v28 }
 0x2a1   :  { %v6382_v60 = vadd.s32 %v2857_v8, %v2853_v3  ;;  %v2440_v17 = vadd.f32 0.041655596, %v2439_v31  ;;  %v2811_v1 = vsel %vm2805_vm0, %v2808_v40, %v2810_v57  ;;  %vm2937_vm15 = vcmp.gt.s32.totalorder %v2936_v2, 0 }
 0x2a2   :  { %v2863_v54 = vadd.s32 %v2862_v19, %v2852_v56  ;;  %v2447_v55 = vadd.f32 0.008332121, %v2446_v59  ;;  %v2577_v43 = vor.u32 %v2576_v52, %v2575_v36  ;;  %v2581_v33 = vor.u32 4788187, %v2580_v62 }
 0x2a3   :  { %v2938_v20 = vsel %vm2937_vm15, %v2936_v2, 0  ;;  %vm3380_vm9 = vcmp.lt.s32.totalorder %v3379_v0, 0  ;;  %v6991_v48 = vand.u32 2147483647, %v7218_v12  ;;  %v6390_v23 = vsel %vm2305_vm7, %v2306_v45, %v6343_v9 }
 0x2a4   :  { %v2864_v50 = vadd.s32 %v2863_v54, %v2854_v29  ;;  %v2940_v21 = vand.u32 31, %v2938_v20  ;;  %v2437_v53 = vsel %vm6237_vm6, 0, %v6336_v61  ;;  %v2865_v31 = vmul.u32 %v6262_v10, %v2811_v1 }
 0x2a5   :  { %vm2867_vm5 = vc.u32 %v6380_v7, %v6382_v60  ;;  %v6401_v59 = vsel %vm2302_vm3, %v6331_v58, %v2303_v46  ;;  %v2441_v36 = vmul.f32 %v2440_v17, %v6340_v41  ;;  %v2448_v9 = vmul.f32 %v2447_v55, %v6340_v41 }
 0x2a6   :  { %v2868_v3 = vadd.s32 1, %v2864_v50  ;;  %v6404_v8 = vsub.s32 32, %v2940_v21  ;;  %v2582_v52 = vand.u32 2147483647, %v2581_v33  ;;  %v2584_v26 = vcvt.s32.f32 %v2577_v43 }
 0x2a7   :  { %v2727_v61 = vsel %vm3380_vm9, 0, %v3379_v0  ;;  %v2933_v10 = vand.u32 8388607, %v6991_v48  ;;  %v2943_v24 = vshll.u32 %v7045_v27, %v2940_v21  ;;  %v2946_v22 = vshll.u32 %v7068_v47, %v2940_v21  ;;  %v7219_v0 = vld [vmem:[#allocation12_spill] sm:$0xff] }
 0x2a8   :  { %v2869_v28 = vsel %vm2867_vm5, %v2868_v3, %v2864_v50  ;;  %v2944_v56 = vshrl.u32 %v7068_v47, %v6404_v8  ;;  %v2947_v5 = vshrl.u32 %v7069_v37, %v6404_v8  ;;  %v2952_v15 = vshll.u32 %v7067_v39, %v2940_v21 }
 0x2a9   :  { %v2870_v58 = vadd.s32 %v2869_v28, %v2865_v31  ;;  %v2442_v62 = vadd.f32 -0.4999988, %v2441_v36  ;;  %v6416_v40 = vshrl.u32 %v2938_v20, 5  ;;  %v2949_v57 = vshll.u32 %v7069_v37, %v2940_v21 }
 0x2aa   :  { %v2950_v35 = vshrl.u32 %v7067_v39, %v6404_v8  ;;  %vm2466_vm6 = vcmp.lt.s32.totalorder %v7219_v0, 0  ;;  %v2712_v29 = vadd.s32 %v6196_v32, %v6194_v13  ;;  %v2732_v19 = vsub.s32 4294967266, %v2727_v61 }
 0x2ab   :  { %v2871_v2 = vadd.s32 536870912, %v2870_v58  ;;  %v2953_v46 = vshrl.u32 %v7051_v51, %v6404_v8  ;;  %v2585_v45 = vmul.f32 %v2584_v26, %v2582_v52  ;;  %v2934_v17 = vor.u32 8388608, %v2933_v10 }
 0x2ac   :  { %v2955_v1 = vshll.u32 %v7051_v51, %v2940_v21  ;;  %v2956_v54 = vshrl.u32 %v7127_v11, %v6404_v8  ;;  %v6431_v43 = vor.u32 %v2944_v56, %v2943_v24  ;;  %v6433_v33 = vor.u32 %v2947_v5, %v2946_v22 }
 0x2ad   :  { %v6429_v55 = vshrl.u32 %v2871_v2, 30  ;;  %v2954_v20 = vor.u32 %v2953_v46, %v2952_v15  ;;  %v7220_v13 = vand.u32 2147483647, %v7219_v0  ;;  %v2728_v50 = vsub.s32 32, %v2727_v61 }
 0x2ae   :  { %v2951_v31 = vor.u32 %v2950_v35, %v2949_v57  ;;  %vm2958_vm11 = vcmp.lt.s32.totalorder %v6416_v40, 1  ;;  %vm2961_vm0 = vcmp.lt.s32.totalorder %v6416_v40, 4  ;;  %v6443_v21 = vand.u32 3, %v2437_v53 }
 0x2af   :  { %vm6437_vm12 = vcmp.le.f32.partialorder %v7220_v13, 0.7853982  ;;  %v2733_v36 = vadd.s32 127, %v2732_v19  ;;  %v2873_v3 = vshll.u32 %v6429_v55, 30  ;;  %vm2960_vm14 = vcmp.lt.s32.totalorder %v6416_v40, 3 }
 0x2b0   :  { %v6448_v52 = vmul.f32 %v2442_v62, %v6340_v41  ;;  %v2449_v26 = vadd.f32 -0.16666654, %v2448_v9  ;;  %v2957_v28 = vor.u32 %v2956_v54, %v2955_v1  ;;  %v2967_v10 = vsel %vm2961_vm0, %v2954_v20, 920167782 }
 0x2b1   :  { %v6452_v24 = vsub.s32 %v2870_v58, %v2873_v3  ;;  %vm2959_vm4 = vcmp.lt.s32.totalorder %v6416_v40, 2  ;;  %v2966_v53 = vsel %vm2958_vm11, %v6431_v43, %v6433_v33  ;;  %v6459_v22 = vshll.u32 %v2934_v17, 8 }
 0x2b2   :  { %v2586_v56 = vxor.u32 2147483648, %v2585_v45  ;;  %v2729_v5 = vshll.u32 %v6316_v63, %v2727_v61  ;;  %v2730_v15 = vshrl.u32 %v2712_v29, %v2728_v50  ;;  %v2968_v9 = vsel %vm2960_vm14, %v2951_v31, %v2967_v10  ;;  %v7223_v61 = vld [vmem:[#allocation20_spill] sm:$0xff] }
 0x2b3   :  { %v2734_v62 = vshll.u32 %v2733_v36, 23  ;;  %vm2875_vm10 = vcmp.lt.s32.totalorder %v6452_v24, 0  ;;  %v2876_v58 = vsub.s32 0, %v6452_v24  ;;  %v2970_v57 = vsel %vm2958_vm11, %v6433_v33, %v2951_v31 }
 0x2b4   :  { %v2450_v35 = vmul.f32 %v2449_v26, %v6340_v41  ;;  %v2969_v19 = vsel %vm2959_vm4, %v2966_v53, %v2968_v9  ;;  %v2971_v63 = vsel %vm2961_vm0, %v2957_v28, 1326507024  ;;  %v3083_v29 = vand.u32 2139095040, %v7223_v61 }
 0x2b5   :  { %v2877_v2 = vsel %vm2875_vm10, %v2876_v58, %v6452_v24  ;;  %v2972_v46 = vsel %vm2960_vm14, %v2954_v20, %v2971_v63  ;;  %v2975_v17 = vand.u32 65535, %v6459_v22  ;;  %v2976_v1 = vshrl.u32 %v6459_v22, 16 }
 0x2b6   :  { %v2587_v41 = vsel %vm2466_vm6, %v2586_v56, %v2585_v45  ;;  %v2731_v54 = vor.u32 %v2730_v15, %v2729_v5  ;;  %v2878_v13 = vclz %v2877_v2  ;;  %v2973_v50 = vsel %vm2959_vm4, %v2970_v57, %v2972_v46 }
 0x2b7   :  { %v2735_v36 = vor.u32 4788187, %v2734_v62  ;;  %v2977_v3 = vand.u32 65535, %v2973_v50  ;;  %v2978_v26 = vshrl.u32 %v2973_v50, 16  ;;  %v3000_v28 = vshrl.u32 %v2969_v19, 16 }
 0x2b8   :  { %v6484_v10 = vadd.f32 1.0, %v2450_v35  ;;  %v3382_v53 = vadd.s32 4294967294, %v2878_v13  ;;  %v3084_v9 = vshrl.u32 %v3083_v29, 23  ;;  %v6490_v58 = vsel %vm6437_vm12, %v7219_v0, %v2587_v41 }
 0x2b9   :  { %v2980_v45 = vmul.u32 %v2978_v26, %v2975_v17  ;;  %v2981_v56 = vmul.u32 %v2977_v3, %v2976_v1  ;;  %v2999_v5 = vand.u32 65535, %v2969_v19  ;;  %v2738_v15 = vcvt.s32.f32 %v2731_v54 }
 0x2ba   :  { %vm3383_vm8 = vcmp.lt.s32.totalorder %v3382_v53, 0  ;;  %v2942_v62 = vshrl.u32 %v7045_v27, %v6404_v8  ;;  %v2979_v57 = vmul.u32 %v2977_v3, %v2975_v17  ;;  %v2736_v35 = vand.u32 2147483647, %v2735_v36 }
 0x2bb   :  { %v2881_v63 = vsel %vm3383_vm8, 0, %v3382_v53  ;;  %v2983_v2 = vshll.u32 %v2980_v45, 16  ;;  %v3002_v46 = vmul.u32 %v3000_v28, %v2975_v17  ;;  %v2866_v29 = vadd.s32 %v6382_v60, %v6380_v7 }
 0x2bc   :  { %v2886_v13 = vsub.s32 4294967266, %v2881_v63  ;;  %v2982_v50 = vmul.u32 %v2978_v26, %v2976_v1  ;;  %v3387_v41 = vadd.s32 4294967169, %v3084_v9  ;;  %v2963_v48 = vsel %vm2961_vm0, %v2951_v31, 2102212464 }
 0x2bd   :  { %v2985_v19 = vshll.u32 %v2981_v56, 16  ;;  %v3001_v54 = vmul.u32 %v2999_v5, %v2975_v17  ;;  %v3003_v30 = vmul.u32 %v2999_v5, %v2976_v1  ;;  %v2882_v20 = vsub.s32 32, %v2881_v63 }
 0x2be   :  { %v2887_v38 = vadd.s32 127, %v2886_v13  ;;  %v2962_v8 = vsel %vm2958_vm11, %v2942_v62, %v6431_v43  ;;  %vm2987_vm2 = vc.u32 %v2979_v57, %v2983_v2  ;;  %v2989_v3 = vadd.s32 %v2983_v2, %v2979_v57 }
 0x2bf   :  { %v2988_v36 = vsel %vm2987_vm2, 1, %v7050_v25  ;;  %v3004_v7 = vmul.u32 %v3000_v28, %v2976_v1  ;;  %v3005_v60 = vshll.u32 %v3002_v46, 16  ;;  %v2883_v26 = vshll.u32 %v6452_v24, %v2881_v63  ;;  %v7224_v1 = vld [vmem:[#allocation13_spill] sm:$0xff] }
 0x2c0   :  { %v2964_v31 = vsel %vm2960_vm14, %v6433_v33, %v2963_v48  ;;  %v2990_v17 = vadd.s32 %v2988_v36, %v2982_v50  ;;  %v3090_v53 = vadd.s32 1, %v3387_v41  ;;  %v2984_v9 = vshrl.u32 %v2980_v45, 16 }
 0x2c1   :  { %vm2991_vm7 = vc.u32 %v2989_v3, %v2985_v19  ;;  %v3007_v5 = vshll.u32 %v3003_v30, 16  ;;  %vm3009_vm3 = vc.u32 %v3001_v54, %v3005_v60  ;;  %v2884_v13 = vshrl.u32 %v2866_v29, %v2882_v20 }
 0x2c2   :  { %v2888_v43 = vshll.u32 %v2887_v38, 23  ;;  %v2992_v62 = vsel %vm2991_vm7, 1, %v7050_v25  ;;  %v3010_v57 = vsel %vm3009_vm3, 1, %v7050_v25  ;;  %vm2620_vm13 = vcmp.lt.s32.totalorder %v7224_v1, 0 }
 0x2c3   :  { %v2986_v28 = vshrl.u32 %v2981_v56, 16  ;;  %v2994_v24 = vadd.s32 %v2992_v62, %v2990_v17  ;;  %v3011_v63 = vadd.s32 %v3005_v60, %v3001_v54  ;;  %v3012_v2 = vadd.s32 %v3010_v57, %v3004_v7 }
 0x2c4   :  { %v2739_v34 = vmul.f32 %v2738_v15, %v2736_v35  ;;  %v2965_v48 = vsel %vm2959_vm4, %v2962_v8, %v2964_v31  ;;  %v6993_v33 = vand.u32 2147483647, %v7223_v61  ;;  %vm3091_vm1 = vcmp.gt.s32.totalorder %v3090_v53, 0 }
 0x2c5   :  { %v2995_v45 = vadd.s32 %v2994_v24, %v2984_v9  ;;  %v3006_v20 = vshrl.u32 %v3002_v46, 16  ;;  %vm3013_vm15 = vc.u32 %v3011_v63, %v3007_v5  ;;  %v3092_v38 = vsel %vm3091_vm1, %v3090_v53, 0 }
 0x2c6   :  { %v2885_v29 = vor.u32 %v2884_v13, %v2883_v26  ;;  %v2889_v50 = vor.u32 4788187, %v2888_v43  ;;  %v3014_v41 = vsel %vm3013_vm15, 1, %v7050_v25  ;;  %v3094_v19 = vand.u32 31, %v3092_v38 }
 0x2c7   :  { %v6513_v56 = vadd.s32 %v2995_v45, %v2986_v28  ;;  %v3008_v54 = vshrl.u32 %v3003_v30, 16  ;;  %v6515_v36 = vadd.s32 %v3011_v63, %v3007_v5  ;;  %v3016_v15 = vadd.s32 %v3014_v41, %v3012_v2 }
 0x2c8   :  { %v6518_v40 = vadd.f32 1.0, %v6448_v52  ;;  %v7225_v35 = vsub.s32 4, %v6171_v16  ;;  %v7226_v8 = vand.u32 2147483647, %v7224_v1  ;;  %v6533_v30 = vsub.s32 32, %v3094_v19 }
 0x2c9   :  { %v6537_v7 = vmul.f32 %v6484_v10, %v6314_v6  ;;  %v6541_v52 = vmul.f32 %v6490_v58, %v6490_v58  ;;  %v3017_v60 = vadd.s32 %v3016_v15, %v3006_v20  ;;  %v2740_v26 = vxor.u32 2147483648, %v2739_v34 }
 0x2ca   :  { %v6525_v46 = vsel %vm2466_vm6, %v7225_v35, %v6171_v16  ;;  %vm6529_vm9 = vcmp.le.f32.partialorder %v7226_v8, 0.7853982  ;;  %v3087_v16 = vand.u32 8388607, %v6993_v33  ;;  %v2890_v31 = vand.u32 2147483647, %v2889_v50 }
 0x2cb   :  { %v2892_v17 = vcvt.s32.f32 %v2885_v29  ;;  %v3019_v53 = vmul.u32 %v6459_v22, %v2965_v48  ;;  %v3018_v9 = vadd.s32 %v3017_v60, %v3008_v54  ;;  %vm3021_vm5 = vc.u32 %v6513_v56, %v6515_v36 }
 0x2cc   :  { %v3100_v6 = vshll.u32 %v7068_v47, %v3094_v19  ;;  %v3106_v10 = vshll.u32 %v7067_v39, %v3094_v19  ;;  %v3101_v5 = vshrl.u32 %v7069_v37, %v6533_v30  ;;  %v3103_v13 = vshll.u32 %v7069_v37, %v3094_v19 }
 0x2cd   :  { %v3104_v43 = vshrl.u32 %v7067_v39, %v6533_v30  ;;  %v3107_v62 = vshrl.u32 %v7051_v51, %v6533_v30  ;;  %vm2459_vm6 = vcmp.eq.s32.totalorder %v6443_v21, 2  ;;  %v3022_v22 = vadd.s32 1, %v3018_v9 }
 0x2ce   :  { %v6558_v57 = vshrl.u32 %v3092_v38, 5  ;;  %v3109_v28 = vshll.u32 %v7051_v51, %v3094_v19  ;;  %v3110_v24 = vshrl.u32 %v7127_v11, %v6533_v30  ;;  %v2741_v63 = vsel %vm2620_vm13, %v2740_v26, %v2739_v34 }
 0x2cf   :  { %v3088_v37 = vor.u32 8388608, %v3087_v16  ;;  %v3097_v2 = vshll.u32 %v7045_v27, %v3094_v19  ;;  %v3098_v39 = vshrl.u32 %v7068_v47, %v6533_v30  ;;  %v2893_v48 = vmul.f32 %v2892_v17, %v2890_v31 }
 0x2d0   :  { %v3023_v45 = vsel %vm3021_vm5, %v3022_v22, %v3018_v9  ;;  %v3108_v20 = vor.u32 %v3107_v62, %v3106_v10  ;;  %v3111_v38 = vor.u32 %v3110_v24, %v3109_v28  ;;  %v2460_v51 = vxor.u32 2147483648, %v6518_v40 }
 0x2d1   :  { %v3024_v29 = vadd.s32 %v3023_v45, %v3019_v53  ;;  %v6572_v11 = vor.u32 %v3101_v5, %v3100_v6  ;;  %v6574_v50 = vor.u32 %v3104_v43, %v3103_v13  ;;  %v6579_v34 = vsel %vm6529_vm9, %v7224_v1, %v2741_v63 }
 0x2d2   :  { %7229 = vst [vmem:[#allocation25_spill] sm:$0xff] %v6579_v34  ;;  %vm2774_vm11 = vcmp.lt.s32.totalorder %v7207_v49, 0  ;;  %vm3112_vm0 = vcmp.lt.s32.totalorder %v6558_v57, 1  ;;  %vm3115_vm14 = vcmp.lt.s32.totalorder %v6558_v57, 4  ;;  %v2600_v47 = vmul.f32 -0.00019511016, %v6541_v52 }
 0x2d3   :  { %v3025_v41 = vadd.s32 536870912, %v3024_v29  ;;  %v6585_v19 = vor.u32 %v3098_v39, %v3097_v2  ;;  %vm3114_vm4 = vcmp.lt.s32.totalorder %v6558_v57, 3  ;;  %v2894_v54 = vxor.u32 2147483648, %v2893_v48 }
 0x2d4   :  { %v3121_v15 = vsel %vm3115_vm14, %v3108_v20, 920167782  ;;  %v3125_v35 = vsel %vm3115_vm14, %v3111_v38, 1326507024  ;;  %v6592_v8 = vshll.u32 %v3088_v37, 8  ;;  %v6596_v60 = vmul.f32 %v6579_v34, %v6579_v34 }
 0x2d5   :  { %v6598_v16 = vshrl.u32 %v3025_v41, 30  ;;  %vm3113_vm10 = vcmp.lt.s32.totalorder %v6558_v57, 2  ;;  %v3124_v26 = vsel %vm3112_vm0, %v6572_v11, %v6574_v50  ;;  %v2593_v17 = vmul.f32 -0.001358992, %v6541_v52 }
 0x2d6   :  { %v7231_v53 = vand.u32 2147483647, %v7207_v49  ;;  %v7232_v9 = vmov 0  ;;  %v3126_v6 = vsel %vm3114_vm4, %v3108_v20, %v3125_v35  ;;  %v2601_v10 = vadd.f32 0.008332121, %v2600_v47 }
 0x2d7   :  { %7230 = vst [vmem:[#allocation45_spill] sm:$0xff] %v6598_v16  ;;  %v3027_v5 = vshll.u32 %v6598_v16, 30  ;;  %v3120_v13 = vsel %vm3112_vm0, %v6585_v19, %v6572_v11  ;;  %v3122_v43 = vsel %vm3114_vm4, %v6574_v50, %v3121_v15  ;;  %v2895_v62 = vsel %vm2774_vm11, %v2894_v54, %v2893_v48 }
 0x2d8   :  { %vm6611_vm8 = vcmp.le.f32.partialorder %v7231_v53, 0.7853982  ;;  %v3127_v22 = vsel %vm3113_vm10, %v3124_v26, %v3126_v6  ;;  %v3129_v28 = vand.u32 65535, %v6592_v8  ;;  %v3130_v24 = vshrl.u32 %v6592_v8, 16 }
 0x2d9   :  { %v7233_v9 = vsel %vm6611_vm8, 4294967295, %v7232_v9  ;;  %v6635_v37 = vsel %vm2459_vm6, %v2460_v51, %v6537_v7  ;;  %v2754_v2 = vmul.f32 -0.00019511016, %v6596_v60  ;;  %v3028_v39 = vsub.s32 %v3024_v29, %v3027_v5 }
 0x2da   :  { %7234 = vst [vmem:[#allocation19_spill] sm:$0xff] %v7233_v9  ;;  %v2594_v45 = vadd.f32 0.041655596, %v2593_v17  ;;  %v3123_v48 = vsel %vm3113_vm10, %v3120_v13, %v3122_v43  ;;  %v3131_v20 = vand.u32 65535, %v3127_v22  ;;  %v3132_v38 = vshrl.u32 %v3127_v22, 16 }
 0x2db   :  { %v2602_v47 = vmul.f32 %v2601_v10, %v6541_v52  ;;  %v6644_v41 = vsel %vm6611_vm8, %v7207_v49, %v2895_v62  ;;  %vm3029_vm2 = vcmp.lt.s32.totalorder %v3028_v39, 0  ;;  %v3030_v54 = vsub.s32 0, %v3028_v39 }
 0x2dc   :  { %7235 = vst [vmem:[#allocation13_spill] sm:$0xff] %v6644_v41  ;;  %v2747_v51 = vmul.f32 -0.001358992, %v6596_v60  ;;  %v3133_v15 = vmul.u32 %v3131_v20, %v3129_v28  ;;  %v3134_v35 = vmul.u32 %v3132_v38, %v3129_v28  ;;  %v6647_v29 = vmul.u32 %v3131_v20, %v3130_v24 }
 0x2dd   :  { %v2755_v26 = vadd.f32 0.008332121, %v2754_v2  ;;  %v3031_v17 = vsel %vm3029_vm2, %v3030_v54, %v3028_v39  ;;  %v3153_v53 = vand.u32 65535, %v3123_v48  ;;  %v3154_v6 = vshrl.u32 %v3123_v48, 16 }
 0x2de   :  { %v6651_v10 = vmul.f32 %v6644_v41, %v6644_v41  ;;  %v3032_v5 = vclz %v3031_v17  ;;  %v3136_v13 = vmul.u32 %v3132_v38, %v3130_v24  ;;  %v3137_v43 = vshll.u32 %v3134_v35, 16 }
 0x2df   :  { %v6654_v62 = vmul.f32 %v2594_v45, %v6541_v52  ;;  %v6656_v22 = vadd.f32 -0.16666654, %v2602_v47  ;;  %v3139_v33 = vshll.u32 %v6647_v29, 16  ;;  %v3156_v20 = vmul.u32 %v3154_v6, %v3129_v28 }
 0x2e0   :  { %v2748_v31 = vadd.f32 0.041655596, %v2747_v51  ;;  %v3385_v2 = vadd.s32 4294967294, %v3032_v5  ;;  %vm3141_vm7 = vc.u32 %v3133_v15, %v3137_v43  ;;  %v3143_v54 = vadd.s32 %v3137_v43, %v3133_v15 }
 0x2e1   :  { %vm2456_vm3 = vcmp.eq.s32.totalorder %v6443_v21, 0  ;;  %v2756_v48 = vmul.f32 %v2755_v26, %v6596_v60  ;;  %v3020_v38 = vadd.s32 %v6515_v36, %v6513_v56  ;;  %v3142_v17 = vsel %vm3141_vm7, 1, %v7050_v25 }
 0x2e2   :  { %v3157_v45 = vmul.u32 %v3153_v53, %v3130_v24  ;;  %v2908_v47 = vmul.f32 -0.00019511016, %v6651_v10  ;;  %vm3386_vm1 = vcmp.lt.s32.totalorder %v3385_v2, 0  ;;  %v3096_v63 = vshrl.u32 %v7045_v27, %v6533_v30 }
 0x2e3   :  { %v3144_v51 = vadd.s32 %v3142_v17, %v3136_v13  ;;  %v3035_v5 = vsel %vm3386_vm1, 0, %v3385_v2  ;;  %vm3145_vm15 = vc.u32 %v3143_v54, %v3139_v33  ;;  %v3155_v15 = vmul.u32 %v3153_v53, %v3129_v28 }
 0x2e4   :  { %v3159_v43 = vshll.u32 %v3156_v20, 16  ;;  %v3036_v18 = vsub.s32 32, %v3035_v5  ;;  %v3037_v61 = vshll.u32 %v3028_v39, %v3035_v5  ;;  %v3040_v26 = vsub.s32 4294967266, %v3035_v5 }
 0x2e5   :  { %v3138_v0 = vshrl.u32 %v3134_v35, 16  ;;  %v2901_v56 = vmul.f32 -0.001358992, %v6651_v10  ;;  %v3146_v36 = vsel %vm3145_vm15, 1, %v7050_v25  ;;  %v3158_v42 = vmul.u32 %v3154_v6, %v3130_v24 }
 0x2e6   :  { %v3161_v44 = vshll.u32 %v3157_v45, 16  ;;  %v2909_v41 = vadd.f32 0.008332121, %v2908_v47  ;;  %v3038_v16 = vshrl.u32 %v3020_v38, %v3036_v18  ;;  %v3041_v9 = vadd.s32 127, %v3040_v26 }
 0x2e7   :  { %v3148_v34 = vadd.s32 %v3146_v36, %v3144_v51  ;;  %v3117_v27 = vsel %vm3115_vm14, %v6574_v50, 2102212464  ;;  %v3140_v33 = vshrl.u32 %v6647_v29, 16  ;;  %vm3163_vm5 = vc.u32 %v3155_v15, %v3159_v43 }
 0x2e8   :  { %v3165_v30 = vadd.s32 %v3159_v43, %v3155_v15  ;;  %v3039_v28 = vor.u32 %v3038_v16, %v3037_v61  ;;  %v3042_v39 = vshll.u32 %v3041_v9, 23  ;;  %v3164_v53 = vsel %vm3163_vm5, 1, %v7050_v25 }
 0x2e9   :  { %v3149_v35 = vadd.s32 %v3148_v34, %v3138_v0  ;;  %vm2301_vm6 = vcmp.lt.s32.totalorder %v6329_v4, 2  ;;  %v3116_v18 = vsel %vm3112_vm0, %v3096_v63, %v6585_v19  ;;  %v3160_v24 = vshrl.u32 %v3156_v20, 16 }
 0x2ea   :  { %v3166_v6 = vadd.s32 %v3164_v53, %v3158_v42  ;;  %vm3167_vm2 = vc.u32 %v3165_v30, %v3161_v44  ;;  %vm2455_vm14 = vcmp.lt.s32.totalorder %v6443_v21, 2  ;;  %v3043_v50 = vor.u32 4788187, %v3042_v39 }
 0x2eb   :  { %v3046_v29 = vcvt.s32.f32 %v3039_v28  ;;  %v3118_v61 = vsel %vm3114_vm4, %v6572_v11, %v3117_v27  ;;  %v3168_v0 = vsel %vm3167_vm2, 1, %v7050_v25  ;;  %v2902_v34 = vadd.f32 0.041655596, %v2901_v56 }
 0x2ec   :  { %v2910_v16 = vmul.f32 %v2909_v41, %v6651_v10  ;;  %v3162_v9 = vshrl.u32 %v3157_v45, 16  ;;  %v3170_v13 = vadd.s32 %v3168_v0, %v3166_v6  ;;  %v7236_v19 = vxor.u32 2147483648, %v6537_v7  ;;  %v7241_v0 = vld [vmem:[#allocation25_spill] sm:$0xff] }
 0x2ed   :  { %v3044_v63 = vand.u32 2147483647, %v3043_v50  ;;  %v6689_v20 = vadd.s32 %v3149_v35, %v3140_v33  ;;  %v6691_v2 = vadd.s32 %v3165_v30, %v3161_v44  ;;  %v2749_v11 = vmul.f32 %v2748_v31, %v6596_v60 }
 0x2ee   :  { %v2458_v42 = vsel %vm2456_vm3, %v6518_v40, %v7236_v19  ;;  %v2757_v54 = vadd.f32 -0.16666654, %v2756_v48  ;;  %v3119_v25 = vsel %vm3113_vm10, %v3116_v18, %v3118_v61  ;;  %v3171_v41 = vadd.s32 %v3170_v13, %v3160_v24  ;;  %v7243_v13 = vld [vmem:[#allocation45_spill] sm:$0xff] }
 0x2ef   :  { %v2596_v38 = vadd.f32 -0.4999988, %v6654_v62  ;;  %v2604_v7 = vmul.f32 %v6656_v22, %v6541_v52  ;;  %v2742_v17 = vsub.s32 4, %v6256_v14  ;;  %v3047_v40 = vmul.f32 %v3046_v29, %v3044_v63 }
 0x2f0   :  { %v2903_v45 = vmul.f32 %v2902_v34, %v6651_v10  ;;  %v2911_v47 = vadd.f32 -0.16666654, %v2910_v16  ;;  %vm2928_vm0 = vcmp.lt.s32.totalorder %v7218_v12, 0  ;;  %v3172_v44 = vadd.s32 %v3171_v41, %v3162_v9 }
 0x2f1   :  { %v7237_v31 = vand.u32 2147483647, %v7218_v12  ;;  %v3048_v48 = vxor.u32 2147483648, %v3047_v40  ;;  %v3173_v62 = vmul.u32 %v6592_v8, %v3119_v25  ;;  %vm3175_vm10 = vc.u32 %v6689_v20, %v6691_v2 }
 0x2f2   :  { %v7240_v22 = vsel %vm6437_vm12, 0, %v6525_v46  ;;  %v2750_v5 = vadd.f32 -0.4999988, %v2749_v11  ;;  %v2758_v15 = vmul.f32 %v2757_v54, %v6596_v60  ;;  %v3176_v43 = vadd.s32 1, %v3172_v44  ;;  %v7244_v54 = vld [vmem:[#allocation13_spill] sm:$0xff] }
 0x2f3   :  { %vm6704_vm4 = vcmp.le.f32.partialorder %v7237_v31, 0.7853982  ;;  %v6715_v51 = vand.u32 3, %v7240_v22  ;;  %v2597_v26 = vmul.f32 %v2596_v38, %v6541_v52  ;;  %v2743_v56 = vsel %vm2620_vm13, %v2742_v17, %v6256_v14  ;;  %v7246_v31 = vld [vmem:[#allocation11_spill] sm:$0xff] }
 0x2f4   :  { %v2896_v8 = vsub.s32 4, %v6429_v55  ;;  %v3049_v36 = vsel %vm2928_vm0, %v3048_v48, %v3047_v40  ;;  %v2904_v32 = vadd.f32 -0.4999988, %v2903_v45  ;;  %v2912_v46 = vmul.f32 %v2911_v47, %v6651_v10  ;;  %v7245_v40 = vld [vmem:[#allocation10_spill] sm:$0xff] }
 0x2f5   :  { %v6729_v27 = vsel %vm6704_vm4, %v7218_v12, %v3049_v36  ;;  %v3177_v33 = vsel %vm3175_vm10, %v3176_v43, %v3172_v44  ;;  %v6735_v52 = vsel %vm2301_vm6, %v6401_v59, %v6390_v23  ;;  %v2605_v14 = vadd.f32 1.0, %v2604_v7 }
 0x2f6   :  { %v3054_v30 = vmul.f32 %v6729_v27, %v6729_v27  ;;  %v3178_v28 = vadd.s32 %v3177_v33, %v3173_v62  ;;  %v6742_v39 = vsel %vm2455_vm14, %v2458_v42, %v6635_v37  ;;  %v2745_v35 = vsel %vm6529_vm9, 0, %v2743_v56 }
 0x2f7   :  { %v2751_v53 = vmul.f32 %v2750_v5, %v6596_v60  ;;  %v2759_v18 = vadd.f32 1.0, %v2758_v15  ;;  %v2897_v4 = vsel %vm2774_vm11, %v2896_v8, %v6429_v55  ;;  %v2598_v6 = vadd.f32 1.0, %v2597_v26  ;;  %v7247_v5 = vld [vmem:[#allocation12_spill] sm:$0xff] }
 0x2f8   :  { %v3055_v23 = vmul.f32 -0.001358992, %v3054_v30  ;;  %v3062_v59 = vmul.f32 -0.00019511016, %v3054_v30  ;;  %v3179_v24 = vadd.s32 536870912, %v3178_v28  ;;  %vm2610_vm12 = vcmp.eq.s32.totalorder %v6715_v51, 0 }
 0x2f9   :  { %v2905_v21 = vmul.f32 %v2904_v32, %v6651_v10  ;;  %v2913_v37 = vadd.f32 1.0, %v2912_v46  ;;  %v2606_v50 = vmul.f32 %v2605_v14, %v6490_v58  ;;  %v2752_v60 = vadd.f32 1.0, %v2751_v53 }
 0x2fa   :  { %v3056_v3 = vadd.f32 0.041655596, %v3055_v23  ;;  %v3063_v29 = vadd.f32 0.008332121, %v3062_v59  ;;  %v6753_v61 = vshrl.u32 %v3179_v24, 30  ;;  %v2760_v34 = vmul.f32 %v2759_v18, %v7241_v0 }
 0x2fb   :  { %v2762_v16 = vand.u32 3, %v2745_v35  ;;  %v2899_v9 = vsel %vm6611_vm8, 0, %v2897_v4  ;;  %vm2609_vm13 = vcmp.lt.s32.totalorder %v6715_v51, 2  ;;  %v3050_v19 = vsub.s32 4, %v7243_v13 }
 0x2fc   :  { %v3057_v42 = vmul.f32 %v3056_v3, %v3054_v30  ;;  %v3064_v10 = vmul.f32 %v3063_v29, %v3054_v30  ;;  %v3181_v63 = vshll.u32 %v6753_v61, 30  ;;  %vm2613_vm9 = vcmp.eq.s32.totalorder %v6715_v51, 2 }
 0x2fd   :  { %v2614_v58 = vxor.u32 2147483648, %v2598_v6  ;;  %v2906_v11 = vadd.f32 1.0, %v2905_v21  ;;  %v2914_v25 = vmul.f32 %v2913_v37, %v7244_v54  ;;  %v2916_v41 = vand.u32 3, %v2899_v9  ;;  %v7248_v37 = vld [vmem:[#allocation20_spill] sm:$0xff]  ;;  %v7255_v54 = vld [vmem:[#allocation17_spill] sm:$0xff] }
 0x2fe   :  { %v3058_v38 = vadd.f32 -0.4999988, %v3057_v42  ;;  %v3065_v7 = vadd.f32 -0.16666654, %v3064_v10  ;;  %v3182_v17 = vsub.s32 %v3178_v28, %v3181_v63  ;;  %vm2299_vm11 = vweird.f32 %v7245_v40 }
 0x2ff   :  { %v2611_v45 = vxor.u32 2147483648, %v2606_v50  ;;  %vm2764_vm8 = vcmp.eq.s32.totalorder %v2762_v16, 0  ;;  %v2765_v47 = vxor.u32 2147483648, %v2760_v34  ;;  %v2768_v44 = vxor.u32 2147483648, %v2752_v60 }
 0x300   :  { %vm2453_vm7 = vweird.f32 %v7246_v31  ;;  %v3051_v48 = vsel %vm2928_vm0, %v3050_v19, %v7243_v13  ;;  %v3066_v62 = vmul.f32 %v3065_v7, %v3054_v30  ;;  %vm3183_vm3 = vcmp.lt.s32.totalorder %v3182_v17, 0  ;;  %v7260_v31 = vld [vmem:[#allocation37_spill] sm:$0xff] }
 0x301   :  { %v3184_v22 = vsub.s32 0, %v3182_v17  ;;  %vm2607_vm1 = vweird.f32 %v7247_v5  ;;  %vm2767_vm15 = vcmp.eq.s32.totalorder %v2762_v16, 2  ;;  %v2919_v15 = vxor.u32 2147483648, %v2914_v25  ;;  %v7263_v5 = vld [vmem:[#allocation16_spill] sm:$0xff] }
 0x302   :  { %v2922_v43 = vxor.u32 2147483648, %v2906_v11  ;;  %v3059_v26 = vmul.f32 %v3058_v38, %v3054_v30  ;;  %vm2918_vm5 = vcmp.eq.s32.totalorder %v2916_v41, 0  ;;  %vm2921_vm6 = vcmp.eq.s32.totalorder %v2916_v41, 2  ;;  %v7257_v38 = vld [vmem:[#allocation21_spill] sm:$0xff] }
 0x303   :  { %v3067_v56 = vadd.f32 1.0, %v3066_v62  ;;  %v3185_v8 = vsel %vm3183_vm3, %v3184_v22, %v3182_v17  ;;  %v2612_v36 = vsel %vm2610_vm12, %v2598_v6, %v2611_v45  ;;  %v2615_v32 = vsel %vm2613_vm9, %v2614_v58, %v2606_v50  ;;  %v7253_v58 = vld [vmem:[#allocation43_spill] sm:$0xff]  ;;  %v7258_v45 = vld [vmem:[#allocation28_spill] sm:$0xff] }
 0x304   :  { %v3053_v46 = vsel %vm6704_vm4, 0, %v3051_v48  ;;  %v3186_v33 = vclz %v3185_v8  ;;  %vm2763_vm2 = vcmp.lt.s32.totalorder %v2762_v16, 2  ;;  %v2766_v14 = vsel %vm2764_vm8, %v2752_v60, %v2765_v47  ;;  %v7259_v47 = vld [vmem:[#allocation38_spill] sm:$0xff]  ;;  %v7262_v22 = vld [vmem:[#allocation36_spill] sm:$0xff] }
 0x305   :  { %v2769_v28 = vsel %vm2767_vm15, %v2768_v44, %v2760_v34  ;;  %vm2917_vm14 = vcmp.lt.s32.totalorder %v2916_v41, 2  ;;  %v2920_v30 = vsel %vm2918_vm5, %v2906_v11, %v2919_v15  ;;  %v2923_v35 = vsel %vm2921_vm6, %v2922_v43, %v2914_v25  ;;  %v7254_v11 = vld [vmem:[#allocation34_spill] sm:$0xff]  ;;  %v7256_v41 = vld [vmem:[#allocation35_spill] sm:$0xff]  ;;  %v7264_v43 = vld [vmem:[#allocation29_spill] sm:$0xff] }
 0x306   :  { %v3060_v53 = vadd.f32 1.0, %v3059_v26  ;;  %v3388_v18 = vadd.s32 4294967294, %v3186_v33  ;;  %vm2761_vm0 = vweird.f32 %v7224_v1  ;;  %v3068_v4 = vmul.f32 %v3067_v56, %v6729_v27  ;;  %v7252_v1 = vld [vmem:[#allocation26_spill] sm:$0xff] }
 0x307   :  { %v6778_v23 = vand.u32 3, %v3053_v46  ;;  %v3204_v59 = vsub.s32 4, %v6753_v61  ;;  %v2616_v57 = vsel %vm2609_vm13, %v2612_v36, %v2615_v32  ;;  %v2770_v24 = vsel %vm2763_vm2, %v2766_v14, %v2769_v28  ;;  %v7261_v48 = vld [vmem:[#allocation22_spill] sm:$0xff]  ;;  %v7267_v36 = vld [vmem:[#allocation23_spill] sm:$0xff]  ;;  %v7268_v46 = vld [vmem:[#allocation40_spill] sm:$0xff] }
 0x308   :  { %v3174_v6 = vadd.s32 %v6691_v2, %v6689_v20  ;;  %vm3389_vm4 = vcmp.lt.s32.totalorder %v3388_v18, 0  ;;  %vm2915_vm10 = vweird.f32 %v7207_v49  ;;  %v2924_v21 = vsel %vm2917_vm14, %v2920_v30, %v2923_v35  ;;  %v7265_v26 = vld [vmem:[#allocation18_spill] sm:$0xff]  ;;  %v7269_v28 = vld [vmem:[#allocation44_spill] sm:$0xff] }
 0x309   :  { %vm3082_vm12 = vcmp.lt.s32.totalorder %v7248_v37, 0  ;;  %v3189_v50 = vsel %vm3389_vm4, 0, %v3388_v18  ;;  %v3076_v3 = vxor.u32 2147483648, %v3060_v53  ;;  %v2309_v51 = vsel %vm2299_vm11, nan, %v6735_v52  ;;  %v7266_v8 = vld [vmem:[#allocation30_spill] sm:$0xff]  ;;  %v7271_v18 = vld [vmem:[#allocation15_spill] sm:$0xff] }
 0x30a   :  { %v3190_v27 = vsub.s32 32, %v3189_v50  ;;  %v3191_v29 = vshll.u32 %v3182_v17, %v3189_v50  ;;  %v3194_v60 = vsub.s32 4294967266, %v3189_v50  ;;  %v3073_v0 = vxor.u32 2147483648, %v3068_v4  ;;  %v7270_v35 = vld [vmem:[#allocation42_spill] sm:$0xff] }
 0x30b   :  { %vm3075_vm13 = vcmp.eq.s32.totalorder %v6778_v23, 2  ;;  %v6794_v20 = vsel %vm3082_vm12, %v3204_v59, %v6753_v61  ;;  %v2463_v2 = vsel %vm2453_vm7, nan, %v6742_v39  ;;  %vm3072_vm9 = vcmp.eq.s32.totalorder %v6778_v23, 0  ;;  %v7272_v59 = vld [vmem:[#allocation39_spill] sm:$0xff] }
 0x30c   :  { %v3192_v34 = vshrl.u32 %v3174_v6, %v3190_v27  ;;  %v3195_v16 = vadd.s32 127, %v3194_v60  ;;  %v2617_v55 = vsel %vm2607_vm1, nan, %v2616_v57  ;;  %v2771_v52 = vsel %vm2761_vm0, nan, %v2770_v24  ;;  %v7273_v57 = vld [vmem:[#allocation24_spill] sm:$0xff]  ;;  %v7274_v6 = vld [vmem:[#allocation31_spill] sm:$0xff] }
 0x30d   :  { %v2925_v9 = vsel %vm2915_vm10, nan, %v2924_v21  ;;  %v7249_v61 = vand.u32 2147483647, %v7248_v37  ;;  %v6812_v39 = vsel %vm3075_vm13, %v3076_v3, %v3068_v4  ;;  %v6817_v63 = vsel %vm3072_vm9, %v3060_v53, %v3073_v0 }
 0x30e   :  { %v3193_v19 = vor.u32 %v3192_v34, %v3191_v29  ;;  %v3196_v42 = vshll.u32 %v3195_v16, 23  ;;  %v3235_v49 = vmul.f32 %v7253_v58, %v7252_v1  ;;  %v3236_v25 = vmul.f32 %v7255_v54, %v7254_v11  ;;  %v7275_v54 = vld [vmem:[#allocation32_spill] sm:$0xff] }
 0x30f   :  { %vm6808_vm11 = vcmp.le.f32.partialorder %v7249_v61, 0.7853982  ;;  %v3237_v7 = vmul.f32 %v7257_v38, %v7256_v41  ;;  %v3238_v44 = vmul.f32 %v7259_v47, %v7258_v45  ;;  %v3239_v62 = vmul.f32 %v7261_v48, %v7260_v31 }
 0x310   :  { %v3207_v10 = vsel %vm6808_vm11, 0, %v6794_v20  ;;  %v3197_v17 = vor.u32 4788187, %v3196_v42  ;;  %v3200_v40 = vcvt.s32.f32 %v3193_v19  ;;  %v3234_v15 = vmul.f32 %v7263_v5, %v7262_v22 }
 0x311   :  { %v3240_v56 = vmul.f32 %v7265_v26, %v7264_v43  ;;  %v3241_v32 = vmul.f32 %v7267_v36, %v7266_v8  ;;  %v3243_v33 = vmul.f32 %v2309_v51, %v7268_v46  ;;  %v3244_v30 = vmul.f32 %v2463_v2, %v7269_v28  ;;  %v3266_v8 = vld [vmem:[#allocation4] sm:$0xff] }
 0x312   :  { %v3198_v14 = vand.u32 2147483647, %v3197_v17  ;;  %v3245_v53 = vmul.f32 %v2617_v55, %v7270_v35  ;;  %v3246_v4 = vmul.f32 %v2771_v52, %v7271_v18  ;;  %v3242_v24 = vmul.f32 %v7273_v57, %v7272_v59  ;;  %v7276_v18 = vld [vmem:[#allocation14_spill] sm:$0xff]  ;;  %v7278_v59 = vld [vmem:[#allocation41_spill] sm:$0xff] }
 0x313   :  { %v3247_v21 = vmul.f32 %v2925_v9, %v7274_v6  ;;  %v3251_v50 = vadd.f32 1.0, %v3235_v49  ;;  %v3252_v3 = vadd.f32 1.0, %v3236_v25  ;;  %v3253_v29 = vadd.f32 1.0, %v3237_v7 }
 0x314   :  { %v3201_v27 = vmul.f32 %v3200_v40, %v3198_v14  ;;  %v3254_v60 = vadd.f32 1.0, %v3238_v44  ;;  %v3255_v0 = vadd.f32 1.0, %v3239_v62  ;;  %v3250_v34 = vadd.f32 1.0, %v3234_v15 }
 0x315   :  { %v3256_v51 = vadd.f32 1.0, %v3240_v56  ;;  %v3257_v16 = vadd.f32 1.0, %v3241_v32  ;;  %v3259_v61 = vadd.f32 1.0, %v3243_v33  ;;  %v3260_v19 = vadd.f32 1.0, %v3244_v30 }
 0x316   :  { %v3202_v2 = vxor.u32 2147483648, %v3201_v27  ;;  %v3261_v55 = vadd.f32 1.0, %v3245_v53  ;;  %v3262_v42 = vadd.f32 1.0, %v3246_v4  ;;  %v3258_v52 = vadd.f32 1.0, %v3242_v24 }
 0x317   :  { %v3263_v1 = vadd.f32 1.0, %v3247_v21  ;;  %v3284_v58 = vrot.slane %v3251_v50, 7  ;;  %v3285_v11 = vrot.slane %v3252_v3, 6  ;;  %vm737_vm8 = vcmp.eq.f32.partialorder %v7275_v54, inf }
 0x318   :  { %vm3071_vm7 = vcmp.lt.s32.totalorder %v6778_v23, 2  ;;  %v3203_v9 = vsel %vm3082_vm12, %v3202_v2, %v3201_v27  ;;  %v3286_v49 = vrot.slane %v3253_v29, 5  ;;  %v3287_v25 = vrot.slane %v3254_v60, 4  ;;  %v7279_v27 = vld [vmem:[#allocation27_spill] sm:$0xff] }
 0x319   :  { %v3288_v41 = vrot.slane %v3255_v0, 3  ;;  %v3206_v38 = vsel %vm6808_vm11, %v7248_v37, %v3203_v9  ;;  %v3289_v7 = vrot.slane %v3256_v51, 2  ;;  %v3290_v17 = vrot.slane %v3257_v16, 1  ;;  %v7280_v16 = vld [vmem:[#allocation33_spill] sm:$0xff] }
 0x31a   :  { %v3291_v40 = vrot.slane %v3259_v61, 7  ;;  %v3208_v45 = vmul.f32 %v3206_v38, %v3206_v38  ;;  %v3292_v47 = vrot.slane %v3260_v19, 6  ;;  %v3293_v44 = vrot.slane %v3261_v55, 5 }
 0x31b   :  { %v3294_v31 = vrot.slane %v3262_v42, 4  ;;  %v3295_v48 = vrot.slane %v3263_v1, 3  ;;  %vm3298_vm3 = vcmask 1040384   ;;  %vm3300_vm1 = vcmask 1042434  }
 0x31c   :  { %vm3302_vm15 = vcmask 1041408   ;;  %v3209_v62 = vmul.f32 -0.001358992, %v3208_v45  ;;  %v3216_v22 = vmul.f32 -0.00019511016, %v3208_v45  ;;  %v3299_v5 = vsel %vm3298_vm3, %v3250_v34, %v3284_v58 }
 0x31d   :  { %v3301_v15 = vsel %vm3300_vm1, %v3285_v11, %v3286_v49  ;;  %vm3304_vm5 = vcmask 1044484   ;;  %vm3306_vm6 = vcmask 1046534   ;;  %vm3308_vm2 = vcmask 1045508  }
 0x31e   :  { %v3303_v43 = vsel %vm3302_vm15, %v3299_v5, %v3301_v15  ;;  %v3210_v26 = vadd.f32 0.041655596, %v3209_v62  ;;  %v3217_v56 = vadd.f32 0.008332121, %v3216_v22  ;;  %v3305_v36 = vsel %vm3304_vm5, %v3287_v25, %v3288_v41 }
 0x31f   :  { %v3307_v32 = vsel %vm3306_vm6, %v3289_v7, %v3290_v17  ;;  %vm3310_vm14 = vcmask 1043456   ;;  %v3312_v33 = vsel %vm3298_vm3, %v3258_v52, %v3291_v40  ;;  %v3313_v14 = vsel %vm3300_vm1, %v3292_v47, %v3293_v44 }
 0x320   :  { %v3309_v46 = vsel %vm3308_vm2, %v3305_v36, %v3307_v32  ;;  %v3211_v28 = vmul.f32 %v3210_v26, %v3208_v45  ;;  %v3218_v30 = vmul.f32 %v3217_v56, %v3208_v45  ;;  %v3314_v53 = vsel %vm3302_vm15, %v3312_v33, %v3313_v14 }
 0x321   :  { %v3311_v35 = vsel %vm3310_vm14, %v3303_v43, %v3309_v46  ;;  %v7277_v4 = vsub.f32 1.5, %v7276_v18  ;;  %v3315_v24 = vsel %vm3304_vm5, %v3294_v31, %v3295_v48  ;;  %vm739_vm0 = vcmp.eq.f32.partialorder %v7275_v54, 0.0 }
 0x322   :  { %v3321_v6 = vmul.f32 %v3311_v35, %v3266_v8  ;;  %v740_v21 = vand.u32 2147483648, %v7275_v54  ;;  %v3212_v50 = vadd.f32 -0.4999988, %v3211_v28  ;;  %v3219_v3 = vadd.f32 -0.16666654, %v3218_v30 }
 0x323   :  { %v747_v57 = vmul.f32 %v7278_v59, %v7277_v4  ;;  %v738_v29 = vsel %vm737_vm8, %v7275_v54, %v7279_v27  ;;  %vm3069_vm4 = vweird.f32 %v7218_v12  ;;  %v3078_v60 = vsel %vm3071_vm7, %v6817_v63, %v6812_v39 }
 0x324   :  { %v3224_v0 = vand.u32 3, %v3207_v10  ;;  %3323 = vst [vmem:[#allocation7] sm:$0xff] %v3321_v6  ;;  %v3213_v34 = vmul.f32 %v3212_v50, %v3208_v45  ;;  %v3220_v51 = vmul.f32 %v3219_v3, %v3208_v45  ;;  %vm749_vm10 = vcmp.eq.f32.partialorder %v7280_v16, inf }
 0x325   :  { %v748_v61 = vmul.f32 %v747_v57, %v7280_v16  ;;  %v741_v2 = vsel %vm739_vm0, %v740_v21, %v738_v29  ;;  %v3079_v19 = vsel %vm3069_vm4, nan, %v3078_v60  ;;  %v752_v23 = vand.u32 2147483648, %v7280_v16 }
 0x326   :  { %v3214_v12 = vadd.f32 1.0, %v3213_v34  ;;  %v3221_v55 = vadd.f32 1.0, %v3220_v51  ;;  %vm3229_vm12 = vcmp.eq.s32.totalorder %v3224_v0, 2  ;;  %vm751_vm13 = vcmp.eq.f32.partialorder %v7280_v16, 0.0 }
 0x327   :  { %v750_v13 = vsel %vm749_vm10, %v7280_v16, %v748_v61  ;;  %vm3226_vm9 = vcmp.eq.s32.totalorder %v3224_v0, 0  ;;  %v3248_v20 = vmul.f32 %v3079_v19, %v741_v2  ;;  %vm3225_vm11 = vcmp.lt.s32.totalorder %v3224_v0, 2 }
 0x328   :  { %v3222_v39 = vmul.f32 %v3221_v55, %v3206_v38  ;;  %v3230_v63 = vxor.u32 2147483648, %v3214_v12  ;;  %vm3223_vm8 = vweird.f32 %v7248_v37  ;;  %v753_v52 = vsel %vm751_vm13, %v752_v23, %v750_v13  ;;  %v3267_v38 = vld [vmem:[#allocation4 + $0x8] sm:$0xff] }
 0x329   :  { %v3264_v11 = vadd.f32 1.0, %v3248_v20 }
 0x32a   :  { %v3227_v10 = vxor.u32 2147483648, %v3222_v39  ;;  %v3231_v42 = vsel %vm3229_vm12, %v3230_v63, %v3222_v39 }
 0x32b   :  { %v3296_v25 = vrot.slane %v3264_v11, 2 }
 0x32c   :  { %v3228_v1 = vsel %vm3226_vm9, %v3214_v12, %v3227_v10 }
 0x32d   :  { %v3232_v58 = vsel %vm3225_vm11, %v3228_v1, %v3231_v42 }
 0x32e   :  { %v3233_v54 = vsel %vm3223_vm8, nan, %v3232_v58 }
 0x32f   :  { %v3249_v9 = vmul.f32 %v3233_v54, %v753_v52 }
 0x331   :  { %v3265_v49 = vadd.f32 1.0, %v3249_v9 }
 0x333   :  { %v3297_v41 = vrot.slane %v3265_v49, 1 }
 0x335   :  { %v3316_v7 = vsel %vm3306_vm6, %v3296_v25, %v3297_v41 }
 0x336   :  { %v3317_v37 = vsel %vm3308_vm2, %v3315_v24, %v3316_v7 }
 0x337   :  { %v3318_v17 = vsel %vm3310_vm14, %v3314_v53, %v3317_v37 }
 0x338   :  { %v3322_v40 = vmul.f32 %v3318_v17, %v3267_v38 }
 0x33a   :  { %3324 = vst [vmem:[#allocation7 + $0x8] sm:$0xff] %v3322_v40 }
 0x33b   :  { %3335 = dma.vmem_to_hbm [thread:$0]  %s3331_s16, 256, %s3333_s19, [#allocation6]  }
 0x33c   :  { %3513 = dma.done.wait [#allocation6], 256  }
 0x33d   :  { %3514 = vsyncadd [#allocation6], 4294967040 }
 0x33e   :  { %3340 = vsyncpa [#allocation5], 1 }
 0x33f   :  { %3341 = vsyncpa [#allocation6], 1 }

</bundles_post_ra>
